<compile_context>
chip_gen: v7x
topology: tpu7x:2x2x1
jax: 0.10.0
libtpu: 0.0.40
codegen_flags: <defaults>
</compile_context>

<pallas_src>
import functools

import jax
import jax.numpy as jnp
from jax.experimental import pallas as pl
from jax.experimental.pallas import tpu as pltpu


# ------------------------------- Pallas kernel ------------------------------ #

def _transformer_mapper_kernel(
        x_ref, mapw_ref, mapb_ref, pref_ref,
        ln1g_ref, ln1b_ref, wq_ref, wk_ref, wv_ref, pw_ref, pb_ref,
        ln2g_ref, ln2b_ref, fc1w_ref, fc1b_ref, fc2w_ref, fc2b_ref,
        o_ref, h_ref,
        *, num_layers, num_heads, clip_length):
    f32 = jnp.float32
    E = pref_ref.shape[-1]
    Dh = E // num_heads
    scale = Dh ** -0.5

    # ---- TransformerMapper.linear(x).view(clip_length, E) + prefix_const ----
    x_row = x_ref[0]                                       # (1, dim_clip)
    for t in range(clip_length):
        row = jnp.dot(x_row, mapw_ref[t],
                      preferred_element_type=f32) + mapb_ref[t]   # (1, E)
        h_ref[t:t + 1, :] = row
    h_ref[clip_length:, :] = pref_ref[...]                 # prefix_const rows

    h = h_ref[...]                                         # (S, E) residual stream
    S = h.shape[0]

    def layernorm(v, g, b):                                # eps matches nn.LayerNorm
        mu = jnp.mean(v, axis=-1, keepdims=True)
        var = jnp.mean((v - mu) ** 2, axis=-1, keepdims=True)
        return (v - mu) * jax.lax.rsqrt(var + 1e-5) * g + b

    qk_dims = (((1,), (1,)), ((), ()))                     # q · kᵀ (contract head dim)

    for l in range(num_layers):
        # ---- multi-head self-attention (pre-LN, residual), no mask ----
        xn = layernorm(h, ln1g_ref[l], ln1b_ref[l])
        attn_out = jnp.zeros((S, E), f32)
        for hh in range(num_heads):
            idx = l * num_heads + hh
            qh = jnp.dot(xn, wq_ref[idx], preferred_element_type=f32)   # (S, Dh)
            kh = jnp.dot(xn, wk_ref[idx], preferred_element_type=f32)   # (S, Dh)
            vh = jnp.dot(xn, wv_ref[idx], preferred_element_type=f32)   # (S, Dh)
            s = jax.lax.dot_general(qh, kh, qk_dims,
                                    preferred_element_type=f32) * scale  # (S, S)
            s = s - jnp.max(s, axis=-1, keepdims=True)
            p = jnp.exp(s)
            p = p * pl.reciprocal(jnp.sum(p, axis=-1, keepdims=True), approx=True)
            oh = jnp.dot(p, vh, preferred_element_type=f32)              # (S, Dh)
            # per-head slice of the output projection (rows h*Dh:(h+1)*Dh)
            attn_out = attn_out + jnp.dot(oh, pw_ref[idx],
                                          preferred_element_type=f32)    # (S, E)
        h = h + attn_out + pb_ref[l]                       # project bias + residual

        # ---- MLP (pre-LN, residual): Linear -> ReLU -> Linear ----
        xn2 = layernorm(h, ln2g_ref[l], ln2b_ref[l])
        m = jnp.dot(xn2, fc1w_ref[l], preferred_element_type=f32) + fc1b_ref[l]
        m = jnp.maximum(m, 0.0)
        m = jnp.dot(m, fc2w_ref[l], preferred_element_type=f32) + fc2b_ref[l]
        h = h + m

    # out = transformer(prefix)[:, clip_length:]
    o_ref[0] = h[clip_length:, :]


# ------------------------------ Python wrapper ------------------------------ #

def transformer_mapper_forward(params, x, cfg):
    B, C = x.shape
    E = cfg["dim_embedding"]
    CL = cfg["clip_length"]
    P = cfg["prefix_length"]
    L = cfg["num_layers"]
    H = cfg["num_heads"]
    S = CL + P

    kern = functools.partial(_transformer_mapper_kernel,
                             num_layers=L, num_heads=H, clip_length=CL)

    def rep(arr):  # full-array block, grid-invariant (fetched once, kept in VMEM)
        return pl.BlockSpec(arr.shape, lambda b, nd=arr.ndim: (0,) * nd)

    weights = (params["map_w"], params["map_b"], params["prefix_const"],
               params["ln1_g"], params["ln1_b"],
               params["wq"], params["wk"], params["wv"],
               params["pw"], params["pb"],
               params["ln2_g"], params["ln2_b"],
               params["fc1_w"], params["fc1_b"],
               params["fc2_w"], params["fc2_b"])

    x3 = x.reshape(B, 1, C)   # leading batch dim blocked by the grid

    out = pl.pallas_call(
        kern,
        out_shape=jax.ShapeDtypeStruct((B, P, E), jnp.float32),
        grid=(B,),
        in_specs=[pl.BlockSpec((1, 1, C), lambda b: (b, 0, 0))]
                 + [rep(w) for w in weights],
        out_specs=pl.BlockSpec((1, P, E), lambda b: (b, 0, 0)),
        scratch_shapes=[pltpu.VMEM((S, E), jnp.float32)],
        compiler_params=pltpu.CompilerParams(
            dimension_semantics=("parallel",)),
    )(x3, *weights)
    return out


# ------------------------------ Parameter init ------------------------------ #

def init_params(key, cfg):
    E = cfg["dim_embedding"]
    C = cfg["dim_clip"]
    CL = cfg["clip_length"]
    P = cfg["prefix_length"]
    L = cfg["num_layers"]
    H = cfg["num_heads"]
    Dh = E // H
    hid = int(E * cfg["mlp_ratio"])

    def nrm(k, shape, s=0.02):
        return (s * jax.random.normal(k, shape)).astype(jnp.float32)

    ks = iter(jax.random.split(key, 3 + 8 * L))

    # TransformerMapper.linear: dim_clip -> clip_length*E, pre-split per clip row
    lin_w = nrm(next(ks), (C, CL * E))
    lin_b = nrm(next(ks), (CL * E,))
    params = {
        "map_w": lin_w.reshape(C, CL, E).transpose(1, 0, 2),   # (CL, C, E)
        "map_b": lin_b.reshape(CL, 1, E),
        "prefix_const": jax.random.normal(next(ks), (P, E), dtype=jnp.float32),
        "ln1_g": jnp.ones((L, 1, E), jnp.float32),
        "ln1_b": jnp.zeros((L, 1, E), jnp.float32),
        "ln2_g": jnp.ones((L, 1, E), jnp.float32),
        "ln2_b": jnp.zeros((L, 1, E), jnp.float32),
    }

    wq_l, wk_l, wv_l, pw_l, pb_l = [], [], [], [], []
    f1w_l, f1b_l, f2w_l, f2b_l = [], [], [], []
    for _ in range(L):
        wq_full = nrm(next(ks), (E, E))         # to_queries (bias=False)
        wkv_full = nrm(next(ks), (E, 2 * E))    # to_keys_values (bias=False)
        proj_w = nrm(next(ks), (E, E))          # project (bias=True)
        proj_b = nrm(next(ks), (E,))
        fc1_w = nrm(next(ks), (E, hid))
        fc1_b = nrm(next(ks), (hid,))
        fc2_w = nrm(next(ks), (hid, E))
        fc2_b = nrm(next(ks), (E,))
        # head splits matching torch .reshape(b, n, H, Dh) / (b, m, 2, H, Dh)
        wq_l.append(wq_full.reshape(E, H, Dh).transpose(1, 0, 2))          # (H,E,Dh)
        wk_l.append(wkv_full[:, :E].reshape(E, H, Dh).transpose(1, 0, 2))
        wv_l.append(wkv_full[:, E:].reshape(E, H, Dh).transpose(1, 0, 2))
        pw_l.append(proj_w.reshape(H, Dh, E))                               # (H,Dh,E)
        pb_l.append(proj_b.reshape(1, E))
        f1w_l.append(fc1_w)
        f1b_l.append(fc1_b.reshape(1, hid))
        f2w_l.append(fc2_w)
        f2b_l.append(fc2_b.reshape(1, E))

    params.update({
        "wq": jnp.stack(wq_l).reshape(L * H, E, Dh),
        "wk": jnp.stack(wk_l).reshape(L * H, E, Dh),
        "wv": jnp.stack(wv_l).reshape(L * H, E, Dh),
        "pw": jnp.stack(pw_l).reshape(L * H, Dh, E),
        "pb": jnp.stack(pb_l),          # (L, 1, E)
        "fc1_w": jnp.stack(f1w_l),      # (L, E, hid)
        "fc1_b": jnp.stack(f1b_l),      # (L, 1, hid)
        "fc2_w": jnp.stack(f2w_l),      # (L, hid, E)
        "fc2_b": jnp.stack(f2b_l),      # (L, 1, E)
    })
    return params


# ----------------------------------- main ----------------------------------- #

if __name__ == "__main__":
    cfg = dict(
        dim_clip=64,
        dim_embedding=64,
        clip_length=4,
        prefix_length=4,
        num_layers=2,     # TransformerMapper default is 8; kept small for the test
        num_heads=8,      # fixed by TransformerMapper: Transformer(dim_embedding, 8, ...)
        mlp_ratio=2.0,    # Transformer default
    )
    key = jax.random.PRNGKey(0)
    k_par, k_x = jax.random.split(key)

    params = init_params(k_par, cfg)

    B = 2
    x = jax.random.normal(k_x, (B, cfg["dim_clip"]), dtype=jnp.float32)

    out = transformer_mapper_forward(params, x, cfg)
    out = jax.block_until_ready(out)

    assert out.shape == (B, cfg["prefix_length"], cfg["dim_embedding"]), out.shape
    assert bool(jnp.all(jnp.isfinite(out)))
    print("KERNEL_OK")
</pallas_src>

<mosaic_0001>
module attributes {stable_mosaic.version = 11 : i64} {
  func.func @_transformer_mapper_kernel(%arg0: i32, %arg1: memref<1x1x64xf32, #tpu.memory_space<vmem>>, %arg2: memref<4x64x64xf32, #tpu.memory_space<vmem>>, %arg3: memref<4x1x64xf32, #tpu.memory_space<vmem>>, %arg4: memref<4x64xf32, #tpu.memory_space<vmem>>, %arg5: memref<2x1x64xf32, #tpu.memory_space<vmem>>, %arg6: memref<2x1x64xf32, #tpu.memory_space<vmem>>, %arg7: memref<16x64x8xf32, #tpu.memory_space<vmem>>, %arg8: memref<16x64x8xf32, #tpu.memory_space<vmem>>, %arg9: memref<16x64x8xf32, #tpu.memory_space<vmem>>, %arg10: memref<16x8x64xf32, #tpu.memory_space<vmem>>, %arg11: memref<2x1x64xf32, #tpu.memory_space<vmem>>, %arg12: memref<2x1x64xf32, #tpu.memory_space<vmem>>, %arg13: memref<2x1x64xf32, #tpu.memory_space<vmem>>, %arg14: memref<2x64x128xf32, #tpu.memory_space<vmem>>, %arg15: memref<2x1x128xf32, #tpu.memory_space<vmem>>, %arg16: memref<2x128x64xf32, #tpu.memory_space<vmem>>, %arg17: memref<2x1x64xf32, #tpu.memory_space<vmem>>, %arg18: memref<1x4x64xf32, #tpu.memory_space<vmem>>, %arg19: memref<8x64xf32, #tpu.memory_space<vmem>>) attributes {dimension_semantics = [#tpu.dimension_semantics<parallel>], iteration_bounds = array<i64: 2>, scalar_prefetch = 0 : i64, scratch_operands = 1 : i64, tpu.core_type = #tpu.core_type<tc>, window_params = [{transform_indices = @transform_0, window_bounds = array<i64: 1, 1, 64>}, {pipeline_mode = #tpu.pipeline_mode<synchronous>, transform_indices = @transform_1, window_bounds = array<i64: 4, 64, 64>}, {pipeline_mode = #tpu.pipeline_mode<synchronous>, transform_indices = @transform_2, window_bounds = array<i64: 4, 1, 64>}, {pipeline_mode = #tpu.pipeline_mode<synchronous>, transform_indices = @transform_3, window_bounds = array<i64: 4, 64>}, {pipeline_mode = #tpu.pipeline_mode<synchronous>, transform_indices = @transform_4, window_bounds = array<i64: 2, 1, 64>}, {pipeline_mode = #tpu.pipeline_mode<synchronous>, transform_indices = @transform_5, window_bounds = array<i64: 2, 1, 64>}, {pipeline_mode = #tpu.pipeline_mode<synchronous>, transform_indices = @transform_6, window_bounds = array<i64: 16, 64, 8>}, {pipeline_mode = #tpu.pipeline_mode<synchronous>, transform_indices = @transform_7, window_bounds = array<i64: 16, 64, 8>}, {pipeline_mode = #tpu.pipeline_mode<synchronous>, transform_indices = @transform_8, window_bounds = array<i64: 16, 64, 8>}, {pipeline_mode = #tpu.pipeline_mode<synchronous>, transform_indices = @transform_9, window_bounds = array<i64: 16, 8, 64>}, {pipeline_mode = #tpu.pipeline_mode<synchronous>, transform_indices = @transform_10, window_bounds = array<i64: 2, 1, 64>}, {pipeline_mode = #tpu.pipeline_mode<synchronous>, transform_indices = @transform_11, window_bounds = array<i64: 2, 1, 64>}, {pipeline_mode = #tpu.pipeline_mode<synchronous>, transform_indices = @transform_12, window_bounds = array<i64: 2, 1, 64>}, {pipeline_mode = #tpu.pipeline_mode<synchronous>, transform_indices = @transform_13, window_bounds = array<i64: 2, 64, 128>}, {pipeline_mode = #tpu.pipeline_mode<synchronous>, transform_indices = @transform_14, window_bounds = array<i64: 2, 1, 128>}, {pipeline_mode = #tpu.pipeline_mode<synchronous>, transform_indices = @transform_15, window_bounds = array<i64: 2, 128, 64>}, {pipeline_mode = #tpu.pipeline_mode<synchronous>, transform_indices = @transform_16, window_bounds = array<i64: 2, 1, 64>}, {transform_indices = @transform_17, window_bounds = array<i64: 1, 4, 64>}]} {
    %c0 = arith.constant 0 : index
    %c0_0 = arith.constant 0 : index
    %c0_1 = arith.constant 0 : index
    %0 = vector.load %arg1[%c0, %c0_0, %c0_1] : memref<1x1x64xf32, #tpu.memory_space<vmem>>, vector<1x1x64xf32>
    %1 = vector.shape_cast %0 : vector<1x1x64xf32> to vector<1x64xf32>
    %c0_2 = arith.constant 0 : index
    %c0_3 = arith.constant 0 : index
    %c0_4 = arith.constant 0 : index
    %2 = vector.load %arg2[%c0_2, %c0_3, %c0_4] : memref<4x64x64xf32, #tpu.memory_space<vmem>>, vector<1x64x64xf32>
    %3 = vector.shape_cast %2 : vector<1x64x64xf32> to vector<64x64xf32>
    %cst = arith.constant dense<0.000000e+00> : vector<1x64xf32>
    %4 = tpu.matmul %1, %3, %cst {dimension_numbers = #tpu.dot_dimension_numbers<[1], [0], [0], [1], [0, 0, 1, 1], [], []>} : vector<1x64xf32>, vector<64x64xf32>, vector<1x64xf32> -> vector<1x64xf32>
    %c0_5 = arith.constant 0 : index
    %c0_6 = arith.constant 0 : index
    %c0_7 = arith.constant 0 : index
    %5 = vector.load %arg3[%c0_5, %c0_6, %c0_7] : memref<4x1x64xf32, #tpu.memory_space<vmem>>, vector<1x1x64xf32>
    %6 = vector.shape_cast %5 : vector<1x1x64xf32> to vector<1x64xf32>
    %7 = arith.addf %4, %6 : vector<1x64xf32>
    %c0_8 = arith.constant 0 : index
    %c0_9 = arith.constant 0 : index
    %8 = vector.load %arg19[%c0_8, %c0_9] : memref<8x64xf32, #tpu.memory_space<vmem>>, vector<1x64xf32>
    tpu.vector_store %arg19[%c0_8, %c0_9], %7 {strides = array<i32>} : memref<8x64xf32, #tpu.memory_space<vmem>>, vector<1x64xf32>,
    %c1 = arith.constant 1 : index
    %c0_10 = arith.constant 0 : index
    %c0_11 = arith.constant 0 : index
    %9 = vector.load %arg2[%c1, %c0_10, %c0_11] : memref<4x64x64xf32, #tpu.memory_space<vmem>>, vector<1x64x64xf32>
    %10 = vector.shape_cast %9 : vector<1x64x64xf32> to vector<64x64xf32>
    %cst_12 = arith.constant dense<0.000000e+00> : vector<1x64xf32>
    %11 = tpu.matmul %1, %10, %cst_12 {dimension_numbers = #tpu.dot_dimension_numbers<[1], [0], [0], [1], [0, 0, 1, 1], [], []>} : vector<1x64xf32>, vector<64x64xf32>, vector<1x64xf32> -> vector<1x64xf32>
    %c1_13 = arith.constant 1 : index
    %c0_14 = arith.constant 0 : index
    %c0_15 = arith.constant 0 : index
    %12 = vector.load %arg3[%c1_13, %c0_14, %c0_15] : memref<4x1x64xf32, #tpu.memory_space<vmem>>, vector<1x1x64xf32>
    %13 = vector.shape_cast %12 : vector<1x1x64xf32> to vector<1x64xf32>
    %14 = arith.addf %11, %13 : vector<1x64xf32>
    %c1_16 = arith.constant 1 : index
    %c0_17 = arith.constant 0 : index
    %15 = vector.load %arg19[%c1_16, %c0_17] : memref<8x64xf32, #tpu.memory_space<vmem>>, vector<1x64xf32>
    tpu.vector_store %arg19[%c1_16, %c0_17], %14 {strides = array<i32>} : memref<8x64xf32, #tpu.memory_space<vmem>>, vector<1x64xf32>,
    %c2 = arith.constant 2 : index
    %c0_18 = arith.constant 0 : index
    %c0_19 = arith.constant 0 : index
    %16 = vector.load %arg2[%c2, %c0_18, %c0_19] : memref<4x64x64xf32, #tpu.memory_space<vmem>>, vector<1x64x64xf32>
    %17 = vector.shape_cast %16 : vector<1x64x64xf32> to vector<64x64xf32>
    %cst_20 = arith.constant dense<0.000000e+00> : vector<1x64xf32>
    %18 = tpu.matmul %1, %17, %cst_20 {dimension_numbers = #tpu.dot_dimension_numbers<[1], [0], [0], [1], [0, 0, 1, 1], [], []>} : vector<1x64xf32>, vector<64x64xf32>, vector<1x64xf32> -> vector<1x64xf32>
    %c2_21 = arith.constant 2 : index
    %c0_22 = arith.constant 0 : index
    %c0_23 = arith.constant 0 : index
    %19 = vector.load %arg3[%c2_21, %c0_22, %c0_23] : memref<4x1x64xf32, #tpu.memory_space<vmem>>, vector<1x1x64xf32>
    %20 = vector.shape_cast %19 : vector<1x1x64xf32> to vector<1x64xf32>
    %21 = arith.addf %18, %20 : vector<1x64xf32>
    %c2_24 = arith.constant 2 : index
    %c0_25 = arith.constant 0 : index
    %22 = vector.load %arg19[%c2_24, %c0_25] : memref<8x64xf32, #tpu.memory_space<vmem>>, vector<1x64xf32>
    tpu.vector_store %arg19[%c2_24, %c0_25], %21 {strides = array<i32>} : memref<8x64xf32, #tpu.memory_space<vmem>>, vector<1x64xf32>,
    %c3 = arith.constant 3 : index
    %c0_26 = arith.constant 0 : index
    %c0_27 = arith.constant 0 : index
    %23 = vector.load %arg2[%c3, %c0_26, %c0_27] : memref<4x64x64xf32, #tpu.memory_space<vmem>>, vector<1x64x64xf32>
    %24 = vector.shape_cast %23 : vector<1x64x64xf32> to vector<64x64xf32>
    %cst_28 = arith.constant dense<0.000000e+00> : vector<1x64xf32>
    %25 = tpu.matmul %1, %24, %cst_28 {dimension_numbers = #tpu.dot_dimension_numbers<[1], [0], [0], [1], [0, 0, 1, 1], [], []>} : vector<1x64xf32>, vector<64x64xf32>, vector<1x64xf32> -> vector<1x64xf32>
    %c3_29 = arith.constant 3 : index
    %c0_30 = arith.constant 0 : index
    %c0_31 = arith.constant 0 : index
    %26 = vector.load %arg3[%c3_29, %c0_30, %c0_31] : memref<4x1x64xf32, #tpu.memory_space<vmem>>, vector<1x1x64xf32>
    %27 = vector.shape_cast %26 : vector<1x1x64xf32> to vector<1x64xf32>
    %28 = arith.addf %25, %27 : vector<1x64xf32>
    %c3_32 = arith.constant 3 : index
    %c0_33 = arith.constant 0 : index
    %29 = vector.load %arg19[%c3_32, %c0_33] : memref<8x64xf32, #tpu.memory_space<vmem>>, vector<1x64xf32>
    tpu.vector_store %arg19[%c3_32, %c0_33], %28 {strides = array<i32>} : memref<8x64xf32, #tpu.memory_space<vmem>>, vector<1x64xf32>,
    %c0_34 = arith.constant 0 : index
    %c0_35 = arith.constant 0 : index
    %30 = vector.load %arg4[%c0_34, %c0_35] : memref<4x64xf32, #tpu.memory_space<vmem>>, vector<4x64xf32>
    %c4 = arith.constant 4 : index
    %c0_36 = arith.constant 0 : index
    %31 = vector.load %arg19[%c4, %c0_36] : memref<8x64xf32, #tpu.memory_space<vmem>>, vector<4x64xf32>
    tpu.vector_store %arg19[%c4, %c0_36], %30 {strides = array<i32>} : memref<8x64xf32, #tpu.memory_space<vmem>>, vector<4x64xf32>,
    %c0_37 = arith.constant 0 : index
    %c0_38 = arith.constant 0 : index
    %32 = vector.load %arg19[%c0_37, %c0_38] : memref<8x64xf32, #tpu.memory_space<vmem>>, vector<8x64xf32>
    %c0_39 = arith.constant 0 : index
    %c0_40 = arith.constant 0 : index
    %c0_41 = arith.constant 0 : index
    %33 = vector.load %arg5[%c0_39, %c0_40, %c0_41] : memref<2x1x64xf32, #tpu.memory_space<vmem>>, vector<1x1x64xf32>
    %34 = vector.shape_cast %33 : vector<1x1x64xf32> to vector<1x64xf32>
    %c0_42 = arith.constant 0 : index
    %c0_43 = arith.constant 0 : index
    %c0_44 = arith.constant 0 : index
    %35 = vector.load %arg6[%c0_42, %c0_43, %c0_44] : memref<2x1x64xf32, #tpu.memory_space<vmem>>, vector<1x1x64xf32>
    %36 = vector.shape_cast %35 : vector<1x1x64xf32> to vector<1x64xf32>
    %cst_45 = arith.constant dense<0.000000e+00> : vector<8xf32>
    %37 = vector.multi_reduction <add>, %32, %cst_45 [1] : vector<8x64xf32> to vector<8xf32>
    %38 = vector.shape_cast %37 : vector<8xf32> to vector<8x1xf32>
    %cst_46 = arith.constant 6.400000e+01 : f32
    %39 = vector.broadcast %cst_46 : f32 to vector<8x1xf32>
    %40 = arith.divf %38, %39 : vector<8x1xf32>
    %41 = vector.broadcast %40 : vector<8x1xf32> to vector<8x64xf32>
    %42 = arith.subf %32, %41 : vector<8x64xf32>
    %43 = arith.mulf %42, %42 : vector<8x64xf32>
    %cst_47 = arith.constant dense<0.000000e+00> : vector<8xf32>
    %44 = vector.multi_reduction <add>, %43, %cst_47 [1] : vector<8x64xf32> to vector<8xf32>
    %45 = vector.shape_cast %44 : vector<8xf32> to vector<8x1xf32>
    %cst_48 = arith.constant 6.400000e+01 : f32
    %46 = vector.broadcast %cst_48 : f32 to vector<8x1xf32>
    %47 = arith.divf %45, %46 : vector<8x1xf32>
    %48 = vector.broadcast %40 : vector<8x1xf32> to vector<8x64xf32>
    %49 = arith.subf %32, %48 : vector<8x64xf32>
    %cst_49 = arith.constant 9.99999974E-6 : f32
    %50 = vector.broadcast %cst_49 : f32 to vector<8x1xf32>
    %51 = arith.addf %47, %50 : vector<8x1xf32>
    %52 = math.rsqrt %51 : vector<8x1xf32>
    %53 = vector.broadcast %52 : vector<8x1xf32> to vector<8x64xf32>
    %54 = arith.mulf %49, %53 : vector<8x64xf32>
    %55 = vector.broadcast %34 : vector<1x64xf32> to vector<8x64xf32>
    %56 = arith.mulf %54, %55 : vector<8x64xf32>
    %57 = vector.broadcast %36 : vector<1x64xf32> to vector<8x64xf32>
    %58 = arith.addf %56, %57 : vector<8x64xf32>
    %cst_50 = arith.constant 0.000000e+00 : f32
    %59 = vector.broadcast %cst_50 : f32 to vector<8x64xf32>
    %c0_51 = arith.constant 0 : index
    %c0_52 = arith.constant 0 : index
    %c0_53 = arith.constant 0 : index
    %60 = vector.load %arg7[%c0_51, %c0_52, %c0_53] : memref<16x64x8xf32, #tpu.memory_space<vmem>>, vector<1x64x8xf32>
    %61 = vector.shape_cast %60 : vector<1x64x8xf32> to vector<64x8xf32>
    %cst_54 = arith.constant dense<0.000000e+00> : vector<8x8xf32>
    %62 = tpu.matmul %58, %61, %cst_54 {dimension_numbers = #tpu.dot_dimension_numbers<[1], [0], [0], [1], [0, 0, 1, 1], [], []>} : vector<8x64xf32>, vector<64x8xf32>, vector<8x8xf32> -> vector<8x8xf32>
    %c0_55 = arith.constant 0 : index
    %c0_56 = arith.constant 0 : index
    %c0_57 = arith.constant 0 : index
    %63 = vector.load %arg8[%c0_55, %c0_56, %c0_57] : memref<16x64x8xf32, #tpu.memory_space<vmem>>, vector<1x64x8xf32>
    %64 = vector.shape_cast %63 : vector<1x64x8xf32> to vector<64x8xf32>
    %cst_58 = arith.constant dense<0.000000e+00> : vector<8x8xf32>
    %65 = tpu.matmul %58, %64, %cst_58 {dimension_numbers = #tpu.dot_dimension_numbers<[1], [0], [0], [1], [0, 0, 1, 1], [], []>} : vector<8x64xf32>, vector<64x8xf32>, vector<8x8xf32> -> vector<8x8xf32>
    %c0_59 = arith.constant 0 : index
    %c0_60 = arith.constant 0 : index
    %c0_61 = arith.constant 0 : index
    %66 = vector.load %arg9[%c0_59, %c0_60, %c0_61] : memref<16x64x8xf32, #tpu.memory_space<vmem>>, vector<1x64x8xf32>
    %67 = vector.shape_cast %66 : vector<1x64x8xf32> to vector<64x8xf32>
    %cst_62 = arith.constant dense<0.000000e+00> : vector<8x8xf32>
    %68 = tpu.matmul %58, %67, %cst_62 {dimension_numbers = #tpu.dot_dimension_numbers<[1], [0], [0], [1], [0, 0, 1, 1], [], []>} : vector<8x64xf32>, vector<64x8xf32>, vector<8x8xf32> -> vector<8x8xf32>
    %cst_63 = arith.constant dense<0.000000e+00> : vector<8x8xf32>
    %69 = tpu.matmul %62, %65, %cst_63 {dimension_numbers = #tpu.dot_dimension_numbers<[1], [1], [0], [0], [0, 0, 1, 0], [], []>} : vector<8x8xf32>, vector<8x8xf32>, vector<8x8xf32> -> vector<8x8xf32>
    %cst_64 = arith.constant 0.353553385 : f32
    %70 = vector.broadcast %cst_64 : f32 to vector<8x8xf32>
    %71 = arith.mulf %69, %70 : vector<8x8xf32>
    %cst_65 = arith.constant dense<0xFF800000> : vector<8xf32>
    %72 = vector.multi_reduction <maximumf>, %71, %cst_65 [1] : vector<8x8xf32> to vector<8xf32>
    %73 = vector.shape_cast %72 : vector<8xf32> to vector<8x1xf32>
    %74 = vector.broadcast %73 : vector<8x1xf32> to vector<8x8xf32>
    %75 = arith.subf %71, %74 : vector<8x8xf32>
    %76 = math.exp %75 : vector<8x8xf32>
    %cst_66 = arith.constant dense<0.000000e+00> : vector<8xf32>
    %77 = vector.multi_reduction <add>, %76, %cst_66 [1] : vector<8x8xf32> to vector<8xf32>
    %78 = vector.shape_cast %77 : vector<8xf32> to vector<8x1xf32>
    %79 = tpu.reciprocal %78 {approx = true} : vector<8x1xf32> -> vector<8x1xf32>
    %80 = vector.broadcast %79 : vector<8x1xf32> to vector<8x8xf32>
    %81 = arith.mulf %76, %80 : vector<8x8xf32>
    %cst_67 = arith.constant dense<0.000000e+00> : vector<8x8xf32>
    %82 = tpu.matmul %81, %68, %cst_67 {dimension_numbers = #tpu.dot_dimension_numbers<[1], [0], [0], [1], [0, 0, 1, 1], [], []>} : vector<8x8xf32>, vector<8x8xf32>, vector<8x8xf32> -> vector<8x8xf32>
    %c0_68 = arith.constant 0 : index
    %c0_69 = arith.constant 0 : index
    %c0_70 = arith.constant 0 : index
    %83 = vector.load %arg10[%c0_68, %c0_69, %c0_70] : memref<16x8x64xf32, #tpu.memory_space<vmem>>, vector<1x8x64xf32>
    %84 = vector.shape_cast %83 : vector<1x8x64xf32> to vector<8x64xf32>
    %cst_71 = arith.constant dense<0.000000e+00> : vector<8x64xf32>
    %85 = tpu.matmul %82, %84, %cst_71 {dimension_numbers = #tpu.dot_dimension_numbers<[1], [0], [0], [1], [0, 0, 1, 1], [], []>} : vector<8x8xf32>, vector<8x64xf32>, vector<8x64xf32> -> vector<8x64xf32>
    %86 = arith.addf %59, %85 : vector<8x64xf32>
    %c1_72 = arith.constant 1 : index
    %c0_73 = arith.constant 0 : index
    %c0_74 = arith.constant 0 : index
    %87 = vector.load %arg7[%c1_72, %c0_73, %c0_74] : memref<16x64x8xf32, #tpu.memory_space<vmem>>, vector<1x64x8xf32>
    %88 = vector.shape_cast %87 : vector<1x64x8xf32> to vector<64x8xf32>
    %cst_75 = arith.constant dense<0.000000e+00> : vector<8x8xf32>
    %89 = tpu.matmul %58, %88, %cst_75 {dimension_numbers = #tpu.dot_dimension_numbers<[1], [0], [0], [1], [0, 0, 1, 1], [], []>} : vector<8x64xf32>, vector<64x8xf32>, vector<8x8xf32> -> vector<8x8xf32>
    %c1_76 = arith.constant 1 : index
    %c0_77 = arith.constant 0 : index
    %c0_78 = arith.constant 0 : index
    %90 = vector.load %arg8[%c1_76, %c0_77, %c0_78] : memref<16x64x8xf32, #tpu.memory_space<vmem>>, vector<1x64x8xf32>
    %91 = vector.shape_cast %90 : vector<1x64x8xf32> to vector<64x8xf32>
    %cst_79 = arith.constant dense<0.000000e+00> : vector<8x8xf32>
    %92 = tpu.matmul %58, %91, %cst_79 {dimension_numbers = #tpu.dot_dimension_numbers<[1], [0], [0], [1], [0, 0, 1, 1], [], []>} : vector<8x64xf32>, vector<64x8xf32>, vector<8x8xf32> -> vector<8x8xf32>
    %c1_80 = arith.constant 1 : index
    %c0_81 = arith.constant 0 : index
    %c0_82 = arith.constant 0 : index
    %93 = vector.load %arg9[%c1_80, %c0_81, %c0_82] : memref<16x64x8xf32, #tpu.memory_space<vmem>>, vector<1x64x8xf32>
    %94 = vector.shape_cast %93 : vector<1x64x8xf32> to vector<64x8xf32>
    %cst_83 = arith.constant dense<0.000000e+00> : vector<8x8xf32>
    %95 = tpu.matmul %58, %94, %cst_83 {dimension_numbers = #tpu.dot_dimension_numbers<[1], [0], [0], [1], [0, 0, 1, 1], [], []>} : vector<8x64xf32>, vector<64x8xf32>, vector<8x8xf32> -> vector<8x8xf32>
    %cst_84 = arith.constant dense<0.000000e+00> : vector<8x8xf32>
    %96 = tpu.matmul %89, %92, %cst_84 {dimension_numbers = #tpu.dot_dimension_numbers<[1], [1], [0], [0], [0, 0, 1, 0], [], []>} : vector<8x8xf32>, vector<8x8xf32>, vector<8x8xf32> -> vector<8x8xf32>
    %cst_85 = arith.constant 0.353553385 : f32
    %97 = vector.broadcast %cst_85 : f32 to vector<8x8xf32>
    %98 = arith.mulf %96, %97 : vector<8x8xf32>
    %cst_86 = arith.constant dense<0xFF800000> : vector<8xf32>
    %99 = vector.multi_reduction <maximumf>, %98, %cst_86 [1] : vector<8x8xf32> to vector<8xf32>
    %100 = vector.shape_cast %99 : vector<8xf32> to vector<8x1xf32>
    %101 = vector.broadcast %100 : vector<8x1xf32> to vector<8x8xf32>
    %102 = arith.subf %98, %101 : vector<8x8xf32>
    %103 = math.exp %102 : vector<8x8xf32>
    %cst_87 = arith.constant dense<0.000000e+00> : vector<8xf32>
    %104 = vector.multi_reduction <add>, %103, %cst_87 [1] : vector<8x8xf32> to vector<8xf32>
    %105 = vector.shape_cast %104 : vector<8xf32> to vector<8x1xf32>
    %106 = tpu.reciprocal %105 {approx = true} : vector<8x1xf32> -> vector<8x1xf32>
    %107 = vector.broadcast %106 : vector<8x1xf32> to vector<8x8xf32>
    %108 = arith.mulf %103, %107 : vector<8x8xf32>
    %cst_88 = arith.constant dense<0.000000e+00> : vector<8x8xf32>
    %109 = tpu.matmul %108, %95, %cst_88 {dimension_numbers = #tpu.dot_dimension_numbers<[1], [0], [0], [1], [0, 0, 1, 1], [], []>} : vector<8x8xf32>, vector<8x8xf32>, vector<8x8xf32> -> vector<8x8xf32>
    %c1_89 = arith.constant 1 : index
    %c0_90 = arith.constant 0 : index
    %c0_91 = arith.constant 0 : index
    %110 = vector.load %arg10[%c1_89, %c0_90, %c0_91] : memref<16x8x64xf32, #tpu.memory_space<vmem>>, vector<1x8x64xf32>
    %111 = vector.shape_cast %110 : vector<1x8x64xf32> to vector<8x64xf32>
    %cst_92 = arith.constant dense<0.000000e+00> : vector<8x64xf32>
    %112 = tpu.matmul %109, %111, %cst_92 {dimension_numbers = #tpu.dot_dimension_numbers<[1], [0], [0], [1], [0, 0, 1, 1], [], []>} : vector<8x8xf32>, vector<8x64xf32>, vector<8x64xf32> -> vector<8x64xf32>
    %113 = arith.addf %86, %112 : vector<8x64xf32>
    %c2_93 = arith.constant 2 : index
    %c0_94 = arith.constant 0 : index
    %c0_95 = arith.constant 0 : index
    %114 = vector.load %arg7[%c2_93, %c0_94, %c0_95] : memref<16x64x8xf32, #tpu.memory_space<vmem>>, vector<1x64x8xf32>
    %115 = vector.shape_cast %114 : vector<1x64x8xf32> to vector<64x8xf32>
    %cst_96 = arith.constant dense<0.000000e+00> : vector<8x8xf32>
    %116 = tpu.matmul %58, %115, %cst_96 {dimension_numbers = #tpu.dot_dimension_numbers<[1], [0], [0], [1], [0, 0, 1, 1], [], []>} : vector<8x64xf32>, vector<64x8xf32>, vector<8x8xf32> -> vector<8x8xf32>
    %c2_97 = arith.constant 2 : index
    %c0_98 = arith.constant 0 : index
    %c0_99 = arith.constant 0 : index
    %117 = vector.load %arg8[%c2_97, %c0_98, %c0_99] : memref<16x64x8xf32, #tpu.memory_space<vmem>>, vector<1x64x8xf32>
    %118 = vector.shape_cast %117 : vector<1x64x8xf32> to vector<64x8xf32>
    %cst_100 = arith.constant dense<0.000000e+00> : vector<8x8xf32>
    %119 = tpu.matmul %58, %118, %cst_100 {dimension_numbers = #tpu.dot_dimension_numbers<[1], [0], [0], [1], [0, 0, 1, 1], [], []>} : vector<8x64xf32>, vector<64x8xf32>, vector<8x8xf32> -> vector<8x8xf32>
    %c2_101 = arith.constant 2 : index
    %c0_102 = arith.constant 0 : index
    %c0_103 = arith.constant 0 : index
    %120 = vector.load %arg9[%c2_101, %c0_102, %c0_103] : memref<16x64x8xf32, #tpu.memory_space<vmem>>, vector<1x64x8xf32>
    %121 = vector.shape_cast %120 : vector<1x64x8xf32> to vector<64x8xf32>
    %cst_104 = arith.constant dense<0.000000e+00> : vector<8x8xf32>
    %122 = tpu.matmul %58, %121, %cst_104 {dimension_numbers = #tpu.dot_dimension_numbers<[1], [0], [0], [1], [0, 0, 1, 1], [], []>} : vector<8x64xf32>, vector<64x8xf32>, vector<8x8xf32> -> vector<8x8xf32>
    %cst_105 = arith.constant dense<0.000000e+00> : vector<8x8xf32>
    %123 = tpu.matmul %116, %119, %cst_105 {dimension_numbers = #tpu.dot_dimension_numbers<[1], [1], [0], [0], [0, 0, 1, 0], [], []>} : vector<8x8xf32>, vector<8x8xf32>, vector<8x8xf32> -> vector<8x8xf32>
    %cst_106 = arith.constant 0.353553385 : f32
    %124 = vector.broadcast %cst_106 : f32 to vector<8x8xf32>
    %125 = arith.mulf %123, %124 : vector<8x8xf32>
    %cst_107 = arith.constant dense<0xFF800000> : vector<8xf32>
    %126 = vector.multi_reduction <maximumf>, %125, %cst_107 [1] : vector<8x8xf32> to vector<8xf32>
    %127 = vector.shape_cast %126 : vector<8xf32> to vector<8x1xf32>
    %128 = vector.broadcast %127 : vector<8x1xf32> to vector<8x8xf32>
    %129 = arith.subf %125, %128 : vector<8x8xf32>
    %130 = math.exp %129 : vector<8x8xf32>
    %cst_108 = arith.constant dense<0.000000e+00> : vector<8xf32>
    %131 = vector.multi_reduction <add>, %130, %cst_108 [1] : vector<8x8xf32> to vector<8xf32>
    %132 = vector.shape_cast %131 : vector<8xf32> to vector<8x1xf32>
    %133 = tpu.reciprocal %132 {approx = true} : vector<8x1xf32> -> vector<8x1xf32>
    %134 = vector.broadcast %133 : vector<8x1xf32> to vector<8x8xf32>
    %135 = arith.mulf %130, %134 : vector<8x8xf32>
    %cst_109 = arith.constant dense<0.000000e+00> : vector<8x8xf32>
    %136 = tpu.matmul %135, %122, %cst_109 {dimension_numbers = #tpu.dot_dimension_numbers<[1], [0], [0], [1], [0, 0, 1, 1], [], []>} : vector<8x8xf32>, vector<8x8xf32>, vector<8x8xf32> -> vector<8x8xf32>
    %c2_110 = arith.constant 2 : index
    %c0_111 = arith.constant 0 : index
    %c0_112 = arith.constant 0 : index
    %137 = vector.load %arg10[%c2_110, %c0_111, %c0_112] : memref<16x8x64xf32, #tpu.memory_space<vmem>>, vector<1x8x64xf32>
    %138 = vector.shape_cast %137 : vector<1x8x64xf32> to vector<8x64xf32>
    %cst_113 = arith.constant dense<0.000000e+00> : vector<8x64xf32>
    %139 = tpu.matmul %136, %138, %cst_113 {dimension_numbers = #tpu.dot_dimension_numbers<[1], [0], [0], [1], [0, 0, 1, 1], [], []>} : vector<8x8xf32>, vector<8x64xf32>, vector<8x64xf32> -> vector<8x64xf32>
    %140 = arith.addf %113, %139 : vector<8x64xf32>
    %c3_114 = arith.constant 3 : index
    %c0_115 = arith.constant 0 : index
    %c0_116 = arith.constant 0 : index
    %141 = vector.load %arg7[%c3_114, %c0_115, %c0_116] : memref<16x64x8xf32, #tpu.memory_space<vmem>>, vector<1x64x8xf32>
    %142 = vector.shape_cast %141 : vector<1x64x8xf32> to vector<64x8xf32>
    %cst_117 = arith.constant dense<0.000000e+00> : vector<8x8xf32>
    %143 = tpu.matmul %58, %142, %cst_117 {dimension_numbers = #tpu.dot_dimension_numbers<[1], [0], [0], [1], [0, 0, 1, 1], [], []>} : vector<8x64xf32>, vector<64x8xf32>, vector<8x8xf32> -> vector<8x8xf32>
    %c3_118 = arith.constant 3 : index
    %c0_119 = arith.constant 0 : index
    %c0_120 = arith.constant 0 : index
    %144 = vector.load %arg8[%c3_118, %c0_119, %c0_120] : memref<16x64x8xf32, #tpu.memory_space<vmem>>, vector<1x64x8xf32>
    %145 = vector.shape_cast %144 : vector<1x64x8xf32> to vector<64x8xf32>
    %cst_121 = arith.constant dense<0.000000e+00> : vector<8x8xf32>
    %146 = tpu.matmul %58, %145, %cst_121 {dimension_numbers = #tpu.dot_dimension_numbers<[1], [0], [0], [1], [0, 0, 1, 1], [], []>} : vector<8x64xf32>, vector<64x8xf32>, vector<8x8xf32> -> vector<8x8xf32>
    %c3_122 = arith.constant 3 : index
    %c0_123 = arith.constant 0 : index
    %c0_124 = arith.constant 0 : index
    %147 = vector.load %arg9[%c3_122, %c0_123, %c0_124] : memref<16x64x8xf32, #tpu.memory_space<vmem>>, vector<1x64x8xf32>
    %148 = vector.shape_cast %147 : vector<1x64x8xf32> to vector<64x8xf32>
    %cst_125 = arith.constant dense<0.000000e+00> : vector<8x8xf32>
    %149 = tpu.matmul %58, %148, %cst_125 {dimension_numbers = #tpu.dot_dimension_numbers<[1], [0], [0], [1], [0, 0, 1, 1], [], []>} : vector<8x64xf32>, vector<64x8xf32>, vector<8x8xf32> -> vector<8x8xf32>
    %cst_126 = arith.constant dense<0.000000e+00> : vector<8x8xf32>
    %150 = tpu.matmul %143, %146, %cst_126 {dimension_numbers = #tpu.dot_dimension_numbers<[1], [1], [0], [0], [0, 0, 1, 0], [], []>} : vector<8x8xf32>, vector<8x8xf32>, vector<8x8xf32> -> vector<8x8xf32>
    %cst_127 = arith.constant 0.353553385 : f32
    %151 = vector.broadcast %cst_127 : f32 to vector<8x8xf32>
    %152 = arith.mulf %150, %151 : vector<8x8xf32>
    %cst_128 = arith.constant dense<0xFF800000> : vector<8xf32>
    %153 = vector.multi_reduction <maximumf>, %152, %cst_128 [1] : vector<8x8xf32> to vector<8xf32>
    %154 = vector.shape_cast %153 : vector<8xf32> to vector<8x1xf32>
    %155 = vector.broadcast %154 : vector<8x1xf32> to vector<8x8xf32>
    %156 = arith.subf %152, %155 : vector<8x8xf32>
    %157 = math.exp %156 : vector<8x8xf32>
    %cst_129 = arith.constant dense<0.000000e+00> : vector<8xf32>
    %158 = vector.multi_reduction <add>, %157, %cst_129 [1] : vector<8x8xf32> to vector<8xf32>
    %159 = vector.shape_cast %158 : vector<8xf32> to vector<8x1xf32>
    %160 = tpu.reciprocal %159 {approx = true} : vector<8x1xf32> -> vector<8x1xf32>
    %161 = vector.broadcast %160 : vector<8x1xf32> to vector<8x8xf32>
    %162 = arith.mulf %157, %161 : vector<8x8xf32>
    %cst_130 = arith.constant dense<0.000000e+00> : vector<8x8xf32>
    %163 = tpu.matmul %162, %149, %cst_130 {dimension_numbers = #tpu.dot_dimension_numbers<[1], [0], [0], [1], [0, 0, 1, 1], [], []>} : vector<8x8xf32>, vector<8x8xf32>, vector<8x8xf32> -> vector<8x8xf32>
    %c3_131 = arith.constant 3 : index
    %c0_132 = arith.constant 0 : index
    %c0_133 = arith.constant 0 : index
    %164 = vector.load %arg10[%c3_131, %c0_132, %c0_133] : memref<16x8x64xf32, #tpu.memory_space<vmem>>, vector<1x8x64xf32>
    %165 = vector.shape_cast %164 : vector<1x8x64xf32> to vector<8x64xf32>
    %cst_134 = arith.constant dense<0.000000e+00> : vector<8x64xf32>
    %166 = tpu.matmul %163, %165, %cst_134 {dimension_numbers = #tpu.dot_dimension_numbers<[1], [0], [0], [1], [0, 0, 1, 1], [], []>} : vector<8x8xf32>, vector<8x64xf32>, vector<8x64xf32> -> vector<8x64xf32>
    %167 = arith.addf %140, %166 : vector<8x64xf32>
    %c4_135 = arith.constant 4 : index
    %c0_136 = arith.constant 0 : index
    %c0_137 = arith.constant 0 : index
    %168 = vector.load %arg7[%c4_135, %c0_136, %c0_137] : memref<16x64x8xf32, #tpu.memory_space<vmem>>, vector<1x64x8xf32>
    %169 = vector.shape_cast %168 : vector<1x64x8xf32> to vector<64x8xf32>
    %cst_138 = arith.constant dense<0.000000e+00> : vector<8x8xf32>
    %170 = tpu.matmul %58, %169, %cst_138 {dimension_numbers = #tpu.dot_dimension_numbers<[1], [0], [0], [1], [0, 0, 1, 1], [], []>} : vector<8x64xf32>, vector<64x8xf32>, vector<8x8xf32> -> vector<8x8xf32>
    %c4_139 = arith.constant 4 : index
    %c0_140 = arith.constant 0 : index
    %c0_141 = arith.constant 0 : index
    %171 = vector.load %arg8[%c4_139, %c0_140, %c0_141] : memref<16x64x8xf32, #tpu.memory_space<vmem>>, vector<1x64x8xf32>
    %172 = vector.shape_cast %171 : vector<1x64x8xf32> to vector<64x8xf32>
    %cst_142 = arith.constant dense<0.000000e+00> : vector<8x8xf32>
    %173 = tpu.matmul %58, %172, %cst_142 {dimension_numbers = #tpu.dot_dimension_numbers<[1], [0], [0], [1], [0, 0, 1, 1], [], []>} : vector<8x64xf32>, vector<64x8xf32>, vector<8x8xf32> -> vector<8x8xf32>
    %c4_143 = arith.constant 4 : index
    %c0_144 = arith.constant 0 : index
    %c0_145 = arith.constant 0 : index
    %174 = vector.load %arg9[%c4_143, %c0_144, %c0_145] : memref<16x64x8xf32, #tpu.memory_space<vmem>>, vector<1x64x8xf32>
    %175 = vector.shape_cast %174 : vector<1x64x8xf32> to vector<64x8xf32>
    %cst_146 = arith.constant dense<0.000000e+00> : vector<8x8xf32>
    %176 = tpu.matmul %58, %175, %cst_146 {dimension_numbers = #tpu.dot_dimension_numbers<[1], [0], [0], [1], [0, 0, 1, 1], [], []>} : vector<8x64xf32>, vector<64x8xf32>, vector<8x8xf32> -> vector<8x8xf32>
    %cst_147 = arith.constant dense<0.000000e+00> : vector<8x8xf32>
    %177 = tpu.matmul %170, %173, %cst_147 {dimension_numbers = #tpu.dot_dimension_numbers<[1], [1], [0], [0], [0, 0, 1, 0], [], []>} : vector<8x8xf32>, vector<8x8xf32>, vector<8x8xf32> -> vector<8x8xf32>
    %cst_148 = arith.constant 0.353553385 : f32
    %178 = vector.broadcast %cst_148 : f32 to vector<8x8xf32>
    %179 = arith.mulf %177, %178 : vector<8x8xf32>
    %cst_149 = arith.constant dense<0xFF800000> : vector<8xf32>
    %180 = vector.multi_reduction <maximumf>, %179, %cst_149 [1] : vector<8x8xf32> to vector<8xf32>
    %181 = vector.shape_cast %180 : vector<8xf32> to vector<8x1xf32>
    %182 = vector.broadcast %181 : vector<8x1xf32> to vector<8x8xf32>
    %183 = arith.subf %179, %182 : vector<8x8xf32>
    %184 = math.exp %183 : vector<8x8xf32>
    %cst_150 = arith.constant dense<0.000000e+00> : vector<8xf32>
    %185 = vector.multi_reduction <add>, %184, %cst_150 [1] : vector<8x8xf32> to vector<8xf32>
    %186 = vector.shape_cast %185 : vector<8xf32> to vector<8x1xf32>
    %187 = tpu.reciprocal %186 {approx = true} : vector<8x1xf32> -> vector<8x1xf32>
    %188 = vector.broadcast %187 : vector<8x1xf32> to vector<8x8xf32>
    %189 = arith.mulf %184, %188 : vector<8x8xf32>
    %cst_151 = arith.constant dense<0.000000e+00> : vector<8x8xf32>
    %190 = tpu.matmul %189, %176, %cst_151 {dimension_numbers = #tpu.dot_dimension_numbers<[1], [0], [0], [1], [0, 0, 1, 1], [], []>} : vector<8x8xf32>, vector<8x8xf32>, vector<8x8xf32> -> vector<8x8xf32>
    %c4_152 = arith.constant 4 : index
    %c0_153 = arith.constant 0 : index
    %c0_154 = arith.constant 0 : index
    %191 = vector.load %arg10[%c4_152, %c0_153, %c0_154] : memref<16x8x64xf32, #tpu.memory_space<vmem>>, vector<1x8x64xf32>
    %192 = vector.shape_cast %191 : vector<1x8x64xf32> to vector<8x64xf32>
    %cst_155 = arith.constant dense<0.000000e+00> : vector<8x64xf32>
    %193 = tpu.matmul %190, %192, %cst_155 {dimension_numbers = #tpu.dot_dimension_numbers<[1], [0], [0], [1], [0, 0, 1, 1], [], []>} : vector<8x8xf32>, vector<8x64xf32>, vector<8x64xf32> -> vector<8x64xf32>
    %194 = arith.addf %167, %193 : vector<8x64xf32>
    %c5 = arith.constant 5 : index
    %c0_156 = arith.constant 0 : index
    %c0_157 = arith.constant 0 : index
    %195 = vector.load %arg7[%c5, %c0_156, %c0_157] : memref<16x64x8xf32, #tpu.memory_space<vmem>>, vector<1x64x8xf32>
    %196 = vector.shape_cast %195 : vector<1x64x8xf32> to vector<64x8xf32>
    %cst_158 = arith.constant dense<0.000000e+00> : vector<8x8xf32>
    %197 = tpu.matmul %58, %196, %cst_158 {dimension_numbers = #tpu.dot_dimension_numbers<[1], [0], [0], [1], [0, 0, 1, 1], [], []>} : vector<8x64xf32>, vector<64x8xf32>, vector<8x8xf32> -> vector<8x8xf32>
    %c5_159 = arith.constant 5 : index
    %c0_160 = arith.constant 0 : index
    %c0_161 = arith.constant 0 : index
    %198 = vector.load %arg8[%c5_159, %c0_160, %c0_161] : memref<16x64x8xf32, #tpu.memory_space<vmem>>, vector<1x64x8xf32>
    %199 = vector.shape_cast %198 : vector<1x64x8xf32> to vector<64x8xf32>
    %cst_162 = arith.constant dense<0.000000e+00> : vector<8x8xf32>
    %200 = tpu.matmul %58, %199, %cst_162 {dimension_numbers = #tpu.dot_dimension_numbers<[1], [0], [0], [1], [0, 0, 1, 1], [], []>} : vector<8x64xf32>, vector<64x8xf32>, vector<8x8xf32> -> vector<8x8xf32>
    %c5_163 = arith.constant 5 : index
    %c0_164 = arith.constant 0 : index
    %c0_165 = arith.constant 0 : index
    %201 = vector.load %arg9[%c5_163, %c0_164, %c0_165] : memref<16x64x8xf32, #tpu.memory_space<vmem>>, vector<1x64x8xf32>
    %202 = vector.shape_cast %201 : vector<1x64x8xf32> to vector<64x8xf32>
    %cst_166 = arith.constant dense<0.000000e+00> : vector<8x8xf32>
    %203 = tpu.matmul %58, %202, %cst_166 {dimension_numbers = #tpu.dot_dimension_numbers<[1], [0], [0], [1], [0, 0, 1, 1], [], []>} : vector<8x64xf32>, vector<64x8xf32>, vector<8x8xf32> -> vector<8x8xf32>
    %cst_167 = arith.constant dense<0.000000e+00> : vector<8x8xf32>
    %204 = tpu.matmul %197, %200, %cst_167 {dimension_numbers = #tpu.dot_dimension_numbers<[1], [1], [0], [0], [0, 0, 1, 0], [], []>} : vector<8x8xf32>, vector<8x8xf32>, vector<8x8xf32> -> vector<8x8xf32>
    %cst_168 = arith.constant 0.353553385 : f32
    %205 = vector.broadcast %cst_168 : f32 to vector<8x8xf32>
    %206 = arith.mulf %204, %205 : vector<8x8xf32>
    %cst_169 = arith.constant dense<0xFF800000> : vector<8xf32>
    %207 = vector.multi_reduction <maximumf>, %206, %cst_169 [1] : vector<8x8xf32> to vector<8xf32>
    %208 = vector.shape_cast %207 : vector<8xf32> to vector<8x1xf32>
    %209 = vector.broadcast %208 : vector<8x1xf32> to vector<8x8xf32>
    %210 = arith.subf %206, %209 : vector<8x8xf32>
    %211 = math.exp %210 : vector<8x8xf32>
    %cst_170 = arith.constant dense<0.000000e+00> : vector<8xf32>
    %212 = vector.multi_reduction <add>, %211, %cst_170 [1] : vector<8x8xf32> to vector<8xf32>
    %213 = vector.shape_cast %212 : vector<8xf32> to vector<8x1xf32>
    %214 = tpu.reciprocal %213 {approx = true} : vector<8x1xf32> -> vector<8x1xf32>
    %215 = vector.broadcast %214 : vector<8x1xf32> to vector<8x8xf32>
    %216 = arith.mulf %211, %215 : vector<8x8xf32>
    %cst_171 = arith.constant dense<0.000000e+00> : vector<8x8xf32>
    %217 = tpu.matmul %216, %203, %cst_171 {dimension_numbers = #tpu.dot_dimension_numbers<[1], [0], [0], [1], [0, 0, 1, 1], [], []>} : vector<8x8xf32>, vector<8x8xf32>, vector<8x8xf32> -> vector<8x8xf32>
    %c5_172 = arith.constant 5 : index
    %c0_173 = arith.constant 0 : index
    %c0_174 = arith.constant 0 : index
    %218 = vector.load %arg10[%c5_172, %c0_173, %c0_174] : memref<16x8x64xf32, #tpu.memory_space<vmem>>, vector<1x8x64xf32>
    %219 = vector.shape_cast %218 : vector<1x8x64xf32> to vector<8x64xf32>
    %cst_175 = arith.constant dense<0.000000e+00> : vector<8x64xf32>
    %220 = tpu.matmul %217, %219, %cst_175 {dimension_numbers = #tpu.dot_dimension_numbers<[1], [0], [0], [1], [0, 0, 1, 1], [], []>} : vector<8x8xf32>, vector<8x64xf32>, vector<8x64xf32> -> vector<8x64xf32>
    %221 = arith.addf %194, %220 : vector<8x64xf32>
    %c6 = arith.constant 6 : index
    %c0_176 = arith.constant 0 : index
    %c0_177 = arith.constant 0 : index
    %222 = vector.load %arg7[%c6, %c0_176, %c0_177] : memref<16x64x8xf32, #tpu.memory_space<vmem>>, vector<1x64x8xf32>
    %223 = vector.shape_cast %222 : vector<1x64x8xf32> to vector<64x8xf32>
    %cst_178 = arith.constant dense<0.000000e+00> : vector<8x8xf32>
    %224 = tpu.matmul %58, %223, %cst_178 {dimension_numbers = #tpu.dot_dimension_numbers<[1], [0], [0], [1], [0, 0, 1, 1], [], []>} : vector<8x64xf32>, vector<64x8xf32>, vector<8x8xf32> -> vector<8x8xf32>
    %c6_179 = arith.constant 6 : index
    %c0_180 = arith.constant 0 : index
    %c0_181 = arith.constant 0 : index
    %225 = vector.load %arg8[%c6_179, %c0_180, %c0_181] : memref<16x64x8xf32, #tpu.memory_space<vmem>>, vector<1x64x8xf32>
    %226 = vector.shape_cast %225 : vector<1x64x8xf32> to vector<64x8xf32>
    %cst_182 = arith.constant dense<0.000000e+00> : vector<8x8xf32>
    %227 = tpu.matmul %58, %226, %cst_182 {dimension_numbers = #tpu.dot_dimension_numbers<[1], [0], [0], [1], [0, 0, 1, 1], [], []>} : vector<8x64xf32>, vector<64x8xf32>, vector<8x8xf32> -> vector<8x8xf32>
    %c6_183 = arith.constant 6 : index
    %c0_184 = arith.constant 0 : index
    %c0_185 = arith.constant 0 : index
    %228 = vector.load %arg9[%c6_183, %c0_184, %c0_185] : memref<16x64x8xf32, #tpu.memory_space<vmem>>, vector<1x64x8xf32>
    %229 = vector.shape_cast %228 : vector<1x64x8xf32> to vector<64x8xf32>
    %cst_186 = arith.constant dense<0.000000e+00> : vector<8x8xf32>
    %230 = tpu.matmul %58, %229, %cst_186 {dimension_numbers = #tpu.dot_dimension_numbers<[1], [0], [0], [1], [0, 0, 1, 1], [], []>} : vector<8x64xf32>, vector<64x8xf32>, vector<8x8xf32> -> vector<8x8xf32>
    %cst_187 = arith.constant dense<0.000000e+00> : vector<8x8xf32>
    %231 = tpu.matmul %224, %227, %cst_187 {dimension_numbers = #tpu.dot_dimension_numbers<[1], [1], [0], [0], [0, 0, 1, 0], [], []>} : vector<8x8xf32>, vector<8x8xf32>, vector<8x8xf32> -> vector<8x8xf32>
    %cst_188 = arith.constant 0.353553385 : f32
    %232 = vector.broadcast %cst_188 : f32 to vector<8x8xf32>
    %233 = arith.mulf %231, %232 : vector<8x8xf32>
    %cst_189 = arith.constant dense<0xFF800000> : vector<8xf32>
    %234 = vector.multi_reduction <maximumf>, %233, %cst_189 [1] : vector<8x8xf32> to vector<8xf32>
    %235 = vector.shape_cast %234 : vector<8xf32> to vector<8x1xf32>
    %236 = vector.broadcast %235 : vector<8x1xf32> to vector<8x8xf32>
    %237 = arith.subf %233, %236 : vector<8x8xf32>
    %238 = math.exp %237 : vector<8x8xf32>
    %cst_190 = arith.constant dense<0.000000e+00> : vector<8xf32>
    %239 = vector.multi_reduction <add>, %238, %cst_190 [1] : vector<8x8xf32> to vector<8xf32>
    %240 = vector.shape_cast %239 : vector<8xf32> to vector<8x1xf32>
    %241 = tpu.reciprocal %240 {approx = true} : vector<8x1xf32> -> vector<8x1xf32>
    %242 = vector.broadcast %241 : vector<8x1xf32> to vector<8x8xf32>
    %243 = arith.mulf %238, %242 : vector<8x8xf32>
    %cst_191 = arith.constant dense<0.000000e+00> : vector<8x8xf32>
    %244 = tpu.matmul %243, %230, %cst_191 {dimension_numbers = #tpu.dot_dimension_numbers<[1], [0], [0], [1], [0, 0, 1, 1], [], []>} : vector<8x8xf32>, vector<8x8xf32>, vector<8x8xf32> -> vector<8x8xf32>
    %c6_192 = arith.constant 6 : index
    %c0_193 = arith.constant 0 : index
    %c0_194 = arith.constant 0 : index
    %245 = vector.load %arg10[%c6_192, %c0_193, %c0_194] : memref<16x8x64xf32, #tpu.memory_space<vmem>>, vector<1x8x64xf32>
    %246 = vector.shape_cast %245 : vector<1x8x64xf32> to vector<8x64xf32>
    %cst_195 = arith.constant dense<0.000000e+00> : vector<8x64xf32>
    %247 = tpu.matmul %244, %246, %cst_195 {dimension_numbers = #tpu.dot_dimension_numbers<[1], [0], [0], [1], [0, 0, 1, 1], [], []>} : vector<8x8xf32>, vector<8x64xf32>, vector<8x64xf32> -> vector<8x64xf32>
    %248 = arith.addf %221, %247 : vector<8x64xf32>
    %c7 = arith.constant 7 : index
    %c0_196 = arith.constant 0 : index
    %c0_197 = arith.constant 0 : index
    %249 = vector.load %arg7[%c7, %c0_196, %c0_197] : memref<16x64x8xf32, #tpu.memory_space<vmem>>, vector<1x64x8xf32>
    %250 = vector.shape_cast %249 : vector<1x64x8xf32> to vector<64x8xf32>
    %cst_198 = arith.constant dense<0.000000e+00> : vector<8x8xf32>
    %251 = tpu.matmul %58, %250, %cst_198 {dimension_numbers = #tpu.dot_dimension_numbers<[1], [0], [0], [1], [0, 0, 1, 1], [], []>} : vector<8x64xf32>, vector<64x8xf32>, vector<8x8xf32> -> vector<8x8xf32>
    %c7_199 = arith.constant 7 : index
    %c0_200 = arith.constant 0 : index
    %c0_201 = arith.constant 0 : index
    %252 = vector.load %arg8[%c7_199, %c0_200, %c0_201] : memref<16x64x8xf32, #tpu.memory_space<vmem>>, vector<1x64x8xf32>
    %253 = vector.shape_cast %252 : vector<1x64x8xf32> to vector<64x8xf32>
    %cst_202 = arith.constant dense<0.000000e+00> : vector<8x8xf32>
    %254 = tpu.matmul %58, %253, %cst_202 {dimension_numbers = #tpu.dot_dimension_numbers<[1], [0], [0], [1], [0, 0, 1, 1], [], []>} : vector<8x64xf32>, vector<64x8xf32>, vector<8x8xf32> -> vector<8x8xf32>
    %c7_203 = arith.constant 7 : index
    %c0_204 = arith.constant 0 : index
    %c0_205 = arith.constant 0 : index
    %255 = vector.load %arg9[%c7_203, %c0_204, %c0_205] : memref<16x64x8xf32, #tpu.memory_space<vmem>>, vector<1x64x8xf32>
    %256 = vector.shape_cast %255 : vector<1x64x8xf32> to vector<64x8xf32>
    %cst_206 = arith.constant dense<0.000000e+00> : vector<8x8xf32>
    %257 = tpu.matmul %58, %256, %cst_206 {dimension_numbers = #tpu.dot_dimension_numbers<[1], [0], [0], [1], [0, 0, 1, 1], [], []>} : vector<8x64xf32>, vector<64x8xf32>, vector<8x8xf32> -> vector<8x8xf32>
    %cst_207 = arith.constant dense<0.000000e+00> : vector<8x8xf32>
    %258 = tpu.matmul %251, %254, %cst_207 {dimension_numbers = #tpu.dot_dimension_numbers<[1], [1], [0], [0], [0, 0, 1, 0], [], []>} : vector<8x8xf32>, vector<8x8xf32>, vector<8x8xf32> -> vector<8x8xf32>
    %cst_208 = arith.constant 0.353553385 : f32
    %259 = vector.broadcast %cst_208 : f32 to vector<8x8xf32>
    %260 = arith.mulf %258, %259 : vector<8x8xf32>
    %cst_209 = arith.constant dense<0xFF800000> : vector<8xf32>
    %261 = vector.multi_reduction <maximumf>, %260, %cst_209 [1] : vector<8x8xf32> to vector<8xf32>
    %262 = vector.shape_cast %261 : vector<8xf32> to vector<8x1xf32>
    %263 = vector.broadcast %262 : vector<8x1xf32> to vector<8x8xf32>
    %264 = arith.subf %260, %263 : vector<8x8xf32>
    %265 = math.exp %264 : vector<8x8xf32>
    %cst_210 = arith.constant dense<0.000000e+00> : vector<8xf32>
    %266 = vector.multi_reduction <add>, %265, %cst_210 [1] : vector<8x8xf32> to vector<8xf32>
    %267 = vector.shape_cast %266 : vector<8xf32> to vector<8x1xf32>
    %268 = tpu.reciprocal %267 {approx = true} : vector<8x1xf32> -> vector<8x1xf32>
    %269 = vector.broadcast %268 : vector<8x1xf32> to vector<8x8xf32>
    %270 = arith.mulf %265, %269 : vector<8x8xf32>
    %cst_211 = arith.constant dense<0.000000e+00> : vector<8x8xf32>
    %271 = tpu.matmul %270, %257, %cst_211 {dimension_numbers = #tpu.dot_dimension_numbers<[1], [0], [0], [1], [0, 0, 1, 1], [], []>} : vector<8x8xf32>, vector<8x8xf32>, vector<8x8xf32> -> vector<8x8xf32>
    %c7_212 = arith.constant 7 : index
    %c0_213 = arith.constant 0 : index
    %c0_214 = arith.constant 0 : index
    %272 = vector.load %arg10[%c7_212, %c0_213, %c0_214] : memref<16x8x64xf32, #tpu.memory_space<vmem>>, vector<1x8x64xf32>
    %273 = vector.shape_cast %272 : vector<1x8x64xf32> to vector<8x64xf32>
    %cst_215 = arith.constant dense<0.000000e+00> : vector<8x64xf32>
    %274 = tpu.matmul %271, %273, %cst_215 {dimension_numbers = #tpu.dot_dimension_numbers<[1], [0], [0], [1], [0, 0, 1, 1], [], []>} : vector<8x8xf32>, vector<8x64xf32>, vector<8x64xf32> -> vector<8x64xf32>
    %275 = arith.addf %248, %274 : vector<8x64xf32>
    %276 = arith.addf %32, %275 : vector<8x64xf32>
    %c0_216 = arith.constant 0 : index
    %c0_217 = arith.constant 0 : index
    %c0_218 = arith.constant 0 : index
    %277 = vector.load %arg11[%c0_216, %c0_217, %c0_218] : memref<2x1x64xf32, #tpu.memory_space<vmem>>, vector<1x1x64xf32>
    %278 = vector.shape_cast %277 : vector<1x1x64xf32> to vector<1x64xf32>
    %279 = vector.broadcast %278 : vector<1x64xf32> to vector<8x64xf32>
    %280 = arith.addf %276, %279 : vector<8x64xf32>
    %c0_219 = arith.constant 0 : index
    %c0_220 = arith.constant 0 : index
    %c0_221 = arith.constant 0 : index
    %281 = vector.load %arg12[%c0_219, %c0_220, %c0_221] : memref<2x1x64xf32, #tpu.memory_space<vmem>>, vector<1x1x64xf32>
    %282 = vector.shape_cast %281 : vector<1x1x64xf32> to vector<1x64xf32>
    %c0_222 = arith.constant 0 : index
    %c0_223 = arith.constant 0 : index
    %c0_224 = arith.constant 0 : index
    %283 = vector.load %arg13[%c0_222, %c0_223, %c0_224] : memref<2x1x64xf32, #tpu.memory_space<vmem>>, vector<1x1x64xf32>
    %284 = vector.shape_cast %283 : vector<1x1x64xf32> to vector<1x64xf32>
    %cst_225 = arith.constant dense<0.000000e+00> : vector<8xf32>
    %285 = vector.multi_reduction <add>, %280, %cst_225 [1] : vector<8x64xf32> to vector<8xf32>
    %286 = vector.shape_cast %285 : vector<8xf32> to vector<8x1xf32>
    %cst_226 = arith.constant 6.400000e+01 : f32
    %287 = vector.broadcast %cst_226 : f32 to vector<8x1xf32>
    %288 = arith.divf %286, %287 : vector<8x1xf32>
    %289 = vector.broadcast %288 : vector<8x1xf32> to vector<8x64xf32>
    %290 = arith.subf %280, %289 : vector<8x64xf32>
    %291 = arith.mulf %290, %290 : vector<8x64xf32>
    %cst_227 = arith.constant dense<0.000000e+00> : vector<8xf32>
    %292 = vector.multi_reduction <add>, %291, %cst_227 [1] : vector<8x64xf32> to vector<8xf32>
    %293 = vector.shape_cast %292 : vector<8xf32> to vector<8x1xf32>
    %cst_228 = arith.constant 6.400000e+01 : f32
    %294 = vector.broadcast %cst_228 : f32 to vector<8x1xf32>
    %295 = arith.divf %293, %294 : vector<8x1xf32>
    %296 = vector.broadcast %288 : vector<8x1xf32> to vector<8x64xf32>
    %297 = arith.subf %280, %296 : vector<8x64xf32>
    %cst_229 = arith.constant 9.99999974E-6 : f32
    %298 = vector.broadcast %cst_229 : f32 to vector<8x1xf32>
    %299 = arith.addf %295, %298 : vector<8x1xf32>
    %300 = math.rsqrt %299 : vector<8x1xf32>
    %301 = vector.broadcast %300 : vector<8x1xf32> to vector<8x64xf32>
    %302 = arith.mulf %297, %301 : vector<8x64xf32>
    %303 = vector.broadcast %282 : vector<1x64xf32> to vector<8x64xf32>
    %304 = arith.mulf %302, %303 : vector<8x64xf32>
    %305 = vector.broadcast %284 : vector<1x64xf32> to vector<8x64xf32>
    %306 = arith.addf %304, %305 : vector<8x64xf32>
    %c0_230 = arith.constant 0 : index
    %c0_231 = arith.constant 0 : index
    %c0_232 = arith.constant 0 : index
    %307 = vector.load %arg14[%c0_230, %c0_231, %c0_232] : memref<2x64x128xf32, #tpu.memory_space<vmem>>, vector<1x64x128xf32>
    %308 = vector.shape_cast %307 : vector<1x64x128xf32> to vector<64x128xf32>
    %cst_233 = arith.constant dense<0.000000e+00> : vector<8x128xf32>
    %309 = tpu.matmul %306, %308, %cst_233 {dimension_numbers = #tpu.dot_dimension_numbers<[1], [0], [0], [1], [0, 0, 1, 1], [], []>} : vector<8x64xf32>, vector<64x128xf32>, vector<8x128xf32> -> vector<8x128xf32>
    %c0_234 = arith.constant 0 : index
    %c0_235 = arith.constant 0 : index
    %c0_236 = arith.constant 0 : index
    %310 = vector.load %arg15[%c0_234, %c0_235, %c0_236] : memref<2x1x128xf32, #tpu.memory_space<vmem>>, vector<1x1x128xf32>
    %311 = vector.shape_cast %310 : vector<1x1x128xf32> to vector<1x128xf32>
    %312 = vector.broadcast %311 : vector<1x128xf32> to vector<8x128xf32>
    %313 = arith.addf %309, %312 : vector<8x128xf32>
    %cst_237 = arith.constant 0.000000e+00 : f32
    %314 = vector.broadcast %cst_237 : f32 to vector<8x128xf32>
    %315 = arith.maximumf %313, %314 : vector<8x128xf32>
    %c0_238 = arith.constant 0 : index
    %c0_239 = arith.constant 0 : index
    %c0_240 = arith.constant 0 : index
    %316 = vector.load %arg16[%c0_238, %c0_239, %c0_240] : memref<2x128x64xf32, #tpu.memory_space<vmem>>, vector<1x128x64xf32>
    %317 = vector.shape_cast %316 : vector<1x128x64xf32> to vector<128x64xf32>
    %cst_241 = arith.constant dense<0.000000e+00> : vector<8x64xf32>
    %318 = tpu.matmul %315, %317, %cst_241 {dimension_numbers = #tpu.dot_dimension_numbers<[1], [0], [0], [1], [0, 0, 1, 1], [], []>} : vector<8x128xf32>, vector<128x64xf32>, vector<8x64xf32> -> vector<8x64xf32>
    %c0_242 = arith.constant 0 : index
    %c0_243 = arith.constant 0 : index
    %c0_244 = arith.constant 0 : index
    %319 = vector.load %arg17[%c0_242, %c0_243, %c0_244] : memref<2x1x64xf32, #tpu.memory_space<vmem>>, vector<1x1x64xf32>
    %320 = vector.shape_cast %319 : vector<1x1x64xf32> to vector<1x64xf32>
    %321 = vector.broadcast %320 : vector<1x64xf32> to vector<8x64xf32>
    %322 = arith.addf %318, %321 : vector<8x64xf32>
    %323 = arith.addf %280, %322 : vector<8x64xf32>
    %c1_245 = arith.constant 1 : index
    %c0_246 = arith.constant 0 : index
    %c0_247 = arith.constant 0 : index
    %324 = vector.load %arg5[%c1_245, %c0_246, %c0_247] : memref<2x1x64xf32, #tpu.memory_space<vmem>>, vector<1x1x64xf32>
    %325 = vector.shape_cast %324 : vector<1x1x64xf32> to vector<1x64xf32>
    %c1_248 = arith.constant 1 : index
    %c0_249 = arith.constant 0 : index
    %c0_250 = arith.constant 0 : index
    %326 = vector.load %arg6[%c1_248, %c0_249, %c0_250] : memref<2x1x64xf32, #tpu.memory_space<vmem>>, vector<1x1x64xf32>
    %327 = vector.shape_cast %326 : vector<1x1x64xf32> to vector<1x64xf32>
    %cst_251 = arith.constant dense<0.000000e+00> : vector<8xf32>
    %328 = vector.multi_reduction <add>, %323, %cst_251 [1] : vector<8x64xf32> to vector<8xf32>
    %329 = vector.shape_cast %328 : vector<8xf32> to vector<8x1xf32>
    %cst_252 = arith.constant 6.400000e+01 : f32
    %330 = vector.broadcast %cst_252 : f32 to vector<8x1xf32>
    %331 = arith.divf %329, %330 : vector<8x1xf32>
    %332 = vector.broadcast %331 : vector<8x1xf32> to vector<8x64xf32>
    %333 = arith.subf %323, %332 : vector<8x64xf32>
    %334 = arith.mulf %333, %333 : vector<8x64xf32>
    %cst_253 = arith.constant dense<0.000000e+00> : vector<8xf32>
    %335 = vector.multi_reduction <add>, %334, %cst_253 [1] : vector<8x64xf32> to vector<8xf32>
    %336 = vector.shape_cast %335 : vector<8xf32> to vector<8x1xf32>
    %cst_254 = arith.constant 6.400000e+01 : f32
    %337 = vector.broadcast %cst_254 : f32 to vector<8x1xf32>
    %338 = arith.divf %336, %337 : vector<8x1xf32>
    %339 = vector.broadcast %331 : vector<8x1xf32> to vector<8x64xf32>
    %340 = arith.subf %323, %339 : vector<8x64xf32>
    %cst_255 = arith.constant 9.99999974E-6 : f32
    %341 = vector.broadcast %cst_255 : f32 to vector<8x1xf32>
    %342 = arith.addf %338, %341 : vector<8x1xf32>
    %343 = math.rsqrt %342 : vector<8x1xf32>
    %344 = vector.broadcast %343 : vector<8x1xf32> to vector<8x64xf32>
    %345 = arith.mulf %340, %344 : vector<8x64xf32>
    %346 = vector.broadcast %325 : vector<1x64xf32> to vector<8x64xf32>
    %347 = arith.mulf %345, %346 : vector<8x64xf32>
    %348 = vector.broadcast %327 : vector<1x64xf32> to vector<8x64xf32>
    %349 = arith.addf %347, %348 : vector<8x64xf32>
    %cst_256 = arith.constant 0.000000e+00 : f32
    %350 = vector.broadcast %cst_256 : f32 to vector<8x64xf32>
    %c8 = arith.constant 8 : index
    %c0_257 = arith.constant 0 : index
    %c0_258 = arith.constant 0 : index
    %351 = vector.load %arg7[%c8, %c0_257, %c0_258] : memref<16x64x8xf32, #tpu.memory_space<vmem>>, vector<1x64x8xf32>
    %352 = vector.shape_cast %351 : vector<1x64x8xf32> to vector<64x8xf32>
    %cst_259 = arith.constant dense<0.000000e+00> : vector<8x8xf32>
    %353 = tpu.matmul %349, %352, %cst_259 {dimension_numbers = #tpu.dot_dimension_numbers<[1], [0], [0], [1], [0, 0, 1, 1], [], []>} : vector<8x64xf32>, vector<64x8xf32>, vector<8x8xf32> -> vector<8x8xf32>
    %c8_260 = arith.constant 8 : index
    %c0_261 = arith.constant 0 : index
    %c0_262 = arith.constant 0 : index
    %354 = vector.load %arg8[%c8_260, %c0_261, %c0_262] : memref<16x64x8xf32, #tpu.memory_space<vmem>>, vector<1x64x8xf32>
    %355 = vector.shape_cast %354 : vector<1x64x8xf32> to vector<64x8xf32>
    %cst_263 = arith.constant dense<0.000000e+00> : vector<8x8xf32>
    %356 = tpu.matmul %349, %355, %cst_263 {dimension_numbers = #tpu.dot_dimension_numbers<[1], [0], [0], [1], [0, 0, 1, 1], [], []>} : vector<8x64xf32>, vector<64x8xf32>, vector<8x8xf32> -> vector<8x8xf32>
    %c8_264 = arith.constant 8 : index
    %c0_265 = arith.constant 0 : index
    %c0_266 = arith.constant 0 : index
    %357 = vector.load %arg9[%c8_264, %c0_265, %c0_266] : memref<16x64x8xf32, #tpu.memory_space<vmem>>, vector<1x64x8xf32>
    %358 = vector.shape_cast %357 : vector<1x64x8xf32> to vector<64x8xf32>
    %cst_267 = arith.constant dense<0.000000e+00> : vector<8x8xf32>
    %359 = tpu.matmul %349, %358, %cst_267 {dimension_numbers = #tpu.dot_dimension_numbers<[1], [0], [0], [1], [0, 0, 1, 1], [], []>} : vector<8x64xf32>, vector<64x8xf32>, vector<8x8xf32> -> vector<8x8xf32>
    %cst_268 = arith.constant dense<0.000000e+00> : vector<8x8xf32>
    %360 = tpu.matmul %353, %356, %cst_268 {dimension_numbers = #tpu.dot_dimension_numbers<[1], [1], [0], [0], [0, 0, 1, 0], [], []>} : vector<8x8xf32>, vector<8x8xf32>, vector<8x8xf32> -> vector<8x8xf32>
    %cst_269 = arith.constant 0.353553385 : f32
    %361 = vector.broadcast %cst_269 : f32 to vector<8x8xf32>
    %362 = arith.mulf %360, %361 : vector<8x8xf32>
    %cst_270 = arith.constant dense<0xFF800000> : vector<8xf32>
    %363 = vector.multi_reduction <maximumf>, %362, %cst_270 [1] : vector<8x8xf32> to vector<8xf32>
    %364 = vector.shape_cast %363 : vector<8xf32> to vector<8x1xf32>
    %365 = vector.broadcast %364 : vector<8x1xf32> to vector<8x8xf32>
    %366 = arith.subf %362, %365 : vector<8x8xf32>
    %367 = math.exp %366 : vector<8x8xf32>
    %cst_271 = arith.constant dense<0.000000e+00> : vector<8xf32>
    %368 = vector.multi_reduction <add>, %367, %cst_271 [1] : vector<8x8xf32> to vector<8xf32>
    %369 = vector.shape_cast %368 : vector<8xf32> to vector<8x1xf32>
    %370 = tpu.reciprocal %369 {approx = true} : vector<8x1xf32> -> vector<8x1xf32>
    %371 = vector.broadcast %370 : vector<8x1xf32> to vector<8x8xf32>
    %372 = arith.mulf %367, %371 : vector<8x8xf32>
    %cst_272 = arith.constant dense<0.000000e+00> : vector<8x8xf32>
    %373 = tpu.matmul %372, %359, %cst_272 {dimension_numbers = #tpu.dot_dimension_numbers<[1], [0], [0], [1], [0, 0, 1, 1], [], []>} : vector<8x8xf32>, vector<8x8xf32>, vector<8x8xf32> -> vector<8x8xf32>
    %c8_273 = arith.constant 8 : index
    %c0_274 = arith.constant 0 : index
    %c0_275 = arith.constant 0 : index
    %374 = vector.load %arg10[%c8_273, %c0_274, %c0_275] : memref<16x8x64xf32, #tpu.memory_space<vmem>>, vector<1x8x64xf32>
    %375 = vector.shape_cast %374 : vector<1x8x64xf32> to vector<8x64xf32>
    %cst_276 = arith.constant dense<0.000000e+00> : vector<8x64xf32>
    %376 = tpu.matmul %373, %375, %cst_276 {dimension_numbers = #tpu.dot_dimension_numbers<[1], [0], [0], [1], [0, 0, 1, 1], [], []>} : vector<8x8xf32>, vector<8x64xf32>, vector<8x64xf32> -> vector<8x64xf32>
    %377 = arith.addf %350, %376 : vector<8x64xf32>
    %c9 = arith.constant 9 : index
    %c0_277 = arith.constant 0 : index
    %c0_278 = arith.constant 0 : index
    %378 = vector.load %arg7[%c9, %c0_277, %c0_278] : memref<16x64x8xf32, #tpu.memory_space<vmem>>, vector<1x64x8xf32>
    %379 = vector.shape_cast %378 : vector<1x64x8xf32> to vector<64x8xf32>
    %cst_279 = arith.constant dense<0.000000e+00> : vector<8x8xf32>
    %380 = tpu.matmul %349, %379, %cst_279 {dimension_numbers = #tpu.dot_dimension_numbers<[1], [0], [0], [1], [0, 0, 1, 1], [], []>} : vector<8x64xf32>, vector<64x8xf32>, vector<8x8xf32> -> vector<8x8xf32>
    %c9_280 = arith.constant 9 : index
    %c0_281 = arith.constant 0 : index
    %c0_282 = arith.constant 0 : index
    %381 = vector.load %arg8[%c9_280, %c0_281, %c0_282] : memref<16x64x8xf32, #tpu.memory_space<vmem>>, vector<1x64x8xf32>
    %382 = vector.shape_cast %381 : vector<1x64x8xf32> to vector<64x8xf32>
    %cst_283 = arith.constant dense<0.000000e+00> : vector<8x8xf32>
    %383 = tpu.matmul %349, %382, %cst_283 {dimension_numbers = #tpu.dot_dimension_numbers<[1], [0], [0], [1], [0, 0, 1, 1], [], []>} : vector<8x64xf32>, vector<64x8xf32>, vector<8x8xf32> -> vector<8x8xf32>
    %c9_284 = arith.constant 9 : index
    %c0_285 = arith.constant 0 : index
    %c0_286 = arith.constant 0 : index
    %384 = vector.load %arg9[%c9_284, %c0_285, %c0_286] : memref<16x64x8xf32, #tpu.memory_space<vmem>>, vector<1x64x8xf32>
    %385 = vector.shape_cast %384 : vector<1x64x8xf32> to vector<64x8xf32>
    %cst_287 = arith.constant dense<0.000000e+00> : vector<8x8xf32>
    %386 = tpu.matmul %349, %385, %cst_287 {dimension_numbers = #tpu.dot_dimension_numbers<[1], [0], [0], [1], [0, 0, 1, 1], [], []>} : vector<8x64xf32>, vector<64x8xf32>, vector<8x8xf32> -> vector<8x8xf32>
    %cst_288 = arith.constant dense<0.000000e+00> : vector<8x8xf32>
    %387 = tpu.matmul %380, %383, %cst_288 {dimension_numbers = #tpu.dot_dimension_numbers<[1], [1], [0], [0], [0, 0, 1, 0], [], []>} : vector<8x8xf32>, vector<8x8xf32>, vector<8x8xf32> -> vector<8x8xf32>
    %cst_289 = arith.constant 0.353553385 : f32
    %388 = vector.broadcast %cst_289 : f32 to vector<8x8xf32>
    %389 = arith.mulf %387, %388 : vector<8x8xf32>
    %cst_290 = arith.constant dense<0xFF800000> : vector<8xf32>
    %390 = vector.multi_reduction <maximumf>, %389, %cst_290 [1] : vector<8x8xf32> to vector<8xf32>
    %391 = vector.shape_cast %390 : vector<8xf32> to vector<8x1xf32>
    %392 = vector.broadcast %391 : vector<8x1xf32> to vector<8x8xf32>
    %393 = arith.subf %389, %392 : vector<8x8xf32>
    %394 = math.exp %393 : vector<8x8xf32>
    %cst_291 = arith.constant dense<0.000000e+00> : vector<8xf32>
    %395 = vector.multi_reduction <add>, %394, %cst_291 [1] : vector<8x8xf32> to vector<8xf32>
    %396 = vector.shape_cast %395 : vector<8xf32> to vector<8x1xf32>
    %397 = tpu.reciprocal %396 {approx = true} : vector<8x1xf32> -> vector<8x1xf32>
    %398 = vector.broadcast %397 : vector<8x1xf32> to vector<8x8xf32>
    %399 = arith.mulf %394, %398 : vector<8x8xf32>
    %cst_292 = arith.constant dense<0.000000e+00> : vector<8x8xf32>
    %400 = tpu.matmul %399, %386, %cst_292 {dimension_numbers = #tpu.dot_dimension_numbers<[1], [0], [0], [1], [0, 0, 1, 1], [], []>} : vector<8x8xf32>, vector<8x8xf32>, vector<8x8xf32> -> vector<8x8xf32>
    %c9_293 = arith.constant 9 : index
    %c0_294 = arith.constant 0 : index
    %c0_295 = arith.constant 0 : index
    %401 = vector.load %arg10[%c9_293, %c0_294, %c0_295] : memref<16x8x64xf32, #tpu.memory_space<vmem>>, vector<1x8x64xf32>
    %402 = vector.shape_cast %401 : vector<1x8x64xf32> to vector<8x64xf32>
    %cst_296 = arith.constant dense<0.000000e+00> : vector<8x64xf32>
    %403 = tpu.matmul %400, %402, %cst_296 {dimension_numbers = #tpu.dot_dimension_numbers<[1], [0], [0], [1], [0, 0, 1, 1], [], []>} : vector<8x8xf32>, vector<8x64xf32>, vector<8x64xf32> -> vector<8x64xf32>
    %404 = arith.addf %377, %403 : vector<8x64xf32>
    %c10 = arith.constant 10 : index
    %c0_297 = arith.constant 0 : index
    %c0_298 = arith.constant 0 : index
    %405 = vector.load %arg7[%c10, %c0_297, %c0_298] : memref<16x64x8xf32, #tpu.memory_space<vmem>>, vector<1x64x8xf32>
    %406 = vector.shape_cast %405 : vector<1x64x8xf32> to vector<64x8xf32>
    %cst_299 = arith.constant dense<0.000000e+00> : vector<8x8xf32>
    %407 = tpu.matmul %349, %406, %cst_299 {dimension_numbers = #tpu.dot_dimension_numbers<[1], [0], [0], [1], [0, 0, 1, 1], [], []>} : vector<8x64xf32>, vector<64x8xf32>, vector<8x8xf32> -> vector<8x8xf32>
    %c10_300 = arith.constant 10 : index
    %c0_301 = arith.constant 0 : index
    %c0_302 = arith.constant 0 : index
    %408 = vector.load %arg8[%c10_300, %c0_301, %c0_302] : memref<16x64x8xf32, #tpu.memory_space<vmem>>, vector<1x64x8xf32>
    %409 = vector.shape_cast %408 : vector<1x64x8xf32> to vector<64x8xf32>
    %cst_303 = arith.constant dense<0.000000e+00> : vector<8x8xf32>
    %410 = tpu.matmul %349, %409, %cst_303 {dimension_numbers = #tpu.dot_dimension_numbers<[1], [0], [0], [1], [0, 0, 1, 1], [], []>} : vector<8x64xf32>, vector<64x8xf32>, vector<8x8xf32> -> vector<8x8xf32>
    %c10_304 = arith.constant 10 : index
    %c0_305 = arith.constant 0 : index
    %c0_306 = arith.constant 0 : index
    %411 = vector.load %arg9[%c10_304, %c0_305, %c0_306] : memref<16x64x8xf32, #tpu.memory_space<vmem>>, vector<1x64x8xf32>
    %412 = vector.shape_cast %411 : vector<1x64x8xf32> to vector<64x8xf32>
    %cst_307 = arith.constant dense<0.000000e+00> : vector<8x8xf32>
    %413 = tpu.matmul %349, %412, %cst_307 {dimension_numbers = #tpu.dot_dimension_numbers<[1], [0], [0], [1], [0, 0, 1, 1], [], []>} : vector<8x64xf32>, vector<64x8xf32>, vector<8x8xf32> -> vector<8x8xf32>
    %cst_308 = arith.constant dense<0.000000e+00> : vector<8x8xf32>
    %414 = tpu.matmul %407, %410, %cst_308 {dimension_numbers = #tpu.dot_dimension_numbers<[1], [1], [0], [0], [0, 0, 1, 0], [], []>} : vector<8x8xf32>, vector<8x8xf32>, vector<8x8xf32> -> vector<8x8xf32>
    %cst_309 = arith.constant 0.353553385 : f32
    %415 = vector.broadcast %cst_309 : f32 to vector<8x8xf32>
    %416 = arith.mulf %414, %415 : vector<8x8xf32>
    %cst_310 = arith.constant dense<0xFF800000> : vector<8xf32>
    %417 = vector.multi_reduction <maximumf>, %416, %cst_310 [1] : vector<8x8xf32> to vector<8xf32>
    %418 = vector.shape_cast %417 : vector<8xf32> to vector<8x1xf32>
    %419 = vector.broadcast %418 : vector<8x1xf32> to vector<8x8xf32>
    %420 = arith.subf %416, %419 : vector<8x8xf32>
    %421 = math.exp %420 : vector<8x8xf32>
    %cst_311 = arith.constant dense<0.000000e+00> : vector<8xf32>
    %422 = vector.multi_reduction <add>, %421, %cst_311 [1] : vector<8x8xf32> to vector<8xf32>
    %423 = vector.shape_cast %422 : vector<8xf32> to vector<8x1xf32>
    %424 = tpu.reciprocal %423 {approx = true} : vector<8x1xf32> -> vector<8x1xf32>
    %425 = vector.broadcast %424 : vector<8x1xf32> to vector<8x8xf32>
    %426 = arith.mulf %421, %425 : vector<8x8xf32>
    %cst_312 = arith.constant dense<0.000000e+00> : vector<8x8xf32>
    %427 = tpu.matmul %426, %413, %cst_312 {dimension_numbers = #tpu.dot_dimension_numbers<[1], [0], [0], [1], [0, 0, 1, 1], [], []>} : vector<8x8xf32>, vector<8x8xf32>, vector<8x8xf32> -> vector<8x8xf32>
    %c10_313 = arith.constant 10 : index
    %c0_314 = arith.constant 0 : index
    %c0_315 = arith.constant 0 : index
    %428 = vector.load %arg10[%c10_313, %c0_314, %c0_315] : memref<16x8x64xf32, #tpu.memory_space<vmem>>, vector<1x8x64xf32>
    %429 = vector.shape_cast %428 : vector<1x8x64xf32> to vector<8x64xf32>
    %cst_316 = arith.constant dense<0.000000e+00> : vector<8x64xf32>
    %430 = tpu.matmul %427, %429, %cst_316 {dimension_numbers = #tpu.dot_dimension_numbers<[1], [0], [0], [1], [0, 0, 1, 1], [], []>} : vector<8x8xf32>, vector<8x64xf32>, vector<8x64xf32> -> vector<8x64xf32>
    %431 = arith.addf %404, %430 : vector<8x64xf32>
    %c11 = arith.constant 11 : index
    %c0_317 = arith.constant 0 : index
    %c0_318 = arith.constant 0 : index
    %432 = vector.load %arg7[%c11, %c0_317, %c0_318] : memref<16x64x8xf32, #tpu.memory_space<vmem>>, vector<1x64x8xf32>
    %433 = vector.shape_cast %432 : vector<1x64x8xf32> to vector<64x8xf32>
    %cst_319 = arith.constant dense<0.000000e+00> : vector<8x8xf32>
    %434 = tpu.matmul %349, %433, %cst_319 {dimension_numbers = #tpu.dot_dimension_numbers<[1], [0], [0], [1], [0, 0, 1, 1], [], []>} : vector<8x64xf32>, vector<64x8xf32>, vector<8x8xf32> -> vector<8x8xf32>
    %c11_320 = arith.constant 11 : index
    %c0_321 = arith.constant 0 : index
    %c0_322 = arith.constant 0 : index
    %435 = vector.load %arg8[%c11_320, %c0_321, %c0_322] : memref<16x64x8xf32, #tpu.memory_space<vmem>>, vector<1x64x8xf32>
    %436 = vector.shape_cast %435 : vector<1x64x8xf32> to vector<64x8xf32>
    %cst_323 = arith.constant dense<0.000000e+00> : vector<8x8xf32>
    %437 = tpu.matmul %349, %436, %cst_323 {dimension_numbers = #tpu.dot_dimension_numbers<[1], [0], [0], [1], [0, 0, 1, 1], [], []>} : vector<8x64xf32>, vector<64x8xf32>, vector<8x8xf32> -> vector<8x8xf32>
    %c11_324 = arith.constant 11 : index
    %c0_325 = arith.constant 0 : index
    %c0_326 = arith.constant 0 : index
    %438 = vector.load %arg9[%c11_324, %c0_325, %c0_326] : memref<16x64x8xf32, #tpu.memory_space<vmem>>, vector<1x64x8xf32>
    %439 = vector.shape_cast %438 : vector<1x64x8xf32> to vector<64x8xf32>
    %cst_327 = arith.constant dense<0.000000e+00> : vector<8x8xf32>
    %440 = tpu.matmul %349, %439, %cst_327 {dimension_numbers = #tpu.dot_dimension_numbers<[1], [0], [0], [1], [0, 0, 1, 1], [], []>} : vector<8x64xf32>, vector<64x8xf32>, vector<8x8xf32> -> vector<8x8xf32>
    %cst_328 = arith.constant dense<0.000000e+00> : vector<8x8xf32>
    %441 = tpu.matmul %434, %437, %cst_328 {dimension_numbers = #tpu.dot_dimension_numbers<[1], [1], [0], [0], [0, 0, 1, 0], [], []>} : vector<8x8xf32>, vector<8x8xf32>, vector<8x8xf32> -> vector<8x8xf32>
    %cst_329 = arith.constant 0.353553385 : f32
    %442 = vector.broadcast %cst_329 : f32 to vector<8x8xf32>
    %443 = arith.mulf %441, %442 : vector<8x8xf32>
    %cst_330 = arith.constant dense<0xFF800000> : vector<8xf32>
    %444 = vector.multi_reduction <maximumf>, %443, %cst_330 [1] : vector<8x8xf32> to vector<8xf32>
    %445 = vector.shape_cast %444 : vector<8xf32> to vector<8x1xf32>
    %446 = vector.broadcast %445 : vector<8x1xf32> to vector<8x8xf32>
    %447 = arith.subf %443, %446 : vector<8x8xf32>
    %448 = math.exp %447 : vector<8x8xf32>
    %cst_331 = arith.constant dense<0.000000e+00> : vector<8xf32>
    %449 = vector.multi_reduction <add>, %448, %cst_331 [1] : vector<8x8xf32> to vector<8xf32>
    %450 = vector.shape_cast %449 : vector<8xf32> to vector<8x1xf32>
    %451 = tpu.reciprocal %450 {approx = true} : vector<8x1xf32> -> vector<8x1xf32>
    %452 = vector.broadcast %451 : vector<8x1xf32> to vector<8x8xf32>
    %453 = arith.mulf %448, %452 : vector<8x8xf32>
    %cst_332 = arith.constant dense<0.000000e+00> : vector<8x8xf32>
    %454 = tpu.matmul %453, %440, %cst_332 {dimension_numbers = #tpu.dot_dimension_numbers<[1], [0], [0], [1], [0, 0, 1, 1], [], []>} : vector<8x8xf32>, vector<8x8xf32>, vector<8x8xf32> -> vector<8x8xf32>
    %c11_333 = arith.constant 11 : index
    %c0_334 = arith.constant 0 : index
    %c0_335 = arith.constant 0 : index
    %455 = vector.load %arg10[%c11_333, %c0_334, %c0_335] : memref<16x8x64xf32, #tpu.memory_space<vmem>>, vector<1x8x64xf32>
    %456 = vector.shape_cast %455 : vector<1x8x64xf32> to vector<8x64xf32>
    %cst_336 = arith.constant dense<0.000000e+00> : vector<8x64xf32>
    %457 = tpu.matmul %454, %456, %cst_336 {dimension_numbers = #tpu.dot_dimension_numbers<[1], [0], [0], [1], [0, 0, 1, 1], [], []>} : vector<8x8xf32>, vector<8x64xf32>, vector<8x64xf32> -> vector<8x64xf32>
    %458 = arith.addf %431, %457 : vector<8x64xf32>
    %c12 = arith.constant 12 : index
    %c0_337 = arith.constant 0 : index
    %c0_338 = arith.constant 0 : index
    %459 = vector.load %arg7[%c12, %c0_337, %c0_338] : memref<16x64x8xf32, #tpu.memory_space<vmem>>, vector<1x64x8xf32>
    %460 = vector.shape_cast %459 : vector<1x64x8xf32> to vector<64x8xf32>
    %cst_339 = arith.constant dense<0.000000e+00> : vector<8x8xf32>
    %461 = tpu.matmul %349, %460, %cst_339 {dimension_numbers = #tpu.dot_dimension_numbers<[1], [0], [0], [1], [0, 0, 1, 1], [], []>} : vector<8x64xf32>, vector<64x8xf32>, vector<8x8xf32> -> vector<8x8xf32>
    %c12_340 = arith.constant 12 : index
    %c0_341 = arith.constant 0 : index
    %c0_342 = arith.constant 0 : index
    %462 = vector.load %arg8[%c12_340, %c0_341, %c0_342] : memref<16x64x8xf32, #tpu.memory_space<vmem>>, vector<1x64x8xf32>
    %463 = vector.shape_cast %462 : vector<1x64x8xf32> to vector<64x8xf32>
    %cst_343 = arith.constant dense<0.000000e+00> : vector<8x8xf32>
    %464 = tpu.matmul %349, %463, %cst_343 {dimension_numbers = #tpu.dot_dimension_numbers<[1], [0], [0], [1], [0, 0, 1, 1], [], []>} : vector<8x64xf32>, vector<64x8xf32>, vector<8x8xf32> -> vector<8x8xf32>
    %c12_344 = arith.constant 12 : index
    %c0_345 = arith.constant 0 : index
    %c0_346 = arith.constant 0 : index
    %465 = vector.load %arg9[%c12_344, %c0_345, %c0_346] : memref<16x64x8xf32, #tpu.memory_space<vmem>>, vector<1x64x8xf32>
    %466 = vector.shape_cast %465 : vector<1x64x8xf32> to vector<64x8xf32>
    %cst_347 = arith.constant dense<0.000000e+00> : vector<8x8xf32>
    %467 = tpu.matmul %349, %466, %cst_347 {dimension_numbers = #tpu.dot_dimension_numbers<[1], [0], [0], [1], [0, 0, 1, 1], [], []>} : vector<8x64xf32>, vector<64x8xf32>, vector<8x8xf32> -> vector<8x8xf32>
    %cst_348 = arith.constant dense<0.000000e+00> : vector<8x8xf32>
    %468 = tpu.matmul %461, %464, %cst_348 {dimension_numbers = #tpu.dot_dimension_numbers<[1], [1], [0], [0], [0, 0, 1, 0], [], []>} : vector<8x8xf32>, vector<8x8xf32>, vector<8x8xf32> -> vector<8x8xf32>
    %cst_349 = arith.constant 0.353553385 : f32
    %469 = vector.broadcast %cst_349 : f32 to vector<8x8xf32>
    %470 = arith.mulf %468, %469 : vector<8x8xf32>
    %cst_350 = arith.constant dense<0xFF800000> : vector<8xf32>
    %471 = vector.multi_reduction <maximumf>, %470, %cst_350 [1] : vector<8x8xf32> to vector<8xf32>
    %472 = vector.shape_cast %471 : vector<8xf32> to vector<8x1xf32>
    %473 = vector.broadcast %472 : vector<8x1xf32> to vector<8x8xf32>
    %474 = arith.subf %470, %473 : vector<8x8xf32>
    %475 = math.exp %474 : vector<8x8xf32>
    %cst_351 = arith.constant dense<0.000000e+00> : vector<8xf32>
    %476 = vector.multi_reduction <add>, %475, %cst_351 [1] : vector<8x8xf32> to vector<8xf32>
    %477 = vector.shape_cast %476 : vector<8xf32> to vector<8x1xf32>
    %478 = tpu.reciprocal %477 {approx = true} : vector<8x1xf32> -> vector<8x1xf32>
    %479 = vector.broadcast %478 : vector<8x1xf32> to vector<8x8xf32>
    %480 = arith.mulf %475, %479 : vector<8x8xf32>
    %cst_352 = arith.constant dense<0.000000e+00> : vector<8x8xf32>
    %481 = tpu.matmul %480, %467, %cst_352 {dimension_numbers = #tpu.dot_dimension_numbers<[1], [0], [0], [1], [0, 0, 1, 1], [], []>} : vector<8x8xf32>, vector<8x8xf32>, vector<8x8xf32> -> vector<8x8xf32>
    %c12_353 = arith.constant 12 : index
    %c0_354 = arith.constant 0 : index
    %c0_355 = arith.constant 0 : index
    %482 = vector.load %arg10[%c12_353, %c0_354, %c0_355] : memref<16x8x64xf32, #tpu.memory_space<vmem>>, vector<1x8x64xf32>
    %483 = vector.shape_cast %482 : vector<1x8x64xf32> to vector<8x64xf32>
    %cst_356 = arith.constant dense<0.000000e+00> : vector<8x64xf32>
    %484 = tpu.matmul %481, %483, %cst_356 {dimension_numbers = #tpu.dot_dimension_numbers<[1], [0], [0], [1], [0, 0, 1, 1], [], []>} : vector<8x8xf32>, vector<8x64xf32>, vector<8x64xf32> -> vector<8x64xf32>
    %485 = arith.addf %458, %484 : vector<8x64xf32>
    %c13 = arith.constant 13 : index
    %c0_357 = arith.constant 0 : index
    %c0_358 = arith.constant 0 : index
    %486 = vector.load %arg7[%c13, %c0_357, %c0_358] : memref<16x64x8xf32, #tpu.memory_space<vmem>>, vector<1x64x8xf32>
    %487 = vector.shape_cast %486 : vector<1x64x8xf32> to vector<64x8xf32>
    %cst_359 = arith.constant dense<0.000000e+00> : vector<8x8xf32>
    %488 = tpu.matmul %349, %487, %cst_359 {dimension_numbers = #tpu.dot_dimension_numbers<[1], [0], [0], [1], [0, 0, 1, 1], [], []>} : vector<8x64xf32>, vector<64x8xf32>, vector<8x8xf32> -> vector<8x8xf32>
    %c13_360 = arith.constant 13 : index
    %c0_361 = arith.constant 0 : index
    %c0_362 = arith.constant 0 : index
    %489 = vector.load %arg8[%c13_360, %c0_361, %c0_362] : memref<16x64x8xf32, #tpu.memory_space<vmem>>, vector<1x64x8xf32>
    %490 = vector.shape_cast %489 : vector<1x64x8xf32> to vector<64x8xf32>
    %cst_363 = arith.constant dense<0.000000e+00> : vector<8x8xf32>
    %491 = tpu.matmul %349, %490, %cst_363 {dimension_numbers = #tpu.dot_dimension_numbers<[1], [0], [0], [1], [0, 0, 1, 1], [], []>} : vector<8x64xf32>, vector<64x8xf32>, vector<8x8xf32> -> vector<8x8xf32>
    %c13_364 = arith.constant 13 : index
    %c0_365 = arith.constant 0 : index
    %c0_366 = arith.constant 0 : index
    %492 = vector.load %arg9[%c13_364, %c0_365, %c0_366] : memref<16x64x8xf32, #tpu.memory_space<vmem>>, vector<1x64x8xf32>
    %493 = vector.shape_cast %492 : vector<1x64x8xf32> to vector<64x8xf32>
    %cst_367 = arith.constant dense<0.000000e+00> : vector<8x8xf32>
    %494 = tpu.matmul %349, %493, %cst_367 {dimension_numbers = #tpu.dot_dimension_numbers<[1], [0], [0], [1], [0, 0, 1, 1], [], []>} : vector<8x64xf32>, vector<64x8xf32>, vector<8x8xf32> -> vector<8x8xf32>
    %cst_368 = arith.constant dense<0.000000e+00> : vector<8x8xf32>
    %495 = tpu.matmul %488, %491, %cst_368 {dimension_numbers = #tpu.dot_dimension_numbers<[1], [1], [0], [0], [0, 0, 1, 0], [], []>} : vector<8x8xf32>, vector<8x8xf32>, vector<8x8xf32> -> vector<8x8xf32>
    %cst_369 = arith.constant 0.353553385 : f32
    %496 = vector.broadcast %cst_369 : f32 to vector<8x8xf32>
    %497 = arith.mulf %495, %496 : vector<8x8xf32>
    %cst_370 = arith.constant dense<0xFF800000> : vector<8xf32>
    %498 = vector.multi_reduction <maximumf>, %497, %cst_370 [1] : vector<8x8xf32> to vector<8xf32>
    %499 = vector.shape_cast %498 : vector<8xf32> to vector<8x1xf32>
    %500 = vector.broadcast %499 : vector<8x1xf32> to vector<8x8xf32>
    %501 = arith.subf %497, %500 : vector<8x8xf32>
    %502 = math.exp %501 : vector<8x8xf32>
    %cst_371 = arith.constant dense<0.000000e+00> : vector<8xf32>
    %503 = vector.multi_reduction <add>, %502, %cst_371 [1] : vector<8x8xf32> to vector<8xf32>
    %504 = vector.shape_cast %503 : vector<8xf32> to vector<8x1xf32>
    %505 = tpu.reciprocal %504 {approx = true} : vector<8x1xf32> -> vector<8x1xf32>
    %506 = vector.broadcast %505 : vector<8x1xf32> to vector<8x8xf32>
    %507 = arith.mulf %502, %506 : vector<8x8xf32>
    %cst_372 = arith.constant dense<0.000000e+00> : vector<8x8xf32>
    %508 = tpu.matmul %507, %494, %cst_372 {dimension_numbers = #tpu.dot_dimension_numbers<[1], [0], [0], [1], [0, 0, 1, 1], [], []>} : vector<8x8xf32>, vector<8x8xf32>, vector<8x8xf32> -> vector<8x8xf32>
    %c13_373 = arith.constant 13 : index
    %c0_374 = arith.constant 0 : index
    %c0_375 = arith.constant 0 : index
    %509 = vector.load %arg10[%c13_373, %c0_374, %c0_375] : memref<16x8x64xf32, #tpu.memory_space<vmem>>, vector<1x8x64xf32>
    %510 = vector.shape_cast %509 : vector<1x8x64xf32> to vector<8x64xf32>
    %cst_376 = arith.constant dense<0.000000e+00> : vector<8x64xf32>
    %511 = tpu.matmul %508, %510, %cst_376 {dimension_numbers = #tpu.dot_dimension_numbers<[1], [0], [0], [1], [0, 0, 1, 1], [], []>} : vector<8x8xf32>, vector<8x64xf32>, vector<8x64xf32> -> vector<8x64xf32>
    %512 = arith.addf %485, %511 : vector<8x64xf32>
    %c14 = arith.constant 14 : index
    %c0_377 = arith.constant 0 : index
    %c0_378 = arith.constant 0 : index
    %513 = vector.load %arg7[%c14, %c0_377, %c0_378] : memref<16x64x8xf32, #tpu.memory_space<vmem>>, vector<1x64x8xf32>
    %514 = vector.shape_cast %513 : vector<1x64x8xf32> to vector<64x8xf32>
    %cst_379 = arith.constant dense<0.000000e+00> : vector<8x8xf32>
    %515 = tpu.matmul %349, %514, %cst_379 {dimension_numbers = #tpu.dot_dimension_numbers<[1], [0], [0], [1], [0, 0, 1, 1], [], []>} : vector<8x64xf32>, vector<64x8xf32>, vector<8x8xf32> -> vector<8x8xf32>
    %c14_380 = arith.constant 14 : index
    %c0_381 = arith.constant 0 : index
    %c0_382 = arith.constant 0 : index
    %516 = vector.load %arg8[%c14_380, %c0_381, %c0_382] : memref<16x64x8xf32, #tpu.memory_space<vmem>>, vector<1x64x8xf32>
    %517 = vector.shape_cast %516 : vector<1x64x8xf32> to vector<64x8xf32>
    %cst_383 = arith.constant dense<0.000000e+00> : vector<8x8xf32>
    %518 = tpu.matmul %349, %517, %cst_383 {dimension_numbers = #tpu.dot_dimension_numbers<[1], [0], [0], [1], [0, 0, 1, 1], [], []>} : vector<8x64xf32>, vector<64x8xf32>, vector<8x8xf32> -> vector<8x8xf32>
    %c14_384 = arith.constant 14 : index
    %c0_385 = arith.constant 0 : index
    %c0_386 = arith.constant 0 : index
    %519 = vector.load %arg9[%c14_384, %c0_385, %c0_386] : memref<16x64x8xf32, #tpu.memory_space<vmem>>, vector<1x64x8xf32>
    %520 = vector.shape_cast %519 : vector<1x64x8xf32> to vector<64x8xf32>
    %cst_387 = arith.constant dense<0.000000e+00> : vector<8x8xf32>
    %521 = tpu.matmul %349, %520, %cst_387 {dimension_numbers = #tpu.dot_dimension_numbers<[1], [0], [0], [1], [0, 0, 1, 1], [], []>} : vector<8x64xf32>, vector<64x8xf32>, vector<8x8xf32> -> vector<8x8xf32>
    %cst_388 = arith.constant dense<0.000000e+00> : vector<8x8xf32>
    %522 = tpu.matmul %515, %518, %cst_388 {dimension_numbers = #tpu.dot_dimension_numbers<[1], [1], [0], [0], [0, 0, 1, 0], [], []>} : vector<8x8xf32>, vector<8x8xf32>, vector<8x8xf32> -> vector<8x8xf32>
    %cst_389 = arith.constant 0.353553385 : f32
    %523 = vector.broadcast %cst_389 : f32 to vector<8x8xf32>
    %524 = arith.mulf %522, %523 : vector<8x8xf32>
    %cst_390 = arith.constant dense<0xFF800000> : vector<8xf32>
    %525 = vector.multi_reduction <maximumf>, %524, %cst_390 [1] : vector<8x8xf32> to vector<8xf32>
    %526 = vector.shape_cast %525 : vector<8xf32> to vector<8x1xf32>
    %527 = vector.broadcast %526 : vector<8x1xf32> to vector<8x8xf32>
    %528 = arith.subf %524, %527 : vector<8x8xf32>
    %529 = math.exp %528 : vector<8x8xf32>
    %cst_391 = arith.constant dense<0.000000e+00> : vector<8xf32>
    %530 = vector.multi_reduction <add>, %529, %cst_391 [1] : vector<8x8xf32> to vector<8xf32>
    %531 = vector.shape_cast %530 : vector<8xf32> to vector<8x1xf32>
    %532 = tpu.reciprocal %531 {approx = true} : vector<8x1xf32> -> vector<8x1xf32>
    %533 = vector.broadcast %532 : vector<8x1xf32> to vector<8x8xf32>
    %534 = arith.mulf %529, %533 : vector<8x8xf32>
    %cst_392 = arith.constant dense<0.000000e+00> : vector<8x8xf32>
    %535 = tpu.matmul %534, %521, %cst_392 {dimension_numbers = #tpu.dot_dimension_numbers<[1], [0], [0], [1], [0, 0, 1, 1], [], []>} : vector<8x8xf32>, vector<8x8xf32>, vector<8x8xf32> -> vector<8x8xf32>
    %c14_393 = arith.constant 14 : index
    %c0_394 = arith.constant 0 : index
    %c0_395 = arith.constant 0 : index
    %536 = vector.load %arg10[%c14_393, %c0_394, %c0_395] : memref<16x8x64xf32, #tpu.memory_space<vmem>>, vector<1x8x64xf32>
    %537 = vector.shape_cast %536 : vector<1x8x64xf32> to vector<8x64xf32>
    %cst_396 = arith.constant dense<0.000000e+00> : vector<8x64xf32>
    %538 = tpu.matmul %535, %537, %cst_396 {dimension_numbers = #tpu.dot_dimension_numbers<[1], [0], [0], [1], [0, 0, 1, 1], [], []>} : vector<8x8xf32>, vector<8x64xf32>, vector<8x64xf32> -> vector<8x64xf32>
    %539 = arith.addf %512, %538 : vector<8x64xf32>
    %c15 = arith.constant 15 : index
    %c0_397 = arith.constant 0 : index
    %c0_398 = arith.constant 0 : index
    %540 = vector.load %arg7[%c15, %c0_397, %c0_398] : memref<16x64x8xf32, #tpu.memory_space<vmem>>, vector<1x64x8xf32>
    %541 = vector.shape_cast %540 : vector<1x64x8xf32> to vector<64x8xf32>
    %cst_399 = arith.constant dense<0.000000e+00> : vector<8x8xf32>
    %542 = tpu.matmul %349, %541, %cst_399 {dimension_numbers = #tpu.dot_dimension_numbers<[1], [0], [0], [1], [0, 0, 1, 1], [], []>} : vector<8x64xf32>, vector<64x8xf32>, vector<8x8xf32> -> vector<8x8xf32>
    %c15_400 = arith.constant 15 : index
    %c0_401 = arith.constant 0 : index
    %c0_402 = arith.constant 0 : index
    %543 = vector.load %arg8[%c15_400, %c0_401, %c0_402] : memref<16x64x8xf32, #tpu.memory_space<vmem>>, vector<1x64x8xf32>
    %544 = vector.shape_cast %543 : vector<1x64x8xf32> to vector<64x8xf32>
    %cst_403 = arith.constant dense<0.000000e+00> : vector<8x8xf32>
    %545 = tpu.matmul %349, %544, %cst_403 {dimension_numbers = #tpu.dot_dimension_numbers<[1], [0], [0], [1], [0, 0, 1, 1], [], []>} : vector<8x64xf32>, vector<64x8xf32>, vector<8x8xf32> -> vector<8x8xf32>
    %c15_404 = arith.constant 15 : index
    %c0_405 = arith.constant 0 : index
    %c0_406 = arith.constant 0 : index
    %546 = vector.load %arg9[%c15_404, %c0_405, %c0_406] : memref<16x64x8xf32, #tpu.memory_space<vmem>>, vector<1x64x8xf32>
    %547 = vector.shape_cast %546 : vector<1x64x8xf32> to vector<64x8xf32>
    %cst_407 = arith.constant dense<0.000000e+00> : vector<8x8xf32>
    %548 = tpu.matmul %349, %547, %cst_407 {dimension_numbers = #tpu.dot_dimension_numbers<[1], [0], [0], [1], [0, 0, 1, 1], [], []>} : vector<8x64xf32>, vector<64x8xf32>, vector<8x8xf32> -> vector<8x8xf32>
    %cst_408 = arith.constant dense<0.000000e+00> : vector<8x8xf32>
    %549 = tpu.matmul %542, %545, %cst_408 {dimension_numbers = #tpu.dot_dimension_numbers<[1], [1], [0], [0], [0, 0, 1, 0], [], []>} : vector<8x8xf32>, vector<8x8xf32>, vector<8x8xf32> -> vector<8x8xf32>
    %cst_409 = arith.constant 0.353553385 : f32
    %550 = vector.broadcast %cst_409 : f32 to vector<8x8xf32>
    %551 = arith.mulf %549, %550 : vector<8x8xf32>
    %cst_410 = arith.constant dense<0xFF800000> : vector<8xf32>
    %552 = vector.multi_reduction <maximumf>, %551, %cst_410 [1] : vector<8x8xf32> to vector<8xf32>
    %553 = vector.shape_cast %552 : vector<8xf32> to vector<8x1xf32>
    %554 = vector.broadcast %553 : vector<8x1xf32> to vector<8x8xf32>
    %555 = arith.subf %551, %554 : vector<8x8xf32>
    %556 = math.exp %555 : vector<8x8xf32>
    %cst_411 = arith.constant dense<0.000000e+00> : vector<8xf32>
    %557 = vector.multi_reduction <add>, %556, %cst_411 [1] : vector<8x8xf32> to vector<8xf32>
    %558 = vector.shape_cast %557 : vector<8xf32> to vector<8x1xf32>
    %559 = tpu.reciprocal %558 {approx = true} : vector<8x1xf32> -> vector<8x1xf32>
    %560 = vector.broadcast %559 : vector<8x1xf32> to vector<8x8xf32>
    %561 = arith.mulf %556, %560 : vector<8x8xf32>
    %cst_412 = arith.constant dense<0.000000e+00> : vector<8x8xf32>
    %562 = tpu.matmul %561, %548, %cst_412 {dimension_numbers = #tpu.dot_dimension_numbers<[1], [0], [0], [1], [0, 0, 1, 1], [], []>} : vector<8x8xf32>, vector<8x8xf32>, vector<8x8xf32> -> vector<8x8xf32>
    %c15_413 = arith.constant 15 : index
    %c0_414 = arith.constant 0 : index
    %c0_415 = arith.constant 0 : index
    %563 = vector.load %arg10[%c15_413, %c0_414, %c0_415] : memref<16x8x64xf32, #tpu.memory_space<vmem>>, vector<1x8x64xf32>
    %564 = vector.shape_cast %563 : vector<1x8x64xf32> to vector<8x64xf32>
    %cst_416 = arith.constant dense<0.000000e+00> : vector<8x64xf32>
    %565 = tpu.matmul %562, %564, %cst_416 {dimension_numbers = #tpu.dot_dimension_numbers<[1], [0], [0], [1], [0, 0, 1, 1], [], []>} : vector<8x8xf32>, vector<8x64xf32>, vector<8x64xf32> -> vector<8x64xf32>
    %566 = arith.addf %539, %565 : vector<8x64xf32>
    %567 = arith.addf %323, %566 : vector<8x64xf32>
    %c1_417 = arith.constant 1 : index
    %c0_418 = arith.constant 0 : index
    %c0_419 = arith.constant 0 : index
    %568 = vector.load %arg11[%c1_417, %c0_418, %c0_419] : memref<2x1x64xf32, #tpu.memory_space<vmem>>, vector<1x1x64xf32>
    %569 = vector.shape_cast %568 : vector<1x1x64xf32> to vector<1x64xf32>
    %570 = vector.broadcast %569 : vector<1x64xf32> to vector<8x64xf32>
    %571 = arith.addf %567, %570 : vector<8x64xf32>
    %c1_420 = arith.constant 1 : index
    %c0_421 = arith.constant 0 : index
    %c0_422 = arith.constant 0 : index
    %572 = vector.load %arg12[%c1_420, %c0_421, %c0_422] : memref<2x1x64xf32, #tpu.memory_space<vmem>>, vector<1x1x64xf32>
    %573 = vector.shape_cast %572 : vector<1x1x64xf32> to vector<1x64xf32>
    %c1_423 = arith.constant 1 : index
    %c0_424 = arith.constant 0 : index
    %c0_425 = arith.constant 0 : index
    %574 = vector.load %arg13[%c1_423, %c0_424, %c0_425] : memref<2x1x64xf32, #tpu.memory_space<vmem>>, vector<1x1x64xf32>
    %575 = vector.shape_cast %574 : vector<1x1x64xf32> to vector<1x64xf32>
    %cst_426 = arith.constant dense<0.000000e+00> : vector<8xf32>
    %576 = vector.multi_reduction <add>, %571, %cst_426 [1] : vector<8x64xf32> to vector<8xf32>
    %577 = vector.shape_cast %576 : vector<8xf32> to vector<8x1xf32>
    %cst_427 = arith.constant 6.400000e+01 : f32
    %578 = vector.broadcast %cst_427 : f32 to vector<8x1xf32>
    %579 = arith.divf %577, %578 : vector<8x1xf32>
    %580 = vector.broadcast %579 : vector<8x1xf32> to vector<8x64xf32>
    %581 = arith.subf %571, %580 : vector<8x64xf32>
    %582 = arith.mulf %581, %581 : vector<8x64xf32>
    %cst_428 = arith.constant dense<0.000000e+00> : vector<8xf32>
    %583 = vector.multi_reduction <add>, %582, %cst_428 [1] : vector<8x64xf32> to vector<8xf32>
    %584 = vector.shape_cast %583 : vector<8xf32> to vector<8x1xf32>
    %cst_429 = arith.constant 6.400000e+01 : f32
    %585 = vector.broadcast %cst_429 : f32 to vector<8x1xf32>
    %586 = arith.divf %584, %585 : vector<8x1xf32>
    %587 = vector.broadcast %579 : vector<8x1xf32> to vector<8x64xf32>
    %588 = arith.subf %571, %587 : vector<8x64xf32>
    %cst_430 = arith.constant 9.99999974E-6 : f32
    %589 = vector.broadcast %cst_430 : f32 to vector<8x1xf32>
    %590 = arith.addf %586, %589 : vector<8x1xf32>
    %591 = math.rsqrt %590 : vector<8x1xf32>
    %592 = vector.broadcast %591 : vector<8x1xf32> to vector<8x64xf32>
    %593 = arith.mulf %588, %592 : vector<8x64xf32>
    %594 = vector.broadcast %573 : vector<1x64xf32> to vector<8x64xf32>
    %595 = arith.mulf %593, %594 : vector<8x64xf32>
    %596 = vector.broadcast %575 : vector<1x64xf32> to vector<8x64xf32>
    %597 = arith.addf %595, %596 : vector<8x64xf32>
    %c1_431 = arith.constant 1 : index
    %c0_432 = arith.constant 0 : index
    %c0_433 = arith.constant 0 : index
    %598 = vector.load %arg14[%c1_431, %c0_432, %c0_433] : memref<2x64x128xf32, #tpu.memory_space<vmem>>, vector<1x64x128xf32>
    %599 = vector.shape_cast %598 : vector<1x64x128xf32> to vector<64x128xf32>
    %cst_434 = arith.constant dense<0.000000e+00> : vector<8x128xf32>
    %600 = tpu.matmul %597, %599, %cst_434 {dimension_numbers = #tpu.dot_dimension_numbers<[1], [0], [0], [1], [0, 0, 1, 1], [], []>} : vector<8x64xf32>, vector<64x128xf32>, vector<8x128xf32> -> vector<8x128xf32>
    %c1_435 = arith.constant 1 : index
    %c0_436 = arith.constant 0 : index
    %c0_437 = arith.constant 0 : index
    %601 = vector.load %arg15[%c1_435, %c0_436, %c0_437] : memref<2x1x128xf32, #tpu.memory_space<vmem>>, vector<1x1x128xf32>
    %602 = vector.shape_cast %601 : vector<1x1x128xf32> to vector<1x128xf32>
    %603 = vector.broadcast %602 : vector<1x128xf32> to vector<8x128xf32>
    %604 = arith.addf %600, %603 : vector<8x128xf32>
    %cst_438 = arith.constant 0.000000e+00 : f32
    %605 = vector.broadcast %cst_438 : f32 to vector<8x128xf32>
    %606 = arith.maximumf %604, %605 : vector<8x128xf32>
    %c1_439 = arith.constant 1 : index
    %c0_440 = arith.constant 0 : index
    %c0_441 = arith.constant 0 : index
    %607 = vector.load %arg16[%c1_439, %c0_440, %c0_441] : memref<2x128x64xf32, #tpu.memory_space<vmem>>, vector<1x128x64xf32>
    %608 = vector.shape_cast %607 : vector<1x128x64xf32> to vector<128x64xf32>
    %cst_442 = arith.constant dense<0.000000e+00> : vector<8x64xf32>
    %609 = tpu.matmul %606, %608, %cst_442 {dimension_numbers = #tpu.dot_dimension_numbers<[1], [0], [0], [1], [0, 0, 1, 1], [], []>} : vector<8x128xf32>, vector<128x64xf32>, vector<8x64xf32> -> vector<8x64xf32>
    %c1_443 = arith.constant 1 : index
    %c0_444 = arith.constant 0 : index
    %c0_445 = arith.constant 0 : index
    %610 = vector.load %arg17[%c1_443, %c0_444, %c0_445] : memref<2x1x64xf32, #tpu.memory_space<vmem>>, vector<1x1x64xf32>
    %611 = vector.shape_cast %610 : vector<1x1x64xf32> to vector<1x64xf32>
    %612 = vector.broadcast %611 : vector<1x64xf32> to vector<8x64xf32>
    %613 = arith.addf %609, %612 : vector<8x64xf32>
    %614 = arith.addf %571, %613 : vector<8x64xf32>
    %615 = vector.extract_strided_slice %614 {offsets = [4, 0], sizes = [4, 64], strides = [1, 1]} : vector<8x64xf32> to vector<4x64xf32>
    %c0_446 = arith.constant 0 : index
    %c0_447 = arith.constant 0 : index
    %c0_448 = arith.constant 0 : index
    %616 = vector.load %arg18[%c0_446, %c0_447, %c0_448] : memref<1x4x64xf32, #tpu.memory_space<vmem>>, vector<1x4x64xf32>
    %617 = vector.shape_cast %616 : vector<1x4x64xf32> to vector<4x64xf32>
    %618 = vector.shape_cast %615 : vector<4x64xf32> to vector<1x4x64xf32>
    tpu.vector_store %arg18[%c0_446, %c0_447, %c0_448], %618 {strides = array<i32>} : memref<1x4x64xf32, #tpu.memory_space<vmem>>, vector<1x4x64xf32>,
    return
  }
  func.func @transform_0(%arg0: i32) -> (i32, i32, i32) {
    %c0_i32 = arith.constant 0 : i32
    %c0_i32_0 = arith.constant 0 : i32
    %c0_i32_1 = arith.constant 0 : i32
    return %arg0, %c0_i32, %c0_i32_0 : i32, i32, i32
  }
  func.func @transform_1(%arg0: i32) -> (i32, i32, i32) {
    %c0_i32 = arith.constant 0 : i32
    %c0_i32_0 = arith.constant 0 : i32
    %c0_i32_1 = arith.constant 0 : i32
    %c0_i32_2 = arith.constant 0 : i32
    return %c0_i32, %c0_i32_0, %c0_i32_1 : i32, i32, i32
  }
  func.func @transform_2(%arg0: i32) -> (i32, i32, i32) {
    %c0_i32 = arith.constant 0 : i32
    %c0_i32_0 = arith.constant 0 : i32
    %c0_i32_1 = arith.constant 0 : i32
    %c0_i32_2 = arith.constant 0 : i32
    return %c0_i32, %c0_i32_0, %c0_i32_1 : i32, i32, i32
  }
  func.func @transform_3(%arg0: i32) -> (i32, i32) {
    %c0_i32 = arith.constant 0 : i32
    %c0_i32_0 = arith.constant 0 : i32
    %c0_i32_1 = arith.constant 0 : i32
    return %c0_i32, %c0_i32_0 : i32, i32
  }
  func.func @transform_4(%arg0: i32) -> (i32, i32, i32) {
    %c0_i32 = arith.constant 0 : i32
    %c0_i32_0 = arith.constant 0 : i32
    %c0_i32_1 = arith.constant 0 : i32
    %c0_i32_2 = arith.constant 0 : i32
    return %c0_i32, %c0_i32_0, %c0_i32_1 : i32, i32, i32
  }
  func.func @transform_5(%arg0: i32) -> (i32, i32, i32) {
    %c0_i32 = arith.constant 0 : i32
    %c0_i32_0 = arith.constant 0 : i32
    %c0_i32_1 = arith.constant 0 : i32
    %c0_i32_2 = arith.constant 0 : i32
    return %c0_i32, %c0_i32_0, %c0_i32_1 : i32, i32, i32
  }
  func.func @transform_6(%arg0: i32) -> (i32, i32, i32) {
    %c0_i32 = arith.constant 0 : i32
    %c0_i32_0 = arith.constant 0 : i32
    %c0_i32_1 = arith.constant 0 : i32
    %c0_i32_2 = arith.constant 0 : i32
    return %c0_i32, %c0_i32_0, %c0_i32_1 : i32, i32, i32
  }
  func.func @transform_7(%arg0: i32) -> (i32, i32, i32) {
    %c0_i32 = arith.constant 0 : i32
    %c0_i32_0 = arith.constant 0 : i32
    %c0_i32_1 = arith.constant 0 : i32
    %c0_i32_2 = arith.constant 0 : i32
    return %c0_i32, %c0_i32_0, %c0_i32_1 : i32, i32, i32
  }
  func.func @transform_8(%arg0: i32) -> (i32, i32, i32) {
    %c0_i32 = arith.constant 0 : i32
    %c0_i32_0 = arith.constant 0 : i32
    %c0_i32_1 = arith.constant 0 : i32
    %c0_i32_2 = arith.constant 0 : i32
    return %c0_i32, %c0_i32_0, %c0_i32_1 : i32, i32, i32
  }
  func.func @transform_9(%arg0: i32) -> (i32, i32, i32) {
    %c0_i32 = arith.constant 0 : i32
    %c0_i32_0 = arith.constant 0 : i32
    %c0_i32_1 = arith.constant 0 : i32
    %c0_i32_2 = arith.constant 0 : i32
    return %c0_i32, %c0_i32_0, %c0_i32_1 : i32, i32, i32
  }
  func.func @transform_10(%arg0: i32) -> (i32, i32, i32) {
    %c0_i32 = arith.constant 0 : i32
    %c0_i32_0 = arith.constant 0 : i32
    %c0_i32_1 = arith.constant 0 : i32
    %c0_i32_2 = arith.constant 0 : i32
    return %c0_i32, %c0_i32_0, %c0_i32_1 : i32, i32, i32
  }
  func.func @transform_11(%arg0: i32) -> (i32, i32, i32) {
    %c0_i32 = arith.constant 0 : i32
    %c0_i32_0 = arith.constant 0 : i32
    %c0_i32_1 = arith.constant 0 : i32
    %c0_i32_2 = arith.constant 0 : i32
    return %c0_i32, %c0_i32_0, %c0_i32_1 : i32, i32, i32
  }
  func.func @transform_12(%arg0: i32) -> (i32, i32, i32) {
    %c0_i32 = arith.constant 0 : i32
    %c0_i32_0 = arith.constant 0 : i32
    %c0_i32_1 = arith.constant 0 : i32
    %c0_i32_2 = arith.constant 0 : i32
    return %c0_i32, %c0_i32_0, %c0_i32_1 : i32, i32, i32
  }
  func.func @transform_13(%arg0: i32) -> (i32, i32, i32) {
    %c0_i32 = arith.constant 0 : i32
    %c0_i32_0 = arith.constant 0 : i32
    %c0_i32_1 = arith.constant 0 : i32
    %c0_i32_2 = arith.constant 0 : i32
    return %c0_i32, %c0_i32_0, %c0_i32_1 : i32, i32, i32
  }
  func.func @transform_14(%arg0: i32) -> (i32, i32, i32) {
    %c0_i32 = arith.constant 0 : i32
    %c0_i32_0 = arith.constant 0 : i32
    %c0_i32_1 = arith.constant 0 : i32
    %c0_i32_2 = arith.constant 0 : i32
    return %c0_i32, %c0_i32_0, %c0_i32_1 : i32, i32, i32
  }
  func.func @transform_15(%arg0: i32) -> (i32, i32, i32) {
    %c0_i32 = arith.constant 0 : i32
    %c0_i32_0 = arith.constant 0 : i32
    %c0_i32_1 = arith.constant 0 : i32
    %c0_i32_2 = arith.constant 0 : i32
    return %c0_i32, %c0_i32_0, %c0_i32_1 : i32, i32, i32
  }
  func.func @transform_16(%arg0: i32) -> (i32, i32, i32) {
    %c0_i32 = arith.constant 0 : i32
    %c0_i32_0 = arith.constant 0 : i32
    %c0_i32_1 = arith.constant 0 : i32
    %c0_i32_2 = arith.constant 0 : i32
    return %c0_i32, %c0_i32_0, %c0_i32_1 : i32, i32, i32
  }
  func.func @transform_17(%arg0: i32) -> (i32, i32, i32) {
    %c0_i32 = arith.constant 0 : i32
    %c0_i32_0 = arith.constant 0 : i32
    %c0_i32_1 = arith.constant 0 : i32
    return %arg0, %c0_i32, %c0_i32_0 : i32, i32, i32
  }
}

</mosaic_0001>

<bundles_post_ra>
// kernel: tpu_custom_call.1
= control target key start
LH: loop header
LB: loop body
LE: loop exit
PB: predicated region body
PF: predicated region fallthrough
CT: control target
= control target key end

     0   :  { %s14906_s0 = inlined_call_operand.vmem [shape: f32[2,1,64], index: 0, kind: input, shape index: {}]   ;;  %s14907_s1 = inlined_call_operand.vmem [shape: f32[4,64,64], index: 1, kind: input, shape index: {}]   ;;  %s14908_s2 = inlined_call_operand.vmem [shape: f32[4,1,64], index: 2, kind: input, shape index: {}]   ;;  %s14909_s3 = inlined_call_operand.vmem [shape: f32[4,64], index: 3, kind: input, shape index: {}]   ;;  %s14910_s4 = inlined_call_operand.vmem [shape: f32[2,1,64], index: 4, kind: input, shape index: {}]   ;;  %s14911_s5 = inlined_call_operand.vmem [shape: f32[2,1,64], index: 5, kind: input, shape index: {}]   ;;  %s14912_s6 = inlined_call_operand.vmem [shape: f32[16,64,8], index: 6, kind: input, shape index: {}]   ;;  %s14913_s7 = inlined_call_operand.vmem [shape: f32[16,64,8], index: 7, kind: input, shape index: {}]   ;;  %s14914_s8 = inlined_call_operand.vmem [shape: f32[16,64,8], index: 8, kind: input, shape index: {}]   ;;  %s14915_s9 = inlined_call_operand.vmem [shape: f32[16,8,64], index: 9, kind: input, shape index: {}]   ;;  %s14916_s10 = inlined_call_operand.vmem [shape: f32[2,1,64], index: 10, kind: input, shape index: {}]   ;;  %s14917_s11 = inlined_call_operand.vmem [shape: f32[2,1,64], index: 11, kind: input, shape index: {}]   ;;  %s14918_s12 = inlined_call_operand.vmem [shape: f32[2,1,64], index: 12, kind: input, shape index: {}]   ;;  %s14919_s13 = inlined_call_operand.vmem [shape: f32[2,64,128], index: 13, kind: input, shape index: {}]   ;;  %s14920_s14 = inlined_call_operand.vmem [shape: f32[2,1,128], index: 14, kind: input, shape index: {}]   ;;  %s14921_s15 = inlined_call_operand.vmem [shape: f32[2,128,64], index: 15, kind: input, shape index: {}]   ;;  %s14922_s16 = inlined_call_operand.vmem [shape: f32[2,1,64], index: 16, kind: input, shape index: {}]   ;;  %s14923_s17 = inlined_call_operand.hbm [shape: f32[2,4,64], index: 17, kind: output, shape index: {}]  }
   0x1   :  { %14934 = sst [smem:[#allocation13_spill]] %s14906_s0 }
   0x2   :  { %14935 = sst [smem:[#allocation14_spill]] %s14907_s1 }
   0x3   :  { %14936 = sst [smem:[#allocation15_spill]] %s14923_s17 }
   0x4   :  { %22 = vsyncpa [#allocation4], 0 }
   0x5   :  { %24 = vsyncpa [#allocation4 + $0x1], 0  ;;  %s12537_s24 = smov 0   ;;  %s12539_s25 = smov 0  }
   0x6   :  { %s12541_s26 = smov 0   ;;  %s12543_s27 = smov 0  }
   0x7 LB: > { %14937 = sst [smem:[#allocation6_spill]] %s12429_s24  ;;  %s12558_s28 = sadd.s32 4294967295, %s12441_s27   ;;  %s12441_s27 = sphi %s12543_s27, %s14953_s27   ;;  %s12437_s26 = sphi %s12541_s26, %s14958_s26   ;;  %s12433_s25 = sphi %s12539_s25, %s14957_s25   ;;  %s12429_s24 = sphi %s12537_s24, %s14956_s24  }
   0x8   : > { %14938 = sst [smem:[#allocation7_spill]] %s12437_s26  ;;  %s9042_s29 = sadd.s32 4294967294, %s12441_s27  }
   0x9   : > { %14939 = sst [smem:[#allocation8_spill]] %s12441_s27  ;;  %s12562_s0 = sadd.s32 1, %s12441_s27  }
   0xa   : > { %14940 = sst [smem:[#allocation9_spill]] %s12562_s0  ;;  %s399_s30 = sadd.s32 1, %s12437_s26 }
   0xb   : > { %s396_s18 = ssub.s32 %s12441_s27, %s12562_s0  ;;  %p409_p0 = scmp.ne.s32.totalorder %s12437_s26, %s12433_s25 }
   0xc   : > { %p397_p1 = scmp.eq.s32.totalorder %s396_s18, 0  ;;  %p410_p2 = scmp.eq.s32.totalorder %s12558_s28, 1 }
   0xd   : > { %p415_p3 = scmp.ne.s32.totalorder %s12433_s25, %s12429_s24  ;;  %p416_p4 = scmp.eq.s32.totalorder %s9042_s29, 1 }
   0xe   : > { %s12573_s19 = scalar_select %p397_p1, %s12437_s26, %s399_s30  }
   0xf   : > { %p12575_p5 = por %p410_p2, %p409_p0  ;;  %p12579_p6 = por %p416_p4, %p415_p3 }
  0x10   : > { %14941 = sst [smem:[#allocation10_spill]] %s12573_s19  ;;  %p9045_p7 = scmp.ge.s32.totalorder %s12441_s27, 1 }
  0x11   : > { %s14942_s1 = scalar_select %p12575_p5, 1, 0 }
  0x12   : > { %s14944_s20 = scalar_select %p12579_p6, 1, 0 }
  0x13   : > { %14943 = sst [smem:[#allocation11_spill]] %s14942_s1  ;;  %p488_p8 = scmp.lt.s32.totalorder %s12441_s27, 3 }
  0x14   : > { %14945 = sst [smem:[#allocation12_spill]] %s14944_s20 }
  0x15   : > { %p489_p9 = pnand %p9045_p7, %p488_p8 }
  0x16   : > { %s14946_s23 = sld [smem:[#allocation14_spill]] (!%p489_p9)  ;;  %v12443_v3 = vmov (!%p489_p9), 0.0|0.0   ;;  %vm12444_vm0 = vmmov (!%p489_p9), 0   ;;  %v12445_v11 = vmov (!%p489_p9), 0.0   ;;  %p538_p10 = scmp.lt.s32.totalorder (!%p489_p9), %s12558_s28, 1  ;;  %vm551_vm1 = vcmask (!%p489_p9), 523264  }
  0x17   : > { %492 = sbr.rel (%p489_p9) target bundleno = 17918 (0x45fe), region = 88  ;;  %11568 = vmatprep.subr.bf16.mxu0 (!%p489_p9), %v12443_v3  ;;  %11580 = vmatprep.subr.bf16.mxu1 (!%p489_p9), %v12443_v3  ;;  %s14947_s30 = sld [smem:[#allocation13_spill]] (!%p489_p9)  ;;  %v873_v51 = vld [vmem:[%s14909_s3] sm:$0xf] (!%p489_p9)  ;;  %vm874_vm2 = vcmask (!%p489_p9), 519168   ;;  %vm625_vm3 = vcmask (!%p489_p9), 516096  }
  0x18   : > { %10248 = vmatprep.mubr.msk.f32.mxu0 (!%p489_p9), %vm12444_vm0, %v12445_v11  ;;  %10267 = vmatprep.mubr.msk.f32.mxu1 (!%p489_p9), %vm12444_vm0, %v12445_v11  ;;  %875 = vst.msk [vmem:[#allocation2 + $0x4] sm:$0xf] (!%p489_p9), %vm874_vm2, %v873_v51  ;;  %v550_v52 = vld [vmem:[%s14908_s2] sm:$0x1] (!%p489_p9)  ;;  %v9056_v53 = vld [vmem:[%s14908_s2 + $0x1] sm:$0x1] (!%p489_p9) }
  0x19   : > { %v9066_v60 = vld [vmem:[%s14908_s2 + $0x2] sm:$0x1] (!%p489_p9)  ;;  %v9076_v61 = vld [vmem:[%s14908_s2 + $0x3] sm:$0x1] (!%p489_p9)  ;;  %v1068_v51 = vld [vmem:[%s14914_s8 + $0x10] sm:$0xff] (!%p489_p9)  ;;  %vm1144_vm4 = vcmask (!%p489_p9), 64512  }
  0x1a   : > { %s9613_s18 = sshll.u32 (!%p489_p9), %s12558_s28, 6  ;;  %vm8970_vm5 = vcmask (!%p489_p9), 523268   ;;  %s14949_s17 = sld [smem:[#allocation15_spill]] (!%p489_p9) }
  0x1c   : > { %v542_v0 = vld [vmem:[%s14946_s23] sm:$0xff] (!%p489_p9)  ;;  %v543_v1 = vld [vmem:[%s14946_s23 + $0x8] sm:$0xff] (!%p489_p9)  ;;  %v544_v6 = vld [vmem:[%s14946_s23 + $0x10] sm:$0xff] (!%p489_p9) }
  0x1d   : > { %v9048_v2 = vld [vmem:[%s14946_s23 + $0x40] sm:$0xff] (!%p489_p9)  ;;  %v11569_v4 = vpack.c.bf16 (!%p489_p9), %v543_v1, %v542_v0  ;;  %v9049_v5 = vld [vmem:[%s14946_s23 + $0x48] sm:$0xff] (!%p489_p9)  ;;  %v545_v7 = vld [vmem:[%s14946_s23 + $0x18] sm:$0xff] (!%p489_p9) }
  0x1e   : > { %v11581_v8 = vpack.c.bf16 %v9049_v5, %v9048_v2  ;;  %v9050_v9 = vld [vmem:[%s14946_s23 + $0x50] sm:$0xff]  ;;  %v9051_v10 = vld [vmem:[%s14946_s23 + $0x58] sm:$0xff]  ;;  %v11572_v12 = vpack.c.bf16 %v545_v7, %v544_v6  ;;  %v546_v14 = vld [vmem:[%s14946_s23 + $0x20] sm:$0xff]  ;;  %s539_s24 = scalar_select %p538_p10, %s12558_s28, 1 }
  0x1f   : > { %11570 = vmatpush3.bf16.msra.mxu0 %v11569_v4  ;;  %v11584_v13 = vpack.c.bf16 %v9051_v10, %v9050_v9  ;;  %v547_v15 = vld [vmem:[%s14946_s23 + $0x28] sm:$0xff]  ;;  %v9052_v16 = vld [vmem:[%s14946_s23 + $0x60] sm:$0xff]  ;;  %v548_v20 = vld [vmem:[%s14946_s23 + $0x30] sm:$0xff] }
  0x20   : > { %11582 = vmatpush3.bf16.msra.mxu1 %v11581_v8  ;;  %11571 = vmatprep.subr.bf16.mxu0 %v12443_v3  ;;  %v9053_v17 = vld [vmem:[%s14946_s23 + $0x68] sm:$0xff]  ;;  %v11575_v18 = vpack.c.bf16 %v547_v15, %v546_v14  ;;  %v549_v21 = vld [vmem:[%s14946_s23 + $0x38] sm:$0xff]  ;;  %v9054_v22 = vld [vmem:[%s14946_s23 + $0x70] sm:$0xff]  ;;  %s540_s26 = scalar_lea.vmem %s14947_s30, %s539_s24  ;;  %s14864_s1 = scalar_lea.hbm %s14949_s17, %s9613_s18 }
  0x21   : > { %11583 = vmatprep.subr.bf16.mxu1 %v12443_v3  ;;  %v11587_v19 = vpack.c.bf16 %v9053_v17, %v9052_v16  ;;  %v9055_v23 = vld [vmem:[%s14946_s23 + $0x78] sm:$0xff]  ;;  %v11578_v24 = vpack.c.bf16 %v549_v21, %v548_v20  ;;  %v9058_v26 = vld [vmem:[%s14946_s23 + $0x80] sm:$0xff]  ;;  %v9059_v27 = vld [vmem:[%s14946_s23 + $0x88] sm:$0xff] }
  0x22   : > { %v11590_v25 = vpack.c.bf16 %v9055_v23, %v9054_v22  ;;  %v9068_v28 = vld [vmem:[%s14946_s23 + $0xc0] sm:$0xff]  ;;  %v9069_v29 = vld [vmem:[%s14946_s23 + $0xc8] sm:$0xff]  ;;  %v11593_v31 = vpack.c.bf16 %v9059_v27, %v9058_v26  ;;  %v9060_v33 = vld [vmem:[%s14946_s23 + $0x90] sm:$0xff] }
  0x23   : > { %11573 = vmatpush3.bf16.msra.mxu0 %v11572_v12  ;;  %v541_v30 = vld [vmem:[%s540_s26] sm:$0x1]  ;;  %v11605_v32 = vpack.c.bf16 %v9069_v29, %v9068_v28  ;;  %v9061_v34 = vld [vmem:[%s14946_s23 + $0x98] sm:$0xff]  ;;  %v9070_v35 = vld [vmem:[%s14946_s23 + $0xd0] sm:$0xff]  ;;  %s535_s26 = sand.u32 1, %s12433_s25  }
  0x24   : > { %11585 = vmatpush3.bf16.msra.mxu1 %v11584_v13  ;;  %11574 = vmatprep.subr.bf16.mxu0 %v12443_v3  ;;  %v9071_v36 = vld [vmem:[%s14946_s23 + $0xd8] sm:$0xff]  ;;  %v11596_v37 = vpack.c.bf16 %v9061_v34, %v9060_v33  ;;  %v9062_v39 = vld [vmem:[%s14946_s23 + $0xa0] sm:$0xff]  ;;  %v9063_v40 = vld [vmem:[%s14946_s23 + $0xa8] sm:$0xff]  ;;  %s9046_s0 = sshll.u32 %s535_s26, 2  ;;  %s8973_s30 = scalar_lea.sflag [#allocation4], %s535_s26 }
  0x25   : > { %11586 = vmatprep.subr.bf16.mxu1 %v12443_v3  ;;  %v11608_v38 = vpack.c.bf16 %v9071_v36, %v9070_v35  ;;  %v9072_v41 = vld [vmem:[%s14946_s23 + $0xe0] sm:$0xff]  ;;  %v9073_v42 = vld [vmem:[%s14946_s23 + $0xe8] sm:$0xff]  ;;  %v11599_v43 = vpack.c.bf16 %v9063_v40, %v9062_v39  ;;  %v9064_v45 = vld [vmem:[%s14946_s23 + $0xb0] sm:$0xff]  ;;  %s537_s27 = scalar_lea.vmem [#allocation3], %s9046_s0  ;;  %s12446_s0 = smov [#allocation3]  }
  0x26   : > { %v11611_v44 = vpack.c.bf16 %v9073_v42, %v9072_v41  ;;  %v9065_v46 = vld [vmem:[%s14946_s23 + $0xb8] sm:$0xff]  ;;  %v9074_v47 = vld [vmem:[%s14946_s23 + $0xf0] sm:$0xff]  ;;  %v907_v13 = vld [vmem:[%s14912_s6] sm:$0xff]  ;;  %s8986_s24 = sshll.u32 %s537_s27, 4  ;;  %s12383_s20 = sshll.u32 %s12446_s0, 4  ;;  %s14866_s24 = int_to_ptr.vmem [resolvable:$true] %s8986_s24  ;;  %s12384_s20 = int_to_ptr.vmem [resolvable:$false] %s12383_s20 }
  0x27   : > { %11576 = vmatpush3.bf16.msra.mxu0 %v11575_v18  ;;  %v9075_v48 = vld [vmem:[%s14946_s23 + $0xf8] sm:$0xff]  ;;  %v11602_v49 = vpack.c.bf16 %v9065_v46, %v9064_v45  ;;  %v908_v14 = vld [vmem:[%s14912_s6 + $0x8] sm:$0xff]  ;;  %v988_v15 = vld [vmem:[%s14913_s7] sm:$0xff]  ;;  %s12379_s28 = scalar_lea.vmem %s14866_s24, 64  ;;  %s12385_s21 = scalar_lea.vmem %s12384_s20, 128 }
  0x28   : > { %11588 = vmatpush3.bf16.msra.mxu1 %v11587_v19  ;;  %11577 = vmatprep.subr.bf16.mxu0 %v12443_v3  ;;  %v11614_v50 = vpack.c.bf16 %v9075_v48, %v9074_v47  ;;  %v11617_v16 = vpack.c.bf16 %v908_v14, %v907_v13  ;;  %v989_v17 = vld [vmem:[%s14913_s7 + $0x8] sm:$0xff]  ;;  %v909_v19 = vld [vmem:[%s14912_s6 + $0x10] sm:$0xff]  ;;  %v910_v20 = vld [vmem:[%s14912_s6 + $0x18] sm:$0xff]  ;;  %p12380_p11 = scmp.ne.s32.totalorder %s14866_s24, %s12379_s28  ;;  %p12386_p0 = scmp.lt.s32.totalorder %s14866_s24, %s12384_s20 }
  0x29   : > { %11589 = vmatprep.subr.bf16.mxu1 %v12443_v3  ;;  %v11629_v18 = vpack.c.bf16 %v989_v17, %v988_v15  ;;  %v990_v21 = vld [vmem:[%s14913_s7 + $0x10] sm:$0xff]  ;;  %v11620_v22 = vpack.c.bf16 %v910_v20, %v909_v19  ;;  %v991_v23 = vld [vmem:[%s14913_s7 + $0x18] sm:$0xff]  ;;  %v912_v26 = vld [vmem:[%s14912_s6 + $0x28] sm:$0xff]  ;;  %p12387_p1 = scmp.lt.s32.totalorder %s12385_s21, %s12379_s28 }
  0x2a   : > { %v992_v27 = vld [vmem:[%s14913_s7 + $0x20] sm:$0xff]  ;;  %v993_v29 = vld [vmem:[%s14913_s7 + $0x28] sm:$0xff]  ;;  %v994_v33 = vld [vmem:[%s14913_s7 + $0x30] sm:$0xff]  ;;  %p12381_p12 = pnand %p12380_p11, %p12575_p5 }
  0x2b   : > { %11579 = vmatpush3.bf16.msra.mxu0 %v11578_v24  ;;  %v11632_v24 = vpack.c.bf16 %v991_v23, %v990_v21  ;;  %v995_v35 = vld [vmem:[%s14913_s7 + $0x38] sm:$0xff]  ;;  %v9078_v41 = vld [vmem:[%s14910_s4] ss:$0 sm:$0xff]  ;;  %v9087_v46 = vld [vmem:[%s14912_s6 + $0x48] sm:$0xff]  ;;  %p12388_p2 = por %p12387_p1, %p12386_p0 }
  0x2c   : > { %11591 = vmatpush3.bf16.msra.mxu1 %v11590_v25  ;;  %11592 = vmatprep.subr.bf16.mxu0 %v12443_v3  ;;  %v911_v25 = vld [vmem:[%s14912_s6 + $0x20] sm:$0xff]  ;;  %v11638_v36 = vpack.c.bf16 %v995_v35, %v994_v33  ;;  %v9109_v15 = vld [vmem:[%s14914_s8 + $0x68] sm:$0xff]  ;;  %v9110_v17 = vld [vmem:[%s14914_s8 + $0x70] sm:$0xff]  ;;  %p12382_p13 = pneg %p12381_p12 }
  0x2d   : > { %11604 = vmatprep.subr.bf16.mxu1 %v12443_v3  ;;  %v11623_v28 = vpack.c.bf16 %v912_v26, %v911_v25  ;;  %v1066_v42 = vld [vmem:[%s14914_s8] sm:$0xff] }
  0x2e   : > { %10249 = vmatmul.mubr.msk.f32.vlgmr.msra.gmra.mrb[0].mxu0 %vm551_vm1, %v541_v30  ;;  %v9086_v45 = vld [vmem:[%s14912_s6 + $0x40] sm:$0xff]  ;;  %p12389_p3 = pnand %p12388_p2, %p12382_p13 }
  0x2f   : > { %10268 = vmatmul.mubr.msk.f32.vlgmr.msra.gmra.mrb[0].mxu1 %vm551_vm1, %v541_v30  ;;  %11594 = vmatpush3.bf16.msra.mxu0 %v11593_v31  ;;  %v913_v31 = vld [vmem:[%s14912_s6 + $0x30] sm:$0xff]  ;;  %v9079_v47 = vld [vmem:[%s14911_s5] ss:$0 sm:$0xff] }
  0x30   : > { %11606 = vmatpush3.bf16.msra.mxu1 %v11605_v32  ;;  %11595 = vmatprep.subr.bf16.mxu0 %v12443_v3  ;;  %v914_v32 = vld [vmem:[%s14912_s6 + $0x38] sm:$0xff]  ;;  %v9108_v14 = vld [vmem:[%s14914_s8 + $0x60] sm:$0xff] }
  0x31   : > { %11607 = vmatprep.subr.bf16.mxu1 %v12443_v3  ;;  %10286 = vmatprep.mubr.msk.f32.mxu0 %vm12444_vm0, %v12445_v11  ;;  %v11626_v34 = vpack.c.bf16 %v914_v32, %v913_v31 }
  0x32   : > { %10305 = vmatprep.mubr.msk.f32.mxu1 %vm12444_vm0, %v12445_v11 }
  0x33   : > { %11597 = vmatpush3.bf16.msra.mxu0 %v11596_v37 }
  0x34   : > { %11609 = vmatpush3.bf16.msra.mxu1 %v11608_v38  ;;  %11598 = vmatprep.subr.bf16.mxu0 %v12443_v3 }
  0x35   : > { %11610 = vmatprep.subr.bf16.mxu1 %v12443_v3 }
  0x37   : > { %11600 = vmatpush3.bf16.msra.mxu0 %v11599_v43 }
  0x38   : > { %11612 = vmatpush3.bf16.msra.mxu1 %v11611_v44  ;;  %11601 = vmatprep.subr.bf16.mxu0 %v12443_v3  ;;  %v1067_v44 = vld [vmem:[%s14914_s8 + $0x8] sm:$0xff] }
  0x39   : > { %11613 = vmatprep.subr.bf16.mxu1 %v12443_v3 }
  0x3b   : > { %11603 = vmatpush3.bf16.msra.mxu0 %v11602_v49  ;;  %v11641_v49 = vpack.c.bf16 %v1067_v44, %v1066_v42  ;;  %v9096_v42 = vld [vmem:[%s14913_s7 + $0x48] sm:$0xff] }
  0x3c   : > { %11615 = vmatpush3.bf16.msra.mxu1 %v11614_v50  ;;  %11616 = vmatprep.subr.bf16.mxu0 %v12443_v3  ;;  %v11653_v50 = vpack.c.bf16 %v9087_v46, %v9086_v45  ;;  %v9097_v46 = vld [vmem:[%s14913_s7 + $0x50] sm:$0xff] }
  0x3d   : > { %11628 = vmatprep.subr.bf16.mxu1 %v12443_v3 }
  0x3e   : > { %10287 = vmatmul.mubr.msk.f32.vlgmr.msra.gmra.mrb[2].mxu0 %vm551_vm1, %v541_v30 }
  0x3f   : > { %10306 = vmatmul.mubr.msk.f32.vlgmr.msra.gmra.mrb[2].mxu1 %vm551_vm1, %v541_v30  ;;  %10324 = vmatprep.mubr.msk.f32.mxu0 %vm12444_vm0, %v12445_v11  ;;  %v11635_v30 = vpack.c.bf16 %v993_v29, %v992_v27 }
  0x40   : > { %10343 = vmatprep.mubr.msk.f32.mxu1 %vm12444_vm0, %v12445_v11  ;;  %11618 = vmatpush3.bf16.msra.mxu0 %v11617_v16  ;;  %v11683_v16 = vpack.c.bf16 %v9109_v15, %v9108_v14 }
  0x41   : > { %11630 = vmatpush3.bf16.msra.mxu1 %v11629_v18  ;;  %11619 = vmatprep.subr.bf16.mxu0 %v12443_v3  ;;  %v9111_v18 = vld [vmem:[%s14914_s8 + $0x78] sm:$0xff] }
  0x42   : > { %11631 = vmatprep.subr.bf16.mxu1 %v12443_v3  ;;  %v11686_v19 = vpack.c.bf16 %v9111_v18, %v9110_v17 }
  0x44   : > { %11621 = vmatpush3.bf16.msra.mxu0 %v11620_v22 }
  0x45   : > { %11633 = vmatpush3.bf16.msra.mxu1 %v11632_v24  ;;  %11622 = vmatprep.subr.bf16.mxu0 %v12443_v3 }
  0x46   : > { %11634 = vmatprep.subr.bf16.mxu1 %v12443_v3 }
  0x48   : > { %11624 = vmatpush3.bf16.msra.mxu0 %v11623_v28 }
  0x49   : > { %11636 = vmatpush3.bf16.msra.mxu1 %v11635_v30  ;;  %11625 = vmatprep.subr.bf16.mxu0 %v12443_v3 }
  0x4a   : > { %11637 = vmatprep.subr.bf16.mxu1 %v12443_v3 }
  0x4c   : > { %11627 = vmatpush3.bf16.msra.mxu0 %v11626_v34 }
  0x4d   : > { %11639 = vmatpush3.bf16.msra.mxu1 %v11638_v36  ;;  %11640 = vmatprep.subr.bf16.mxu0 %v12443_v3 }
  0x4e   : > { %11652 = vmatprep.subr.bf16.mxu1 %v12443_v3 }
 0x101   : > { %v621_v54 = vpop.f32.mrb[0].mxu0 }
 0x102   : > { %v622_v55 = vadd.f32 %v621_v54, %v550_v52  ;;  %v704_v56 = vpop.f32.mrb[0].mxu1  ;;  %v10250_v57 = vpop.f32.mrb[1].mxu0  ;;  %v9088_v54 = vld [vmem:[%s14912_s6 + $0x50] sm:$0xff] }
 0x103   : > { %v705_v58 = vadd.f32 %v9056_v53, %v704_v56  ;;  %v10269_v59 = vpop.f32.mrb[1].mxu1  ;;  %v1069_v53 = vld [vmem:[%s14914_s8 + $0x18] sm:$0xff] }
 0x104   : > { %626 = vst.msk [vmem:[#allocation2] sm:$0x1] %vm625_vm3, %v622_v55  ;;  %v9089_v55 = vld [vmem:[%s14912_s6 + $0x58] sm:$0xff]  ;;  %v11644_v56 = vpack.c.bf16 %v1069_v53, %v1068_v51  ;;  %v1071_v59 = vld [vmem:[%s14914_s8 + $0x28] sm:$0xff]  ;;  %v9101_v53 = vld [vmem:[%s14913_s7 + $0x70] sm:$0xff] }
 0x105   : > { %708 = vst.msk [vmem:[#allocation2 + $0x1] sm:$0x1] %vm625_vm3, %v705_v58  ;;  %v11656_v57 = vpack.c.bf16 %v9089_v55, %v9088_v54  ;;  %v1070_v58 = vld [vmem:[%s14914_s8 + $0x20] sm:$0xff]  ;;  %v9102_v54 = vld [vmem:[%s14913_s7 + $0x78] sm:$0xff] }
 0x106   : > { %v11674_v55 = vpack.c.bf16 %v9102_v54, %v9101_v53  ;;  %v9160_v54 = vld [vmem:[%s14913_s7 + $0xc0] sm:$0xff] }
 0x111   : > { %v786_v62 = vpop.f32.mrb[2].mxu0 }
 0x112   : > { %v787_v63 = vadd.f32 %v9066_v60, %v786_v62  ;;  %v868_v0 = vpop.f32.mrb[2].mxu1  ;;  %v10288_v1 = vpop.f32.mrb[3].mxu0  ;;  %v9090_v60 = vld [vmem:[%s14912_s6 + $0x60] sm:$0xff]  ;;  %v11647_v62 = vpack.c.bf16 %v1071_v59, %v1070_v58  ;;  %v9130_v59 = vld [vmem:[%s14913_s7 + $0x90] sm:$0xff] }
 0x113   : > { %v869_v2 = vadd.f32 %v9076_v61, %v868_v0  ;;  %v10307_v4 = vpop.f32.mrb[3].mxu1  ;;  %v9091_v61 = vld [vmem:[%s14912_s6 + $0x68] sm:$0xff]  ;;  %v1072_v0 = vld [vmem:[%s14914_s8 + $0x30] sm:$0xff]  ;;  %v1073_v1 = vld [vmem:[%s14914_s8 + $0x38] sm:$0xff] }
 0x114   : > { %790 = vst.msk [vmem:[#allocation2 + $0x2] sm:$0x1] %vm625_vm3, %v787_v63  ;;  %v11659_v63 = vpack.c.bf16 %v9091_v61, %v9090_v60  ;;  %v9093_v4 = vld [vmem:[%s14912_s6 + $0x78] sm:$0xff] }
 0x115   : > { %872 = vst.msk [vmem:[#allocation2 + $0x3] sm:$0x1] %vm625_vm3, %v869_v2  ;;  %v9092_v2 = vld [vmem:[%s14912_s6 + $0x70] sm:$0xff]  ;;  %v9131_v60 = vld [vmem:[%s14913_s7 + $0x98] sm:$0xff] }
 0x11c   : > { %v876_v5 = vld [vmem:[#allocation2] sm:$0xff] }
 0x11d   : > { %v879_v6 = vsel %vm551_vm1, %v876_v5, 0.0 }
 0x11e   : > { %880 = vadd.xlane.f32.xlu0 %v879_v6  ;;  %v11662_v6 = vpack.c.bf16 %v9093_v4, %v9092_v2  ;;  %v9134_v4 = vld [vmem:[%s14913_s7 + $0xb0] sm:$0xff] }
 0x1ab   : > { %v881_v7 = vpop.xlane.xlu0 %880 }
 0x1ac   : > { %v883_v8 = vmul.f32 0.015625, %v881_v7  ;;  %v9104_v7 = vld [vmem:[%s14914_s8 + $0x40] sm:$0xff] }
 0x1ae   : > { %v884_v9 = vsub.f32 %v876_v5, %v883_v8  ;;  %v11650_v5 = vpack.c.bf16 %v1073_v1, %v1072_v0  ;;  %v9105_v8 = vld [vmem:[%s14914_s8 + $0x48] sm:$0xff]  ;;  %v9132_v0 = vld [vmem:[%s14913_s7 + $0xa0] sm:$0xff] }
 0x1af   : > { %v9133_v1 = vld [vmem:[%s14913_s7 + $0xa8] sm:$0xff] }
 0x1b0   : > { %v885_v10 = vmul.f32 %v884_v9, %v884_v9  ;;  %v11707_v2 = vpack.c.bf16 %v9133_v1, %v9132_v0  ;;  %v9167_v0 = vld [vmem:[%s14913_s7 + $0xf8] sm:$0xff] }
 0x1b2   : > { %v886_v12 = vsel %vm551_vm1, %v885_v10, 0.0  ;;  %v9106_v10 = vld [vmem:[%s14914_s8 + $0x50] sm:$0xff] }
 0x1b3   : > { %887 = vadd.xlane.f32.xlu0 %v886_v12  ;;  %v9107_v12 = vld [vmem:[%s14914_s8 + $0x58] sm:$0xff] }
 0x1b4   : > { %v11680_v13 = vpack.c.bf16 %v9107_v12, %v9106_v10 }
 0x240   : > { %v888_v37 = vpop.xlane.xlu0 %887 }
 0x241   : > { %v889_v38 = vmul.f32 0.015625, %v888_v37 }
 0x243   : > { %v890_v39 = vadd.f32 1e-05, %v889_v38 }
 0x245   : > { %12306 = vrsqrt.f32 %v890_v39  ;;  %v1306_v39 = vld [vmem:[%s14915_s9] sm:$0xff] }
 0x24f   : > { %v12307_v40 = vpop.eup %12306 }
 0x250   : > { %v892_v43 = vmul.f32 %v12307_v40, %v884_v9  ;;  %v11677_v9 = vpack.c.bf16 %v9105_v8, %v9104_v7 }
 0x252   : > { %v899_v48 = vmul.f32 %v9078_v41, %v892_v43  ;;  %v9095_v41 = vld [vmem:[%s14913_s7 + $0x40] sm:$0xff] }
 0x253   : > { %v11665_v44 = vpack.c.bf16 %v9096_v42, %v9095_v41  ;;  %v9137_v41 = vld [vmem:[%s14914_s8 + $0x80] sm:$0xff]  ;;  %v9138_v42 = vld [vmem:[%s14914_s8 + $0x88] sm:$0xff] }
 0x254   : > { %v12818_v52 = vadd.f32 %v9079_v47, %v899_v48  ;;  %v9098_v47 = vld [vmem:[%s14913_s7 + $0x58] sm:$0xff] }
 0x255   : > { %v11668_v48 = vpack.c.bf16 %v9098_v47, %v9097_v46  ;;  %v9141_v47 = vld [vmem:[%s14914_s8 + $0xa0] sm:$0xff] }
 0x256   : > { %10325 = vmatmul.mubr.msk.f32.vlgmr.msra.gmra.mrb[4].mxu0 %vm551_vm1, %v12818_v52  ;;  %10344 = vmatmul.mubr.msk.f32.vlgmr.msra.gmra.mrb[4].mxu1 %vm551_vm1, %v12818_v52 }
 0x257   : > { %11642 = vmatpush3.bf16.msra.mxu0 %v11641_v49  ;;  %11654 = vmatpush3.bf16.msra.mxu1 %v11653_v50  ;;  %v9099_v49 = vld [vmem:[%s14913_s7 + $0x60] sm:$0xff]  ;;  %v9100_v50 = vld [vmem:[%s14913_s7 + $0x68] sm:$0xff] }
 0x258   : > { %11643 = vmatprep.subr.bf16.mxu0 %v12443_v3  ;;  %11655 = vmatprep.subr.bf16.mxu1 %v12443_v3  ;;  %v11671_v51 = vpack.c.bf16 %v9100_v50, %v9099_v49  ;;  %v9143_v50 = vld [vmem:[%s14914_s8 + $0xb0] sm:$0xff] }
 0x259   : > { %10362 = vmatprep.mubr.msk.f32.mxu0 %vm12444_vm0, %v12445_v11  ;;  %10391 = vmatprep.mubr.msk.f32.mxu1 %vm12444_vm0, %v12445_v11 }
 0x25b   : > { %11645 = vmatpush3.bf16.msra.mxu0 %v11644_v56  ;;  %11657 = vmatpush3.bf16.msra.mxu1 %v11656_v57  ;;  %v9128_v56 = vld [vmem:[%s14913_s7 + $0x80] sm:$0xff]  ;;  %v9129_v57 = vld [vmem:[%s14913_s7 + $0x88] sm:$0xff] }
 0x25c   : > { %11646 = vmatprep.subr.bf16.mxu0 %v12443_v3  ;;  %11658 = vmatprep.subr.bf16.mxu1 %v12443_v3  ;;  %v11701_v58 = vpack.c.bf16 %v9129_v57, %v9128_v56  ;;  %v9162_v57 = vld [vmem:[%s14913_s7 + $0xd0] sm:$0xff] }
 0x25f   : > { %11648 = vmatpush3.bf16.msra.mxu0 %v11647_v62  ;;  %11660 = vmatpush3.bf16.msra.mxu1 %v11659_v63  ;;  %v11704_v63 = vpack.c.bf16 %v9131_v60, %v9130_v59  ;;  %v9164_v60 = vld [vmem:[%s14913_s7 + $0xe0] sm:$0xff] }
 0x260   : > { %11649 = vmatprep.subr.bf16.mxu0 %v12443_v3  ;;  %11661 = vmatprep.subr.bf16.mxu1 %v12443_v3 }
 0x263   : > { %11651 = vmatpush3.bf16.msra.mxu0 %v11650_v5  ;;  %11663 = vmatpush3.bf16.msra.mxu1 %v11662_v6  ;;  %v9135_v5 = vld [vmem:[%s14913_s7 + $0xb8] sm:$0xff] }
 0x264   : > { %11676 = vmatprep.subr.bf16.mxu1 %v12443_v3  ;;  %10365 = vmatprep.subr.mxu0 %v12445_v11  ;;  %v11710_v6 = vpack.c.bf16 %v9135_v5, %v9134_v4 }
 0x266   : > { %10363 = vmatmul.mubr.msk.f32.vlgmr.msra.gmra.mrb[6].mxu0 %vm551_vm1, %v12818_v52  ;;  %10392 = vmatmul.mubr.msk.f32.vlgmr.msra.gmra.mrb[6].mxu1 %vm551_vm1, %v12818_v52 }
 0x267   : > { %11678 = vmatpush3.bf16.msra.mxu1 %v11677_v9  ;;  %10429 = vmatprep.mubr.msk.f32.mxu1 %vm12444_vm0, %v12445_v11 }
 0x268   : > { %11679 = vmatprep.subr.bf16.mxu1 %v12443_v3  ;;  %10367 = vmatprep.mubr.msk.f32.mxu0 %vm12444_vm0, %v12445_v11 }
 0x26b   : > { %11681 = vmatpush3.bf16.msra.mxu1 %v11680_v13 }
 0x26c   : > { %11682 = vmatprep.subr.bf16.mxu1 %v12443_v3 }
 0x26f   : > { %11684 = vmatpush3.bf16.msra.mxu1 %v11683_v16 }
 0x270   : > { %11685 = vmatprep.subr.bf16.mxu1 %v12443_v3 }
 0x273   : > { %11687 = vmatpush3.bf16.msra.mxu1 %v11686_v19 }
 0x274   : > { %10447 = vmatprep.subr.mxu1 %v12445_v11 }
 0x276   : > { %10430 = vmatmul.mubr.msk.f32.vlgmr.msra.gmra.mrb[8].mxu1 %vm551_vm1, %v12818_v52 }
 0x277   : > { %10449 = vmatprep.mubr.msk.f32.mxu1 %vm12444_vm0, %v12445_v11  ;;  %10448 = vmatpush3.msra.mxu1 %v1306_v39  ;;  %v9126_v39 = vld [vmem:[%s14912_s6 + $0xb8] sm:$0xff] }
 0x278   : > { %11700 = vmatprep.subr.bf16.mxu1 %v12443_v3 }
 0x329   : > { %v984_v20 = vpop.f32.mrb[4].mxu0  ;;  %v1062_v21 = vpop.f32.mrb[4].mxu1 }
 0x32a   : > { %v10326_v22 = vpop.f32.mrb[5].mxu0  ;;  %v10345_v23 = vpop.f32.mrb[5].mxu1  ;;  %10366 = vmatpush3.xpose.msk.msra.mxu0 %vm1144_vm4, %v1062_v21 }
 0x32b   : > { %10370 = vmatprep.subr.mxu0 %v12445_v11 }
 0x32d   : > { %10368 = vmatmul.mubr.msk.f32.vlgmr.msra.gmra.mrb[8].mxu0 %vm1144_vm4, %v984_v20 }
 0x32e   : > { %10372 = vmatprep.mubr.msk.f32.mxu0 %vm12444_vm0, %v12445_v11 }
 0x339   : > { %v1140_v24 = vpop.f32.mrb[6].mxu0  ;;  %v12914_v25 = vpop.f32.mrb[6].mxu1 }
 0x33a   : > { %v10364_v26 = vpop.f32.mrb[7].mxu0  ;;  %10371 = vmatpush3.msra.mxu0 %v1140_v24  ;;  %v10393_v27 = vpop.f32.mrb[7].mxu1 }
 0x33b   : > { %11664 = vmatprep.subr.bf16.mxu0 %v12443_v3  ;;  %v9116_v26 = vld [vmem:[%s14915_s9 + $0x8] sm:$0xff]  ;;  %v9119_v27 = vld [vmem:[%s14912_s6 + $0x80] sm:$0xff] }
 0x349   : > { %v12917_v28 = vpop.f32.mrb[8].mxu1 }
 0x34a   : > { %v10431_v29 = vpop.f32.mrb[9].mxu1 }
 0x400   : > { %v1217_v30 = vpop.f32.mrb[8].mxu0 }
 0x401   : > { %v1221_v31 = vmul.f32 0.35355338, %v1217_v30  ;;  %v10369_v32 = vpop.f32.mrb[9].mxu0  ;;  %v9121_v30 = vld [vmem:[%s14912_s6 + $0x90] sm:$0xff] }
 0x403   : > { %v1222_v33 = vsel %vm1144_vm4, %v1221_v31, -inf }
 0x404   : > { %1223 = vmax.xlane.f32.xlu1 %v1222_v33 }
 0x491   : > { %v1224_v34 = vpop.xlane.xlu1 %1223 }
 0x492   : > { %v1225_v35 = vsub.f32 %v1221_v31, %v1224_v34  ;;  %v9122_v31 = vld [vmem:[%s14912_s6 + $0x98] sm:$0xff] }
 0x493   : > { %v11692_v34 = vpack.c.bf16 %v9122_v31, %v9121_v30  ;;  %v9154_v30 = vld [vmem:[%s14912_s6 + $0xd8] sm:$0xff] }
 0x494   : > { %v1226_v36 = vmul.f32 1.442695, %v1225_v35  ;;  %v9123_v35 = vld [vmem:[%s14912_s6 + $0xa0] sm:$0xff] }
 0x496   : > { %12308 = vpow2.f32 %v1226_v36  ;;  %v9124_v36 = vld [vmem:[%s14912_s6 + $0xa8] sm:$0xff] }
 0x4a0   : > { %v12309_v37 = vpop.eup %12308 }
 0x4a1   : > { %v1228_v38 = vsel %vm1144_vm4, %v12309_v37, 0.0 }
 0x4a2   : > { %1229 = vadd.xlane.f32.xlu1 %v1228_v38  ;;  %v9125_v38 = vld [vmem:[%s14912_s6 + $0xb0] sm:$0xff] }
 0x52f   : > { %v1230_v40 = vpop.xlane.xlu1 %1229 }
 0x530   : > { %12310 = vrcp.f32 %v1230_v40  ;;  %v11698_v40 = vpack.c.bf16 %v9126_v39, %v9125_v38  ;;  %v9158_v38 = vld [vmem:[%s14912_s6 + $0xf8] sm:$0xff] }
 0x53a   : > { %v12311_v43 = vpop.eup %12310 }
 0x53b   : > { %v1232_v45 = vmul.f32 %v12311_v43, %v12309_v37  ;;  %v11695_v37 = vpack.c.bf16 %v9124_v36, %v9123_v35  ;;  %v11713_v43 = vpack.c.bf16 %v9138_v42, %v9137_v41  ;;  %v9156_v35 = vld [vmem:[%s14912_s6 + $0xe8] sm:$0xff] }
 0x53c   : > { %v9170_v41 = vld [vmem:[%s14914_s8 + $0xc8] sm:$0xff] }
 0x53d   : > { %10373 = vmatmul.mubr.msk.f32.vlgmr.msra.gmra.mrb[10].mxu0 %vm1144_vm4, %v1232_v45  ;;  %v9140_v45 = vld [vmem:[%s14914_s8 + $0x98] sm:$0xff] }
 0x53e   : > { %11666 = vmatpush3.bf16.msra.mxu0 %v11665_v44  ;;  %10410 = vmatprep.mubr.msk.f32.mxu0 %vm12444_vm0, %v12445_v11  ;;  %v9139_v44 = vld [vmem:[%s14914_s8 + $0x90] sm:$0xff] }
 0x53f   : > { %11667 = vmatprep.subr.bf16.mxu0 %v12443_v3  ;;  %v11716_v46 = vpack.c.bf16 %v9140_v45, %v9139_v44  ;;  %v9172_v44 = vld [vmem:[%s14914_s8 + $0xd8] sm:$0xff] }
 0x542   : > { %11669 = vmatpush3.bf16.msra.mxu0 %v11668_v48  ;;  %v9142_v48 = vld [vmem:[%s14914_s8 + $0xa8] sm:$0xff] }
 0x543   : > { %11670 = vmatprep.subr.bf16.mxu0 %v12443_v3  ;;  %v11719_v49 = vpack.c.bf16 %v9142_v48, %v9141_v47  ;;  %v9174_v47 = vld [vmem:[%s14914_s8 + $0xe8] sm:$0xff] }
 0x546   : > { %11672 = vmatpush3.bf16.msra.mxu0 %v11671_v51  ;;  %v9144_v51 = vld [vmem:[%s14914_s8 + $0xb8] sm:$0xff] }
 0x547   : > { %11673 = vmatprep.subr.bf16.mxu0 %v12443_v3  ;;  %v11722_v53 = vpack.c.bf16 %v9144_v51, %v9143_v50  ;;  %v9176_v50 = vld [vmem:[%s14914_s8 + $0xf8] sm:$0xff] }
 0x54a   : > { %11675 = vmatpush3.bf16.msra.mxu0 %v11674_v55  ;;  %v9161_v55 = vld [vmem:[%s14913_s7 + $0xc8] sm:$0xff] }
 0x54b   : > { %10432 = vmatprep.subr.mxu0 %v12445_v11  ;;  %v11737_v56 = vpack.c.bf16 %v9161_v55, %v9160_v54  ;;  %v9193_v54 = vld [vmem:[%s14913_s7 + $0x108] sm:$0xff] }
 0x54d   : > { %10411 = vmatmul.mubr.msk.f32.vlgmr.msra.gmra.mrb[12].mxu0 %vm551_vm1, %v12818_v52 }
 0x54e   : > { %10434 = vmatprep.mubr.msk.f32.mxu0 %vm12444_vm0, %v12445_v11 }
 0x610   : > { %v1302_v61 = vpop.f32.mrb[10].mxu0 }
 0x611   : > { %v10374_v62 = vpop.f32.mrb[11].mxu0  ;;  %10450 = vmatmul.mubr.msk.f32.vlgmr.msra.gmra.mrb[10].mxu1 %vm1144_vm4, %v1302_v61  ;;  %v9165_v61 = vld [vmem:[%s14913_s7 + $0xe8] sm:$0xff] }
 0x612   : > { %11702 = vmatpush3.bf16.msra.mxu1 %v11701_v58  ;;  %10487 = vmatprep.mubr.msk.f32.mxu1 %vm12444_vm0, %v12445_v11  ;;  %v9163_v58 = vld [vmem:[%s14913_s7 + $0xd8] sm:$0xff]  ;;  %v11743_v62 = vpack.c.bf16 %v9165_v61, %v9164_v60  ;;  %v9197_v60 = vld [vmem:[%s14913_s7 + $0x128] sm:$0xff] }
 0x613   : > { %11703 = vmatprep.subr.bf16.mxu1 %v12443_v3  ;;  %v11740_v59 = vpack.c.bf16 %v9163_v58, %v9162_v57  ;;  %v9195_v57 = vld [vmem:[%s14913_s7 + $0x118] sm:$0xff] }
 0x616   : > { %11705 = vmatpush3.bf16.msra.mxu1 %v11704_v63  ;;  %v9166_v63 = vld [vmem:[%s14913_s7 + $0xf0] sm:$0xff] }
 0x617   : > { %11706 = vmatprep.subr.bf16.mxu1 %v12443_v3  ;;  %v11746_v1 = vpack.c.bf16 %v9167_v0, %v9166_v63  ;;  %v9199_v63 = vld [vmem:[%s14913_s7 + $0x138] sm:$0xff] }
 0x61a   : > { %11708 = vmatpush3.bf16.msra.mxu1 %v11707_v2 }
 0x61b   : > { %11709 = vmatprep.subr.bf16.mxu1 %v12443_v3 }
 0x61e   : > { %11711 = vmatpush3.bf16.msra.mxu1 %v11710_v6 }
 0x61f   : > { %10509 = vmatprep.subr.mxu1 %v12445_v11 }
 0x620   : > { %v1461_v7 = vpop.f32.mrb[12].mxu0 }
 0x621   : > { %v10412_v8 = vpop.f32.mrb[13].mxu0  ;;  %10433 = vmatpush3.xpose.msk.msra.mxu0 %vm1144_vm4, %v1461_v7  ;;  %10488 = vmatmul.mubr.msk.f32.vlgmr.msra.gmra.mrb[12].mxu1 %vm551_vm1, %v12818_v52 }
 0x622   : > { %10437 = vmatprep.subr.mxu0 %v12445_v11  ;;  %10511 = vmatprep.mubr.msk.f32.mxu1 %vm12444_vm0, %v12445_v11 }
 0x624   : > { %10435 = vmatmul.mubr.msk.f32.vlgmr.msra.gmra.mrb[14].mxu0 %vm1144_vm4, %v12914_v25 }
 0x625   : > { %10438 = vmatpush3.msra.mxu0 %v12917_v28  ;;  %10439 = vmatprep.mubr.msk.f32.mxu0 %vm12444_vm0, %v12445_v11  ;;  %v9120_v28 = vld [vmem:[%s14912_s6 + $0x88] sm:$0xff] }
 0x626   : > { %10442 = vmatprep.subr.mxu0 %v12445_v11  ;;  %v11689_v29 = vpack.c.bf16 %v9120_v28, %v9119_v27  ;;  %v9152_v27 = vld [vmem:[%s14912_s6 + $0xc8] sm:$0xff] }
 0x6e4   : > { %v13003_v9 = vpop.f32.mrb[10].mxu1 }
 0x6e5   : > { %v10451_v10 = vpop.f32.mrb[11].mxu1 }
 0x6f4   : > { %v2007_v12 = vpop.f32.mrb[12].mxu1 }
 0x6f5   : > { %v10489_v13 = vpop.f32.mrb[13].mxu1  ;;  %10510 = vmatpush3.xpose.msk.msra.mxu1 %vm1144_vm4, %v2007_v12 }
 0x6f6   : > { %10514 = vmatprep.subr.mxu1 %v12445_v11 }
 0x6f7   : > { %v1616_v14 = vpop.f32.mrb[14].mxu0 }
 0x6f8   : > { %v1620_v15 = vmul.f32 0.35355338, %v1616_v14  ;;  %v10436_v16 = vpop.f32.mrb[15].mxu0 }
 0x6fa   : > { %v1621_v17 = vsel %vm1144_vm4, %v1620_v15, -inf }
 0x6fb   : > { %1622 = vmax.xlane.f32.xlu0 %v1621_v17 }
 0x788   : > { %v1623_v18 = vpop.xlane.xlu0 %1622 }
 0x789   : > { %v1624_v19 = vsub.f32 %v1620_v15, %v1623_v18 }
 0x78b   : > { %v1625_v20 = vmul.f32 1.442695, %v1624_v19 }
 0x78d   : > { %12312 = vpow2.f32 %v1625_v20 }
 0x797   : > { %v12313_v21 = vpop.eup %12312 }
 0x798   : > { %v1627_v22 = vsel %vm1144_vm4, %v12313_v21, 0.0 }
 0x799   : > { %1628 = vadd.xlane.f32.xlu1 %v1627_v22 }
 0x826   : > { %v1629_v23 = vpop.xlane.xlu1 %1628 }
 0x827   : > { %12314 = vrcp.f32 %v1629_v23 }
 0x831   : > { %v12315_v24 = vpop.eup %12314 }
 0x832   : > { %v1631_v25 = vmul.f32 %v12315_v24, %v12313_v21 }
 0x834   : > { %10440 = vmatmul.mubr.msk.f32.vlgmr.msra.gmra.mrb[16].mxu0 %vm1144_vm4, %v1631_v25  ;;  %v9149_v25 = vld [vmem:[%s14915_s9 + $0x10] sm:$0xff] }
 0x835   : > { %10443 = vmatpush3.msra.mxu0 %v9116_v26  ;;  %10444 = vmatprep.mubr.msk.f32.mxu0 %vm12444_vm0, %v12445_v11  ;;  %v9151_v26 = vld [vmem:[%s14912_s6 + $0xc0] sm:$0xff] }
 0x836   : > { %11688 = vmatprep.subr.bf16.mxu0 %v12443_v3  ;;  %v11725_v28 = vpack.c.bf16 %v9152_v27, %v9151_v26  ;;  %v9184_v26 = vld [vmem:[%s14912_s6 + $0x108] sm:$0xff] }
 0x907   : > { %v1701_v32 = vpop.f32.mrb[16].mxu0 }
 0x908   : > { %v10441_v33 = vpop.f32.mrb[17].mxu0  ;;  %10445 = vmatmul.mubr.msk.f32.vlgmr.msra.gmra.mrb[18].mxu0 %vm1144_vm4, %v1701_v32 }
 0x909   : > { %11690 = vmatpush3.bf16.msra.mxu0 %v11689_v29  ;;  %10468 = vmatprep.mubr.msk.f32.mxu0 %vm12444_vm0, %v12445_v11  ;;  %v9153_v29 = vld [vmem:[%s14912_s6 + $0xd0] sm:$0xff] }
 0x90a   : > { %11691 = vmatprep.subr.bf16.mxu0 %v12443_v3  ;;  %v11728_v33 = vpack.c.bf16 %v9154_v30, %v9153_v29  ;;  %v9186_v29 = vld [vmem:[%s14912_s6 + $0x118] sm:$0xff] }
 0x90d   : > { %11693 = vmatpush3.bf16.msra.mxu0 %v11692_v34  ;;  %v9155_v34 = vld [vmem:[%s14912_s6 + $0xe0] sm:$0xff] }
 0x90e   : > { %11694 = vmatprep.subr.bf16.mxu0 %v12443_v3  ;;  %v11731_v36 = vpack.c.bf16 %v9156_v35, %v9155_v34  ;;  %v9188_v34 = vld [vmem:[%s14912_s6 + $0x128] sm:$0xff] }
 0x911   : > { %11696 = vmatpush3.bf16.msra.mxu0 %v11695_v37  ;;  %v9157_v37 = vld [vmem:[%s14912_s6 + $0xf0] sm:$0xff] }
 0x912   : > { %11697 = vmatprep.subr.bf16.mxu0 %v12443_v3  ;;  %v11734_v39 = vpack.c.bf16 %v9158_v38, %v9157_v37  ;;  %v9190_v37 = vld [vmem:[%s14912_s6 + $0x138] sm:$0xff] }
 0x915   : > { %11699 = vmatpush3.bf16.msra.mxu0 %v11698_v40  ;;  %v9169_v40 = vld [vmem:[%s14914_s8 + $0xc0] sm:$0xff] }
 0x916   : > { %11712 = vmatprep.subr.bf16.mxu0 %v12443_v3  ;;  %v11749_v42 = vpack.c.bf16 %v9170_v41, %v9169_v40  ;;  %v9202_v40 = vld [vmem:[%s14914_s8 + $0x108] sm:$0xff] }
 0x918   : > { %10469 = vmatmul.mubr.msk.f32.vlgmr.msra.gmra.mrb[20].mxu0 %vm551_vm1, %v12818_v52 }
 0x919   : > { %11714 = vmatpush3.bf16.msra.mxu0 %v11713_v43  ;;  %10506 = vmatprep.mubr.msk.f32.mxu0 %vm12444_vm0, %v12445_v11  ;;  %v9171_v43 = vld [vmem:[%s14914_s8 + $0xd0] sm:$0xff] }
 0x91a   : > { %11715 = vmatprep.subr.bf16.mxu0 %v12443_v3  ;;  %v11752_v45 = vpack.c.bf16 %v9172_v44, %v9171_v43  ;;  %v9204_v43 = vld [vmem:[%s14914_s8 + $0x118] sm:$0xff] }
 0x91d   : > { %11717 = vmatpush3.bf16.msra.mxu0 %v11716_v46  ;;  %v9173_v46 = vld [vmem:[%s14914_s8 + $0xe0] sm:$0xff] }
 0x91e   : > { %11718 = vmatprep.subr.bf16.mxu0 %v12443_v3  ;;  %v11755_v48 = vpack.c.bf16 %v9174_v47, %v9173_v46  ;;  %v9206_v46 = vld [vmem:[%s14914_s8 + $0x128] sm:$0xff] }
 0x921   : > { %11720 = vmatpush3.bf16.msra.mxu0 %v11719_v49  ;;  %v9175_v49 = vld [vmem:[%s14914_s8 + $0xf0] sm:$0xff] }
 0x922   : > { %11721 = vmatprep.subr.bf16.mxu0 %v12443_v3  ;;  %v11758_v51 = vpack.c.bf16 %v9176_v50, %v9175_v49  ;;  %v9208_v49 = vld [vmem:[%s14914_s8 + $0x138] sm:$0xff] }
 0x925   : > { %11723 = vmatpush3.bf16.msra.mxu0 %v11722_v53  ;;  %v9192_v53 = vld [vmem:[%s14913_s7 + $0x100] sm:$0xff] }
 0x926   : > { %11736 = vmatprep.subr.bf16.mxu0 %v12443_v3  ;;  %v11773_v55 = vpack.c.bf16 %v9193_v54, %v9192_v53  ;;  %v9225_v53 = vld [vmem:[%s14913_s7 + $0x148] sm:$0xff] }
 0x928   : > { %10507 = vmatmul.mubr.msk.f32.vlgmr.msra.gmra.mrb[22].mxu0 %vm551_vm1, %v12818_v52 }
 0x929   : > { %11738 = vmatpush3.bf16.msra.mxu0 %v11737_v56  ;;  %10559 = vmatprep.mubr.msk.f32.mxu0 %vm12444_vm0, %v12445_v11  ;;  %v9194_v56 = vld [vmem:[%s14913_s7 + $0x110] sm:$0xff] }
 0x92a   : > { %11739 = vmatprep.subr.bf16.mxu0 %v12443_v3  ;;  %v11776_v58 = vpack.c.bf16 %v9195_v57, %v9194_v56  ;;  %v9227_v56 = vld [vmem:[%s14913_s7 + $0x158] sm:$0xff] }
 0x92d   : > { %11741 = vmatpush3.bf16.msra.mxu0 %v11740_v59  ;;  %v9196_v59 = vld [vmem:[%s14913_s7 + $0x120] sm:$0xff] }
 0x92e   : > { %11742 = vmatprep.subr.bf16.mxu0 %v12443_v3  ;;  %v11779_v61 = vpack.c.bf16 %v9197_v60, %v9196_v59  ;;  %v9229_v59 = vld [vmem:[%s14913_s7 + $0x168] sm:$0xff] }
 0x931   : > { %11744 = vmatpush3.bf16.msra.mxu0 %v11743_v62  ;;  %v9198_v62 = vld [vmem:[%s14913_s7 + $0x130] sm:$0xff] }
 0x932   : > { %11745 = vmatprep.subr.bf16.mxu0 %v12443_v3  ;;  %v11782_v0 = vpack.c.bf16 %v9199_v63, %v9198_v62  ;;  %v9231_v62 = vld [vmem:[%s14913_s7 + $0x178] sm:$0xff] }
 0x935   : > { %11747 = vmatpush3.bf16.msra.mxu0 %v11746_v1 }
 0x936   : > { %10581 = vmatprep.subr.mxu0 %v12445_v11 }
 0x938   : > { %10560 = vmatmul.mubr.msk.f32.vlgmr.msra.gmra.mrb[24].mxu0 %vm551_vm1, %v12818_v52 }
 0x939   : > { %10583 = vmatprep.mubr.msk.f32.mxu0 %vm12444_vm0, %v12445_v11 }
 0x9db   : > { %v1776_v2 = vpop.f32.mrb[18].mxu0 }
 0x9dc   : > { %v13116_v4 = vadd.f32 %v13003_v9, %v1776_v2  ;;  %v10446_v5 = vpop.f32.mrb[19].mxu0 }
 0x9eb   : > { %v1928_v6 = vpop.f32.mrb[20].mxu0 }
 0x9ec   : > { %v10470_v7 = vpop.f32.mrb[21].mxu0  ;;  %10512 = vmatmul.mubr.msk.f32.vlgmr.msra.gmra.mrb[14].mxu1 %vm1144_vm4, %v1928_v6 }
 0x9ed   : > { %10516 = vmatprep.mubr.msk.f32.mxu1 %vm12444_vm0, %v12445_v11 }
 0x9fb   : > { %v2086_v8 = vpop.f32.mrb[22].mxu0 }
 0x9fc   : > { %v10508_v10 = vpop.f32.mrb[23].mxu0  ;;  %10515 = vmatpush3.msra.mxu1 %v2086_v8 }
 0x9fd   : > { %10519 = vmatprep.subr.mxu1 %v12445_v11 }
 0xa0b   : > { %v2481_v12 = vpop.f32.mrb[24].mxu0 }
 0xa0c   : > { %v10561_v13 = vpop.f32.mrb[25].mxu0  ;;  %10582 = vmatpush3.xpose.msk.msra.mxu0 %vm1144_vm4, %v2481_v12 }
 0xa0d   : > { %10586 = vmatprep.subr.mxu0 %v12445_v11 }
 0xabf   : > { %v2162_v9 = vpop.f32.mrb[14].mxu1 }
 0xac0   : > { %v2166_v14 = vmul.f32 0.35355338, %v2162_v9  ;;  %v10513_v15 = vpop.f32.mrb[15].mxu1 }
 0xac2   : > { %v2167_v16 = vsel %vm1144_vm4, %v2166_v14, -inf }
 0xac3   : > { %2168 = vmax.xlane.f32.xlu0 %v2167_v16 }
 0xb50   : > { %v2169_v17 = vpop.xlane.xlu0 %2168 }
 0xb51   : > { %v2170_v18 = vsub.f32 %v2166_v14, %v2169_v17 }
 0xb53   : > { %v2171_v19 = vmul.f32 1.442695, %v2170_v18 }
 0xb55   : > { %12316 = vpow2.f32 %v2171_v19 }
 0xb5f   : > { %v12317_v20 = vpop.eup %12316 }
 0xb60   : > { %v2173_v21 = vsel %vm1144_vm4, %v12317_v20, 0.0 }
 0xb61   : > { %2174 = vadd.xlane.f32.xlu1 %v2173_v21 }
 0xbee   : > { %v2175_v22 = vpop.xlane.xlu1 %2174 }
 0xbef   : > { %12318 = vrcp.f32 %v2175_v22 }
 0xbf9   : > { %v12319_v23 = vpop.eup %12318 }
 0xbfa   : > { %v2177_v24 = vmul.f32 %v12319_v23, %v12317_v20 }
 0xbfc   : > { %10517 = vmatmul.mubr.msk.f32.vlgmr.msra.gmra.mrb[16].mxu1 %vm1144_vm4, %v2177_v24  ;;  %v9181_v24 = vld [vmem:[%s14915_s9 + $0x18] sm:$0xff] }
 0xbfd   : > { %10520 = vmatpush3.msra.mxu1 %v9149_v25  ;;  %10521 = vmatprep.mubr.msk.f32.mxu1 %vm12444_vm0, %v12445_v11  ;;  %v9183_v25 = vld [vmem:[%s14912_s6 + $0x100] sm:$0xff] }
 0xbfe   : > { %11724 = vmatprep.subr.bf16.mxu1 %v12443_v3  ;;  %v11761_v27 = vpack.c.bf16 %v9184_v26, %v9183_v25  ;;  %v9216_v25 = vld [vmem:[%s14912_s6 + $0x148] sm:$0xff] }
 0xccf   : > { %v2247_v31 = vpop.f32.mrb[16].mxu1 }
 0xcd0   : > { %v10518_v32 = vpop.f32.mrb[17].mxu1  ;;  %10522 = vmatmul.mubr.msk.f32.vlgmr.msra.gmra.mrb[18].mxu1 %vm1144_vm4, %v2247_v31 }
 0xcd1   : > { %11726 = vmatpush3.bf16.msra.mxu1 %v11725_v28  ;;  %10540 = vmatprep.mubr.msk.f32.mxu1 %vm12444_vm0, %v12445_v11  ;;  %v9185_v28 = vld [vmem:[%s14912_s6 + $0x110] sm:$0xff] }
 0xcd2   : > { %11727 = vmatprep.subr.bf16.mxu1 %v12443_v3  ;;  %v11764_v32 = vpack.c.bf16 %v9186_v29, %v9185_v28  ;;  %v9218_v28 = vld [vmem:[%s14912_s6 + $0x158] sm:$0xff] }
 0xcd5   : > { %11729 = vmatpush3.bf16.msra.mxu1 %v11728_v33  ;;  %v9187_v33 = vld [vmem:[%s14912_s6 + $0x120] sm:$0xff] }
 0xcd6   : > { %11730 = vmatprep.subr.bf16.mxu1 %v12443_v3  ;;  %v11767_v35 = vpack.c.bf16 %v9188_v34, %v9187_v33  ;;  %v9220_v33 = vld [vmem:[%s14912_s6 + $0x168] sm:$0xff] }
 0xcd9   : > { %11732 = vmatpush3.bf16.msra.mxu1 %v11731_v36  ;;  %v9189_v36 = vld [vmem:[%s14912_s6 + $0x130] sm:$0xff] }
 0xcda   : > { %11733 = vmatprep.subr.bf16.mxu1 %v12443_v3  ;;  %v11770_v38 = vpack.c.bf16 %v9190_v37, %v9189_v36  ;;  %v9222_v36 = vld [vmem:[%s14912_s6 + $0x178] sm:$0xff] }
 0xcdd   : > { %11735 = vmatpush3.bf16.msra.mxu1 %v11734_v39  ;;  %v9201_v39 = vld [vmem:[%s14914_s8 + $0x100] sm:$0xff] }
 0xcde   : > { %11748 = vmatprep.subr.bf16.mxu1 %v12443_v3  ;;  %v11785_v41 = vpack.c.bf16 %v9202_v40, %v9201_v39  ;;  %v9234_v39 = vld [vmem:[%s14914_s8 + $0x148] sm:$0xff] }
 0xce0   : > { %10541 = vmatmul.mubr.msk.f32.vlgmr.msra.gmra.mrb[20].mxu1 %vm551_vm1, %v12818_v52 }
 0xce1   : > { %11750 = vmatpush3.bf16.msra.mxu1 %v11749_v42  ;;  %10578 = vmatprep.mubr.msk.f32.mxu1 %vm12444_vm0, %v12445_v11  ;;  %v9203_v42 = vld [vmem:[%s14914_s8 + $0x110] sm:$0xff] }
 0xce2   : > { %11751 = vmatprep.subr.bf16.mxu1 %v12443_v3  ;;  %v11788_v44 = vpack.c.bf16 %v9204_v43, %v9203_v42  ;;  %v9236_v42 = vld [vmem:[%s14914_s8 + $0x158] sm:$0xff] }
 0xce5   : > { %11753 = vmatpush3.bf16.msra.mxu1 %v11752_v45  ;;  %v9205_v45 = vld [vmem:[%s14914_s8 + $0x120] sm:$0xff] }
 0xce6   : > { %11754 = vmatprep.subr.bf16.mxu1 %v12443_v3  ;;  %v11791_v47 = vpack.c.bf16 %v9206_v46, %v9205_v45  ;;  %v9238_v45 = vld [vmem:[%s14914_s8 + $0x168] sm:$0xff] }
 0xce9   : > { %11756 = vmatpush3.bf16.msra.mxu1 %v11755_v48  ;;  %v9207_v48 = vld [vmem:[%s14914_s8 + $0x130] sm:$0xff] }
 0xcea   : > { %11757 = vmatprep.subr.bf16.mxu1 %v12443_v3  ;;  %v11794_v50 = vpack.c.bf16 %v9208_v49, %v9207_v48  ;;  %v9240_v48 = vld [vmem:[%s14914_s8 + $0x178] sm:$0xff] }
 0xced   : > { %11759 = vmatpush3.bf16.msra.mxu1 %v11758_v51  ;;  %v9224_v51 = vld [vmem:[%s14913_s7 + $0x140] sm:$0xff] }
 0xcee   : > { %11772 = vmatprep.subr.bf16.mxu1 %v12443_v3  ;;  %v11809_v54 = vpack.c.bf16 %v9225_v53, %v9224_v51  ;;  %v9257_v51 = vld [vmem:[%s14913_s7 + $0x188] sm:$0xff] }
 0xcf0   : > { %10579 = vmatmul.mubr.msk.f32.vlgmr.msra.gmra.mrb[22].mxu1 %vm551_vm1, %v12818_v52 }
 0xcf1   : > { %11774 = vmatpush3.bf16.msra.mxu1 %v11773_v55  ;;  %10631 = vmatprep.mubr.msk.f32.mxu1 %vm12444_vm0, %v12445_v11  ;;  %v9226_v55 = vld [vmem:[%s14913_s7 + $0x150] sm:$0xff] }
 0xcf2   : > { %11775 = vmatprep.subr.bf16.mxu1 %v12443_v3  ;;  %v11812_v57 = vpack.c.bf16 %v9227_v56, %v9226_v55  ;;  %v9259_v55 = vld [vmem:[%s14913_s7 + $0x198] sm:$0xff] }
 0xcf5   : > { %11777 = vmatpush3.bf16.msra.mxu1 %v11776_v58  ;;  %v9228_v58 = vld [vmem:[%s14913_s7 + $0x160] sm:$0xff] }
 0xcf6   : > { %11778 = vmatprep.subr.bf16.mxu1 %v12443_v3  ;;  %v11815_v60 = vpack.c.bf16 %v9229_v59, %v9228_v58  ;;  %v9261_v58 = vld [vmem:[%s14913_s7 + $0x1a8] sm:$0xff] }
 0xcf9   : > { %11780 = vmatpush3.bf16.msra.mxu1 %v11779_v61  ;;  %v9230_v61 = vld [vmem:[%s14913_s7 + $0x170] sm:$0xff] }
 0xcfa   : > { %11781 = vmatprep.subr.bf16.mxu1 %v12443_v3  ;;  %v11818_v63 = vpack.c.bf16 %v9231_v62, %v9230_v61  ;;  %v9263_v61 = vld [vmem:[%s14913_s7 + $0x1b8] sm:$0xff] }
 0xcfd   : > { %11783 = vmatpush3.bf16.msra.mxu1 %v11782_v0 }
 0xcfe   : > { %10653 = vmatprep.subr.mxu1 %v12445_v11 }
 0xd00   : > { %10632 = vmatmul.mubr.msk.f32.vlgmr.msra.gmra.mrb[24].mxu1 %vm551_vm1, %v12818_v52 }
 0xd01   : > { %10655 = vmatprep.mubr.msk.f32.mxu1 %vm12444_vm0, %v12445_v11 }
 0xda3   : > { %v2322_v1 = vpop.f32.mrb[18].mxu1 }
 0xda4   : > { %v13233_v2 = vadd.f32 %v2322_v1, %v13116_v4  ;;  %v10523_v5 = vpop.f32.mrb[19].mxu1 }
 0xdb3   : > { %v2402_v6 = vpop.f32.mrb[20].mxu1 }
 0xdb4   : > { %v10542_v7 = vpop.f32.mrb[21].mxu1  ;;  %10584 = vmatmul.mubr.msk.f32.vlgmr.msra.gmra.mrb[26].mxu0 %vm1144_vm4, %v2402_v6 }
 0xdb5   : > { %10588 = vmatprep.mubr.msk.f32.mxu0 %vm12444_vm0, %v12445_v11 }
 0xdc3   : > { %v2560_v8 = vpop.f32.mrb[22].mxu1 }
 0xdc4   : > { %v10580_v10 = vpop.f32.mrb[23].mxu1  ;;  %10587 = vmatpush3.msra.mxu0 %v2560_v8 }
 0xdc5   : > { %10591 = vmatprep.subr.mxu0 %v12445_v11 }
 0xdd3   : > { %v2955_v12 = vpop.f32.mrb[24].mxu1 }
 0xdd4   : > { %v10633_v13 = vpop.f32.mrb[25].mxu1  ;;  %10654 = vmatpush3.xpose.msk.msra.mxu1 %vm1144_vm4, %v2955_v12 }
 0xdd5   : > { %10658 = vmatprep.subr.mxu1 %v12445_v11 }
 0xe87   : > { %v2636_v4 = vpop.f32.mrb[26].mxu0 }
 0xe88   : > { %v2640_v9 = vmul.f32 0.35355338, %v2636_v4  ;;  %v10585_v14 = vpop.f32.mrb[27].mxu0 }
 0xe8a   : > { %v2641_v15 = vsel %vm1144_vm4, %v2640_v9, -inf }
 0xe8b   : > { %2642 = vmax.xlane.f32.xlu0 %v2641_v15 }
 0xf18   : > { %v2643_v16 = vpop.xlane.xlu0 %2642 }
 0xf19   : > { %v2644_v17 = vsub.f32 %v2640_v9, %v2643_v16 }
 0xf1b   : > { %v2645_v18 = vmul.f32 1.442695, %v2644_v17 }
 0xf1d   : > { %12320 = vpow2.f32 %v2645_v18 }
 0xf27   : > { %v12321_v19 = vpop.eup %12320 }
 0xf28   : > { %v2647_v20 = vsel %vm1144_vm4, %v12321_v19, 0.0 }
 0xf29   : > { %2648 = vadd.xlane.f32.xlu1 %v2647_v20 }
 0xfb6   : > { %v2649_v21 = vpop.xlane.xlu1 %2648 }
 0xfb7   : > { %12322 = vrcp.f32 %v2649_v21 }
 0xfc1   : > { %v12323_v22 = vpop.eup %12322 }
 0xfc2   : > { %v2651_v23 = vmul.f32 %v12323_v22, %v12321_v19 }
 0xfc4   : > { %10589 = vmatmul.mubr.msk.f32.vlgmr.msra.gmra.mrb[28].mxu0 %vm1144_vm4, %v2651_v23  ;;  %v9213_v23 = vld [vmem:[%s14915_s9 + $0x20] sm:$0xff] }
 0xfc5   : > { %10592 = vmatpush3.msra.mxu0 %v9181_v24  ;;  %10593 = vmatprep.mubr.msk.f32.mxu0 %vm12444_vm0, %v12445_v11  ;;  %v9215_v24 = vld [vmem:[%s14912_s6 + $0x140] sm:$0xff] }
 0xfc6   : > { %11760 = vmatprep.subr.bf16.mxu0 %v12443_v3  ;;  %v11797_v26 = vpack.c.bf16 %v9216_v25, %v9215_v24  ;;  %v9248_v24 = vld [vmem:[%s14912_s6 + $0x188] sm:$0xff] }
0x1097   : > { %v2721_v30 = vpop.f32.mrb[28].mxu0 }
0x1098   : > { %v10590_v31 = vpop.f32.mrb[29].mxu0  ;;  %10594 = vmatmul.mubr.msk.f32.vlgmr.msra.gmra.mrb[30].mxu0 %vm1144_vm4, %v2721_v30 }
0x1099   : > { %11762 = vmatpush3.bf16.msra.mxu0 %v11761_v27  ;;  %10612 = vmatprep.mubr.msk.f32.mxu0 %vm12444_vm0, %v12445_v11  ;;  %v9217_v27 = vld [vmem:[%s14912_s6 + $0x150] sm:$0xff] }
0x109a   : > { %11763 = vmatprep.subr.bf16.mxu0 %v12443_v3  ;;  %v11800_v31 = vpack.c.bf16 %v9218_v28, %v9217_v27  ;;  %v9250_v27 = vld [vmem:[%s14912_s6 + $0x198] sm:$0xff] }
0x109d   : > { %11765 = vmatpush3.bf16.msra.mxu0 %v11764_v32  ;;  %v9219_v32 = vld [vmem:[%s14912_s6 + $0x160] sm:$0xff] }
0x109e   : > { %11766 = vmatprep.subr.bf16.mxu0 %v12443_v3  ;;  %v11803_v34 = vpack.c.bf16 %v9220_v33, %v9219_v32  ;;  %v9252_v32 = vld [vmem:[%s14912_s6 + $0x1a8] sm:$0xff] }
0x10a1   : > { %11768 = vmatpush3.bf16.msra.mxu0 %v11767_v35  ;;  %v9221_v35 = vld [vmem:[%s14912_s6 + $0x170] sm:$0xff] }
0x10a2   : > { %11769 = vmatprep.subr.bf16.mxu0 %v12443_v3  ;;  %v11806_v37 = vpack.c.bf16 %v9222_v36, %v9221_v35  ;;  %v9254_v35 = vld [vmem:[%s14912_s6 + $0x1b8] sm:$0xff] }
0x10a5   : > { %11771 = vmatpush3.bf16.msra.mxu0 %v11770_v38  ;;  %v9233_v38 = vld [vmem:[%s14914_s8 + $0x140] sm:$0xff] }
0x10a6   : > { %11784 = vmatprep.subr.bf16.mxu0 %v12443_v3  ;;  %v11821_v40 = vpack.c.bf16 %v9234_v39, %v9233_v38  ;;  %v9266_v38 = vld [vmem:[%s14914_s8 + $0x188] sm:$0xff] }
0x10a8   : > { %10613 = vmatmul.mubr.msk.f32.vlgmr.msra.gmra.mrb[32].mxu0 %vm551_vm1, %v12818_v52 }
0x10a9   : > { %11786 = vmatpush3.bf16.msra.mxu0 %v11785_v41  ;;  %10650 = vmatprep.mubr.msk.f32.mxu0 %vm12444_vm0, %v12445_v11  ;;  %v9235_v41 = vld [vmem:[%s14914_s8 + $0x150] sm:$0xff] }
0x10aa   : > { %11787 = vmatprep.subr.bf16.mxu0 %v12443_v3  ;;  %v11824_v43 = vpack.c.bf16 %v9236_v42, %v9235_v41  ;;  %v9268_v41 = vld [vmem:[%s14914_s8 + $0x198] sm:$0xff] }
0x10ad   : > { %11789 = vmatpush3.bf16.msra.mxu0 %v11788_v44  ;;  %v9237_v44 = vld [vmem:[%s14914_s8 + $0x160] sm:$0xff] }
0x10ae   : > { %11790 = vmatprep.subr.bf16.mxu0 %v12443_v3  ;;  %v11827_v46 = vpack.c.bf16 %v9238_v45, %v9237_v44  ;;  %v9270_v44 = vld [vmem:[%s14914_s8 + $0x1a8] sm:$0xff] }
0x10b1   : > { %11792 = vmatpush3.bf16.msra.mxu0 %v11791_v47  ;;  %v9239_v47 = vld [vmem:[%s14914_s8 + $0x170] sm:$0xff] }
0x10b2   : > { %11793 = vmatprep.subr.bf16.mxu0 %v12443_v3  ;;  %v11830_v49 = vpack.c.bf16 %v9240_v48, %v9239_v47  ;;  %v9272_v47 = vld [vmem:[%s14914_s8 + $0x1b8] sm:$0xff] }
0x10b5   : > { %11795 = vmatpush3.bf16.msra.mxu0 %v11794_v50  ;;  %v9256_v50 = vld [vmem:[%s14913_s7 + $0x180] sm:$0xff] }
0x10b6   : > { %11808 = vmatprep.subr.bf16.mxu0 %v12443_v3  ;;  %v11845_v53 = vpack.c.bf16 %v9257_v51, %v9256_v50  ;;  %v9289_v50 = vld [vmem:[%s14913_s7 + $0x1c8] sm:$0xff] }
0x10b8   : > { %10651 = vmatmul.mubr.msk.f32.vlgmr.msra.gmra.mrb[34].mxu0 %vm551_vm1, %v12818_v52 }
0x10b9   : > { %11810 = vmatpush3.bf16.msra.mxu0 %v11809_v54  ;;  %10703 = vmatprep.mubr.msk.f32.mxu0 %vm12444_vm0, %v12445_v11  ;;  %v9258_v54 = vld [vmem:[%s14913_s7 + $0x190] sm:$0xff] }
0x10ba   : > { %11811 = vmatprep.subr.bf16.mxu0 %v12443_v3  ;;  %v11848_v56 = vpack.c.bf16 %v9259_v55, %v9258_v54  ;;  %v9291_v54 = vld [vmem:[%s14913_s7 + $0x1d8] sm:$0xff] }
0x10bd   : > { %11813 = vmatpush3.bf16.msra.mxu0 %v11812_v57  ;;  %v9260_v57 = vld [vmem:[%s14913_s7 + $0x1a0] sm:$0xff] }
0x10be   : > { %11814 = vmatprep.subr.bf16.mxu0 %v12443_v3  ;;  %v11851_v59 = vpack.c.bf16 %v9261_v58, %v9260_v57  ;;  %v9293_v57 = vld [vmem:[%s14913_s7 + $0x1e8] sm:$0xff] }
0x10c1   : > { %11816 = vmatpush3.bf16.msra.mxu0 %v11815_v60  ;;  %v9262_v60 = vld [vmem:[%s14913_s7 + $0x1b0] sm:$0xff] }
0x10c2   : > { %11817 = vmatprep.subr.bf16.mxu0 %v12443_v3  ;;  %v11854_v62 = vpack.c.bf16 %v9263_v61, %v9262_v60  ;;  %v9295_v60 = vld [vmem:[%s14913_s7 + $0x1f8] sm:$0xff] }
0x10c5   : > { %11819 = vmatpush3.bf16.msra.mxu0 %v11818_v63 }
0x10c6   : > { %10725 = vmatprep.subr.mxu0 %v12445_v11 }
0x10c8   : > { %10704 = vmatmul.mubr.msk.f32.vlgmr.msra.gmra.mrb[36].mxu0 %vm551_vm1, %v12818_v52 }
0x10c9   : > { %10727 = vmatprep.mubr.msk.f32.mxu0 %vm12444_vm0, %v12445_v11 }
0x116b   : > { %v2796_v0 = vpop.f32.mrb[30].mxu0 }
0x116c   : > { %v13350_v1 = vadd.f32 %v2796_v0, %v13233_v2  ;;  %v10595_v5 = vpop.f32.mrb[31].mxu0 }
0x117b   : > { %v2876_v6 = vpop.f32.mrb[32].mxu0 }
0x117c   : > { %v10614_v7 = vpop.f32.mrb[33].mxu0  ;;  %10656 = vmatmul.mubr.msk.f32.vlgmr.msra.gmra.mrb[26].mxu1 %vm1144_vm4, %v2876_v6 }
0x117d   : > { %10660 = vmatprep.mubr.msk.f32.mxu1 %vm12444_vm0, %v12445_v11 }
0x118b   : > { %v3034_v8 = vpop.f32.mrb[34].mxu0 }
0x118c   : > { %v10652_v10 = vpop.f32.mrb[35].mxu0  ;;  %10659 = vmatpush3.msra.mxu1 %v3034_v8 }
0x118d   : > { %10663 = vmatprep.subr.mxu1 %v12445_v11 }
0x119b   : > { %v3429_v12 = vpop.f32.mrb[36].mxu0 }
0x119c   : > { %v10705_v13 = vpop.f32.mrb[37].mxu0  ;;  %10726 = vmatpush3.xpose.msk.msra.mxu0 %vm1144_vm4, %v3429_v12 }
0x119d   : > { %10730 = vmatprep.subr.mxu0 %v12445_v11 }
0x124f   : > { %v3110_v2 = vpop.f32.mrb[26].mxu1 }
0x1250   : > { %v3114_v4 = vmul.f32 0.35355338, %v3110_v2  ;;  %v10657_v9 = vpop.f32.mrb[27].mxu1 }
0x1252   : > { %v3115_v14 = vsel %vm1144_vm4, %v3114_v4, -inf }
0x1253   : > { %3116 = vmax.xlane.f32.xlu0 %v3115_v14 }
0x12e0   : > { %v3117_v15 = vpop.xlane.xlu0 %3116 }
0x12e1   : > { %v3118_v16 = vsub.f32 %v3114_v4, %v3117_v15 }
0x12e3   : > { %v3119_v17 = vmul.f32 1.442695, %v3118_v16 }
0x12e5   : > { %12324 = vpow2.f32 %v3119_v17 }
0x12ef   : > { %v12325_v18 = vpop.eup %12324 }
0x12f0   : > { %v3121_v19 = vsel %vm1144_vm4, %v12325_v18, 0.0 }
0x12f1   : > { %3122 = vadd.xlane.f32.xlu1 %v3121_v19 }
0x137e   : > { %v3123_v20 = vpop.xlane.xlu1 %3122 }
0x137f   : > { %12326 = vrcp.f32 %v3123_v20 }
0x1389   : > { %v12327_v21 = vpop.eup %12326 }
0x138a   : > { %v3125_v22 = vmul.f32 %v12327_v21, %v12325_v18 }
0x138c   : > { %10661 = vmatmul.mubr.msk.f32.vlgmr.msra.gmra.mrb[28].mxu1 %vm1144_vm4, %v3125_v22  ;;  %v9245_v22 = vld [vmem:[%s14915_s9 + $0x28] sm:$0xff] }
0x138d   : > { %10664 = vmatpush3.msra.mxu1 %v9213_v23  ;;  %10665 = vmatprep.mubr.msk.f32.mxu1 %vm12444_vm0, %v12445_v11  ;;  %v9247_v23 = vld [vmem:[%s14912_s6 + $0x180] sm:$0xff] }
0x138e   : > { %11796 = vmatprep.subr.bf16.mxu1 %v12443_v3  ;;  %v11833_v25 = vpack.c.bf16 %v9248_v24, %v9247_v23  ;;  %v9280_v23 = vld [vmem:[%s14912_s6 + $0x1c8] sm:$0xff] }
0x145f   : > { %v3195_v29 = vpop.f32.mrb[28].mxu1 }
0x1460   : > { %v10662_v30 = vpop.f32.mrb[29].mxu1  ;;  %10666 = vmatmul.mubr.msk.f32.vlgmr.msra.gmra.mrb[30].mxu1 %vm1144_vm4, %v3195_v29 }
0x1461   : > { %11798 = vmatpush3.bf16.msra.mxu1 %v11797_v26  ;;  %10684 = vmatprep.mubr.msk.f32.mxu1 %vm12444_vm0, %v12445_v11  ;;  %v9249_v26 = vld [vmem:[%s14912_s6 + $0x190] sm:$0xff] }
0x1462   : > { %11799 = vmatprep.subr.bf16.mxu1 %v12443_v3  ;;  %v11836_v30 = vpack.c.bf16 %v9250_v27, %v9249_v26  ;;  %v9282_v26 = vld [vmem:[%s14912_s6 + $0x1d8] sm:$0xff] }
0x1465   : > { %11801 = vmatpush3.bf16.msra.mxu1 %v11800_v31  ;;  %v9251_v31 = vld [vmem:[%s14912_s6 + $0x1a0] sm:$0xff] }
0x1466   : > { %11802 = vmatprep.subr.bf16.mxu1 %v12443_v3  ;;  %v11839_v33 = vpack.c.bf16 %v9252_v32, %v9251_v31  ;;  %v9284_v31 = vld [vmem:[%s14912_s6 + $0x1e8] sm:$0xff] }
0x1469   : > { %11804 = vmatpush3.bf16.msra.mxu1 %v11803_v34  ;;  %v9253_v34 = vld [vmem:[%s14912_s6 + $0x1b0] sm:$0xff] }
0x146a   : > { %11805 = vmatprep.subr.bf16.mxu1 %v12443_v3  ;;  %v11842_v36 = vpack.c.bf16 %v9254_v35, %v9253_v34  ;;  %v9286_v34 = vld [vmem:[%s14912_s6 + $0x1f8] sm:$0xff] }
0x146d   : > { %11807 = vmatpush3.bf16.msra.mxu1 %v11806_v37  ;;  %v9265_v37 = vld [vmem:[%s14914_s8 + $0x180] sm:$0xff] }
0x146e   : > { %11820 = vmatprep.subr.bf16.mxu1 %v12443_v3  ;;  %v11857_v39 = vpack.c.bf16 %v9266_v38, %v9265_v37  ;;  %v9298_v37 = vld [vmem:[%s14914_s8 + $0x1c8] sm:$0xff] }
0x1470   : > { %10685 = vmatmul.mubr.msk.f32.vlgmr.msra.gmra.mrb[32].mxu1 %vm551_vm1, %v12818_v52 }
0x1471   : > { %11822 = vmatpush3.bf16.msra.mxu1 %v11821_v40  ;;  %10722 = vmatprep.mubr.msk.f32.mxu1 %vm12444_vm0, %v12445_v11  ;;  %v9267_v40 = vld [vmem:[%s14914_s8 + $0x190] sm:$0xff] }
0x1472   : > { %11823 = vmatprep.subr.bf16.mxu1 %v12443_v3  ;;  %v11860_v42 = vpack.c.bf16 %v9268_v41, %v9267_v40  ;;  %v9300_v40 = vld [vmem:[%s14914_s8 + $0x1d8] sm:$0xff] }
0x1475   : > { %11825 = vmatpush3.bf16.msra.mxu1 %v11824_v43  ;;  %v9269_v43 = vld [vmem:[%s14914_s8 + $0x1a0] sm:$0xff] }
0x1476   : > { %11826 = vmatprep.subr.bf16.mxu1 %v12443_v3  ;;  %v11863_v45 = vpack.c.bf16 %v9270_v44, %v9269_v43  ;;  %v9302_v43 = vld [vmem:[%s14914_s8 + $0x1e8] sm:$0xff] }
0x1479   : > { %11828 = vmatpush3.bf16.msra.mxu1 %v11827_v46  ;;  %v9271_v46 = vld [vmem:[%s14914_s8 + $0x1b0] sm:$0xff] }
0x147a   : > { %11829 = vmatprep.subr.bf16.mxu1 %v12443_v3  ;;  %v11866_v48 = vpack.c.bf16 %v9272_v47, %v9271_v46  ;;  %v9304_v46 = vld [vmem:[%s14914_s8 + $0x1f8] sm:$0xff] }
0x147d   : > { %11831 = vmatpush3.bf16.msra.mxu1 %v11830_v49  ;;  %v9288_v49 = vld [vmem:[%s14913_s7 + $0x1c0] sm:$0xff] }
0x147e   : > { %11844 = vmatprep.subr.bf16.mxu1 %v12443_v3  ;;  %v11881_v51 = vpack.c.bf16 %v9289_v50, %v9288_v49 }
0x1480   : > { %10723 = vmatmul.mubr.msk.f32.vlgmr.msra.gmra.mrb[34].mxu1 %vm551_vm1, %v12818_v52 }
0x1481   : > { %11846 = vmatpush3.bf16.msra.mxu1 %v11845_v53  ;;  %10775 = vmatprep.mubr.msk.f32.mxu1 %vm12444_vm0, %v12445_v11  ;;  %v9290_v53 = vld [vmem:[%s14913_s7 + $0x1d0] sm:$0xff] }
0x1482   : > { %11847 = vmatprep.subr.bf16.mxu1 %v12443_v3  ;;  %v11884_v55 = vpack.c.bf16 %v9291_v54, %v9290_v53 }
0x1485   : > { %11849 = vmatpush3.bf16.msra.mxu1 %v11848_v56  ;;  %v9292_v56 = vld [vmem:[%s14913_s7 + $0x1e0] sm:$0xff] }
0x1486   : > { %11850 = vmatprep.subr.bf16.mxu1 %v12443_v3  ;;  %v11887_v58 = vpack.c.bf16 %v9293_v57, %v9292_v56 }
0x1489   : > { %11852 = vmatpush3.bf16.msra.mxu1 %v11851_v59  ;;  %v9294_v59 = vld [vmem:[%s14913_s7 + $0x1f0] sm:$0xff] }
0x148a   : > { %11853 = vmatprep.subr.bf16.mxu1 %v12443_v3  ;;  %v11890_v61 = vpack.c.bf16 %v9295_v60, %v9294_v59 }
0x148d   : > { %11855 = vmatpush3.bf16.msra.mxu1 %v11854_v62 }
0x148e   : > { %10797 = vmatprep.subr.mxu1 %v12445_v11 }
0x1490   : > { %10776 = vmatmul.mubr.msk.f32.vlgmr.msra.gmra.mrb[36].mxu1 %vm551_vm1, %v12818_v52 }
0x1491   : > { %10799 = vmatprep.mubr.msk.f32.mxu1 %vm12444_vm0, %v12445_v11 }
0x1533   : > { %v3270_v63 = vpop.f32.mrb[30].mxu1 }
0x1534   : > { %v13467_v0 = vadd.f32 %v3270_v63, %v13350_v1  ;;  %v10667_v5 = vpop.f32.mrb[31].mxu1 }
0x1543   : > { %v3350_v6 = vpop.f32.mrb[32].mxu1 }
0x1544   : > { %v10686_v7 = vpop.f32.mrb[33].mxu1  ;;  %10728 = vmatmul.mubr.msk.f32.vlgmr.msra.gmra.mrb[38].mxu0 %vm1144_vm4, %v3350_v6 }
0x1545   : > { %10732 = vmatprep.mubr.msk.f32.mxu0 %vm12444_vm0, %v12445_v11 }
0x1553   : > { %v3508_v8 = vpop.f32.mrb[34].mxu1 }
0x1554   : > { %v10724_v10 = vpop.f32.mrb[35].mxu1  ;;  %10731 = vmatpush3.msra.mxu0 %v3508_v8 }
0x1555   : > { %10735 = vmatprep.subr.mxu0 %v12445_v11 }
0x1563   : > { %v3903_v12 = vpop.f32.mrb[36].mxu1 }
0x1564   : > { %v10777_v13 = vpop.f32.mrb[37].mxu1  ;;  %10798 = vmatpush3.xpose.msk.msra.mxu1 %vm1144_vm4, %v3903_v12 }
0x1565   : > { %10802 = vmatprep.subr.mxu1 %v12445_v11 }
0x1617   : > { %v3584_v1 = vpop.f32.mrb[38].mxu0 }
0x1618   : > { %v3588_v2 = vmul.f32 0.35355338, %v3584_v1  ;;  %v10729_v4 = vpop.f32.mrb[39].mxu0 }
0x161a   : > { %v3589_v9 = vsel %vm1144_vm4, %v3588_v2, -inf }
0x161b   : > { %3590 = vmax.xlane.f32.xlu0 %v3589_v9 }
0x16a8   : > { %v3591_v14 = vpop.xlane.xlu0 %3590 }
0x16a9   : > { %v3592_v15 = vsub.f32 %v3588_v2, %v3591_v14 }
0x16ab   : > { %v3593_v16 = vmul.f32 1.442695, %v3592_v15 }
0x16ad   : > { %12328 = vpow2.f32 %v3593_v16 }
0x16b7   : > { %v12329_v17 = vpop.eup %12328 }
0x16b8   : > { %v3595_v18 = vsel %vm1144_vm4, %v12329_v17, 0.0 }
0x16b9   : > { %3596 = vadd.xlane.f32.xlu1 %v3595_v18 }
0x1746   : > { %v3597_v19 = vpop.xlane.xlu1 %3596 }
0x1747   : > { %12330 = vrcp.f32 %v3597_v19 }
0x1751   : > { %v12331_v20 = vpop.eup %12330 }
0x1752   : > { %v3599_v21 = vmul.f32 %v12331_v20, %v12329_v17 }
0x1754   : > { %10733 = vmatmul.mubr.msk.f32.vlgmr.msra.gmra.mrb[40].mxu0 %vm1144_vm4, %v3599_v21  ;;  %v9277_v21 = vld [vmem:[%s14915_s9 + $0x30] sm:$0xff] }
0x1755   : > { %10736 = vmatpush3.msra.mxu0 %v9245_v22  ;;  %10737 = vmatprep.mubr.msk.f32.mxu0 %vm12444_vm0, %v12445_v11  ;;  %v9279_v22 = vld [vmem:[%s14912_s6 + $0x1c0] sm:$0xff] }
0x1756   : > { %11832 = vmatprep.subr.bf16.mxu0 %v12443_v3  ;;  %v11869_v24 = vpack.c.bf16 %v9280_v23, %v9279_v22  ;;  %v4736_v22 = vld [vmem:[%s14919_s13 + $0x8] sm:$0xff] }
0x1827   : > { %v3669_v28 = vpop.f32.mrb[40].mxu0 }
0x1828   : > { %v10734_v29 = vpop.f32.mrb[41].mxu0  ;;  %10738 = vmatmul.mubr.msk.f32.vlgmr.msra.gmra.mrb[42].mxu0 %vm1144_vm4, %v3669_v28 }
0x1829   : > { %11834 = vmatpush3.bf16.msra.mxu0 %v11833_v25  ;;  %10756 = vmatprep.mubr.msk.f32.mxu0 %vm12444_vm0, %v12445_v11  ;;  %v9281_v25 = vld [vmem:[%s14912_s6 + $0x1d0] sm:$0xff] }
0x182a   : > { %11835 = vmatprep.subr.bf16.mxu0 %v12443_v3  ;;  %v11872_v29 = vpack.c.bf16 %v9282_v26, %v9281_v25  ;;  %v4738_v25 = vld [vmem:[%s14919_s13 + $0x18] sm:$0xff] }
0x182d   : > { %11837 = vmatpush3.bf16.msra.mxu0 %v11836_v30  ;;  %v9283_v30 = vld [vmem:[%s14912_s6 + $0x1e0] sm:$0xff] }
0x182e   : > { %11838 = vmatprep.subr.bf16.mxu0 %v12443_v3  ;;  %v11875_v32 = vpack.c.bf16 %v9284_v31, %v9283_v30  ;;  %v4741_v30 = vld [vmem:[%s14919_s13 + $0x30] sm:$0xff]  ;;  %v4742_v31 = vld [vmem:[%s14919_s13 + $0x38] sm:$0xff] }
0x1831   : > { %11840 = vmatpush3.bf16.msra.mxu0 %v11839_v33  ;;  %v9285_v33 = vld [vmem:[%s14912_s6 + $0x1f0] sm:$0xff] }
0x1832   : > { %11841 = vmatprep.subr.bf16.mxu0 %v12443_v3  ;;  %v11878_v35 = vpack.c.bf16 %v9286_v34, %v9285_v33  ;;  %v4824_v33 = vld [vmem:[%s14921_s15] sm:$0xff]  ;;  %v4825_v34 = vld [vmem:[%s14921_s15 + $0x8] sm:$0xff] }
0x1835   : > { %11843 = vmatpush3.bf16.msra.mxu0 %v11842_v36  ;;  %v9297_v36 = vld [vmem:[%s14914_s8 + $0x1c0] sm:$0xff] }
0x1836   : > { %11856 = vmatprep.subr.bf16.mxu0 %v12443_v3  ;;  %v11893_v38 = vpack.c.bf16 %v9298_v37, %v9297_v36  ;;  %v11917_v36 = vpack.c.bf16 %v4825_v34, %v4824_v33  ;;  %v4827_v37 = vld [vmem:[%s14921_s15 + $0x18] sm:$0xff]  ;;  %v9326_v33 = vld [vmem:[%s14912_s6 + $0x228] sm:$0xff] }
0x1838   : > { %10757 = vmatmul.mubr.msk.f32.vlgmr.msra.gmra.mrb[44].mxu0 %vm551_vm1, %v12818_v52 }
0x1839   : > { %11858 = vmatpush3.bf16.msra.mxu0 %v11857_v39  ;;  %10794 = vmatprep.mubr.msk.f32.mxu0 %vm12444_vm0, %v12445_v11  ;;  %v9299_v39 = vld [vmem:[%s14914_s8 + $0x1d0] sm:$0xff] }
0x183a   : > { %11859 = vmatprep.subr.bf16.mxu0 %v12443_v3  ;;  %v11896_v41 = vpack.c.bf16 %v9300_v40, %v9299_v39  ;;  %v4828_v39 = vld [vmem:[%s14921_s15 + $0x20] sm:$0xff]  ;;  %v4829_v40 = vld [vmem:[%s14921_s15 + $0x28] sm:$0xff] }
0x183d   : > { %11861 = vmatpush3.bf16.msra.mxu0 %v11860_v42  ;;  %v9301_v42 = vld [vmem:[%s14914_s8 + $0x1e0] sm:$0xff] }
0x183e   : > { %11862 = vmatprep.subr.bf16.mxu0 %v12443_v3  ;;  %v11899_v44 = vpack.c.bf16 %v9302_v43, %v9301_v42  ;;  %v4830_v42 = vld [vmem:[%s14921_s15 + $0x30] sm:$0xff]  ;;  %v4831_v43 = vld [vmem:[%s14921_s15 + $0x38] sm:$0xff] }
0x1841   : > { %11864 = vmatpush3.bf16.msra.mxu0 %v11863_v45  ;;  %v9303_v45 = vld [vmem:[%s14914_s8 + $0x1f0] sm:$0xff] }
0x1842   : > { %11865 = vmatprep.subr.bf16.mxu0 %v12443_v3  ;;  %v11902_v47 = vpack.c.bf16 %v9304_v46, %v9303_v45  ;;  %v4832_v45 = vld [vmem:[%s14921_s15 + $0x40] sm:$0xff]  ;;  %v4833_v46 = vld [vmem:[%s14921_s15 + $0x48] sm:$0xff] }
0x1845   : > { %11867 = vmatpush3.bf16.msra.mxu0 %v11866_v48 }
0x1846   : > { %11880 = vmatprep.subr.bf16.mxu0 %v12443_v3 }
0x1848   : > { %10795 = vmatmul.mubr.msk.f32.vlgmr.msra.gmra.mrb[46].mxu0 %vm551_vm1, %v12818_v52 }
0x1849   : > { %11882 = vmatpush3.bf16.msra.mxu0 %v11881_v51  ;;  %10847 = vmatprep.mubr.msk.f32.mxu0 %vm12444_vm0, %v12445_v11 }
0x184a   : > { %11883 = vmatprep.subr.bf16.mxu0 %v12443_v3 }
0x184d   : > { %11885 = vmatpush3.bf16.msra.mxu0 %v11884_v55 }
0x184e   : > { %11886 = vmatprep.subr.bf16.mxu0 %v12443_v3 }
0x1851   : > { %11888 = vmatpush3.bf16.msra.mxu0 %v11887_v58 }
0x1852   : > { %11889 = vmatprep.subr.bf16.mxu0 %v12443_v3 }
0x1855   : > { %11891 = vmatpush3.bf16.msra.mxu0 %v11890_v61 }
0x1856   : > { %10869 = vmatprep.subr.mxu0 %v12445_v11 }
0x1858   : > { %10848 = vmatmul.mubr.msk.f32.vlgmr.msra.gmra.mrb[48].mxu0 %vm551_vm1, %v12818_v52 }
0x1859   : > { %10871 = vmatprep.mubr.msk.f32.mxu0 %vm12444_vm0, %v12445_v11 }
0x18fb   : > { %v3744_v62 = vpop.f32.mrb[42].mxu0 }
0x18fc   : > { %v13584_v63 = vadd.f32 %v3744_v62, %v13467_v0  ;;  %v10739_v5 = vpop.f32.mrb[43].mxu0 }
0x190b   : > { %v3824_v6 = vpop.f32.mrb[44].mxu0 }
0x190c   : > { %v10758_v7 = vpop.f32.mrb[45].mxu0  ;;  %10800 = vmatmul.mubr.msk.f32.vlgmr.msra.gmra.mrb[38].mxu1 %vm1144_vm4, %v3824_v6 }
0x190d   : > { %10804 = vmatprep.mubr.msk.f32.mxu1 %vm12444_vm0, %v12445_v11 }
0x191b   : > { %v3982_v8 = vpop.f32.mrb[46].mxu0 }
0x191c   : > { %v10796_v10 = vpop.f32.mrb[47].mxu0  ;;  %10803 = vmatpush3.msra.mxu1 %v3982_v8  ;;  %v9309_v8 = vld [vmem:[%s14915_s9 + $0x38] sm:$0xff] }
0x191d   : > { %10807 = vmatprep.subr.mxu1 %v12445_v11 }
0x192b   : > { %v4377_v12 = vpop.f32.mrb[48].mxu0 }
0x192c   : > { %v10849_v13 = vpop.f32.mrb[49].mxu0  ;;  %10870 = vmatpush3.xpose.msk.msra.mxu0 %vm1144_vm4, %v4377_v12 }
0x192d   : > { %10874 = vmatprep.subr.mxu0 %v12445_v11 }
0x19df   : > { %v4058_v0 = vpop.f32.mrb[38].mxu1 }
0x19e0   : > { %v4062_v1 = vmul.f32 0.35355338, %v4058_v0  ;;  %v10801_v2 = vpop.f32.mrb[39].mxu1 }
0x19e1   : > { %v9311_v2 = vld [vmem:[%s14916_s10] ss:$0 sm:$0xff] }
0x19e2   : > { %v4063_v4 = vsel %vm1144_vm4, %v4062_v1, -inf }
0x19e3   : > { %4064 = vmax.xlane.f32.xlu0 %v4063_v4  ;;  %v12378_v4 = vld [vmem:[#allocation2] sm:$0xff] }
0x1a70   : > { %v4065_v9 = vpop.xlane.xlu0 %4064 }
0x1a71   : > { %v4066_v14 = vsub.f32 %v4062_v1, %v4065_v9 }
0x1a73   : > { %v4067_v15 = vmul.f32 1.442695, %v4066_v14 }
0x1a75   : > { %12332 = vpow2.f32 %v4067_v15 }
0x1a7f   : > { %v12333_v16 = vpop.eup %12332 }
0x1a80   : > { %v4069_v17 = vsel %vm1144_vm4, %v12333_v16, 0.0 }
0x1a81   : > { %4070 = vadd.xlane.f32.xlu1 %v4069_v17 }
0x1b0e   : > { %v4071_v18 = vpop.xlane.xlu1 %4070 }
0x1b0f   : > { %12334 = vrcp.f32 %v4071_v18 }
0x1b19   : > { %v12335_v19 = vpop.eup %12334 }
0x1b1a   : > { %v4073_v20 = vmul.f32 %v12335_v19, %v12333_v16 }
0x1b1c   : > { %10805 = vmatmul.mubr.msk.f32.vlgmr.msra.gmra.mrb[40].mxu1 %vm1144_vm4, %v4073_v20 }
0x1b1d   : > { %10808 = vmatpush3.msra.mxu1 %v9277_v21  ;;  %10809 = vmatprep.mubr.msk.f32.mxu1 %vm12444_vm0, %v12445_v11  ;;  %v4735_v21 = vld [vmem:[%s14919_s13] sm:$0xff] }
0x1b1e   : > { %11868 = vmatprep.subr.bf16.mxu1 %v12443_v3  ;;  %v11905_v23 = vpack.c.bf16 %v4736_v22, %v4735_v21  ;;  %v9321_v21 = vld [vmem:[%s14912_s6 + $0x200] sm:$0xff] }
0x1bef   : > { %v4143_v27 = vpop.f32.mrb[40].mxu1 }
0x1bf0   : > { %v10806_v28 = vpop.f32.mrb[41].mxu1  ;;  %10810 = vmatmul.mubr.msk.f32.vlgmr.msra.gmra.mrb[42].mxu1 %vm1144_vm4, %v4143_v27  ;;  %v4739_v27 = vld [vmem:[%s14919_s13 + $0x20] sm:$0xff] }
0x1bf1   : > { %11870 = vmatpush3.bf16.msra.mxu1 %v11869_v24  ;;  %10828 = vmatprep.mubr.msk.f32.mxu1 %vm12444_vm0, %v12445_v11  ;;  %v4737_v24 = vld [vmem:[%s14919_s13 + $0x10] sm:$0xff]  ;;  %v4740_v28 = vld [vmem:[%s14919_s13 + $0x28] sm:$0xff] }
0x1bf2   : > { %11871 = vmatprep.subr.bf16.mxu1 %v12443_v3  ;;  %v11908_v26 = vpack.c.bf16 %v4738_v25, %v4737_v24  ;;  %v9340_v24 = vld [vmem:[%s14914_s8 + $0x208] sm:$0xff] }
0x1bf5   : > { %11873 = vmatpush3.bf16.msra.mxu1 %v11872_v29  ;;  %v11911_v29 = vpack.c.bf16 %v4740_v28, %v4739_v27  ;;  %v9324_v27 = vld [vmem:[%s14912_s6 + $0x218] sm:$0xff] }
0x1bf6   : > { %11874 = vmatprep.subr.bf16.mxu1 %v12443_v3 }
0x1bf9   : > { %11876 = vmatpush3.bf16.msra.mxu1 %v11875_v32  ;;  %v11914_v32 = vpack.c.bf16 %v4742_v31, %v4741_v30  ;;  %v9342_v30 = vld [vmem:[%s14914_s8 + $0x218] sm:$0xff] }
0x1bfa   : > { %11877 = vmatprep.subr.bf16.mxu1 %v12443_v3 }
0x1bfd   : > { %11879 = vmatpush3.bf16.msra.mxu1 %v11878_v35  ;;  %v4826_v35 = vld [vmem:[%s14921_s15 + $0x10] sm:$0xff] }
0x1bfe   : > { %11892 = vmatprep.subr.bf16.mxu1 %v12443_v3 }
0x1c00   : > { %10829 = vmatmul.mubr.msk.f32.vlgmr.msra.gmra.mrb[44].mxu1 %vm551_vm1, %v12818_v52 }
0x1c01   : > { %11894 = vmatpush3.bf16.msra.mxu1 %v11893_v38  ;;  %10866 = vmatprep.mubr.msk.f32.mxu1 %vm12444_vm0, %v12445_v11  ;;  %v11920_v38 = vpack.c.bf16 %v4827_v37, %v4826_v35  ;;  %v9343_v35 = vld [vmem:[%s14914_s8 + $0x220] sm:$0xff] }
0x1c02   : > { %11895 = vmatprep.subr.bf16.mxu1 %v12443_v3 }
0x1c05   : > { %11897 = vmatpush3.bf16.msra.mxu1 %v11896_v41  ;;  %v11923_v41 = vpack.c.bf16 %v4829_v40, %v4828_v39  ;;  %v9328_v39 = vld [vmem:[%s14912_s6 + $0x238] sm:$0xff] }
0x1c06   : > { %11898 = vmatprep.subr.bf16.mxu1 %v12443_v3 }
0x1c09   : > { %11900 = vmatpush3.bf16.msra.mxu1 %v11899_v44  ;;  %v11926_v44 = vpack.c.bf16 %v4831_v43, %v4830_v42  ;;  %v9346_v42 = vld [vmem:[%s14914_s8 + $0x238] sm:$0xff] }
0x1c0a   : > { %11901 = vmatprep.subr.bf16.mxu1 %v12443_v3 }
0x1c0d   : > { %11903 = vmatpush3.bf16.msra.mxu1 %v11902_v47  ;;  %v11929_v47 = vpack.c.bf16 %v4833_v46, %v4832_v45 }
0x1c0e   : > { %11916 = vmatprep.subr.bf16.mxu1 %v12443_v3 }
0x1c10   : > { %10867 = vmatmul.mubr.msk.f32.vlgmr.msra.gmra.mrb[46].mxu1 %vm551_vm1, %v12818_v52 }
0x1c11   : > { %10935 = vmatprep.mubr.msk.f32.mxu1 %vm12444_vm0, %v12445_v11  ;;  %11918 = vmatpush3.bf16.msra.mxu1 %v11917_v36  ;;  %v9344_v36 = vld [vmem:[%s14914_s8 + $0x228] sm:$0xff] }
0x1c12   : > { %11919 = vmatprep.subr.bf16.mxu1 %v12443_v3  ;;  %v11971_v37 = vpack.c.bf16 %v9344_v36, %v9343_v35  ;;  %v9386_v35 = vld [vmem:[%s14912_s6 + $0x288] sm:$0xff] }
0x1c15   : > { %11921 = vmatpush3.bf16.msra.mxu1 %v11920_v38  ;;  %v9327_v38 = vld [vmem:[%s14912_s6 + $0x230] sm:$0xff] }
0x1c16   : > { %11922 = vmatprep.subr.bf16.mxu1 %v12443_v3  ;;  %v11950_v40 = vpack.c.bf16 %v9328_v39, %v9327_v38  ;;  %v9388_v38 = vld [vmem:[%s14912_s6 + $0x298] sm:$0xff] }
0x1c19   : > { %11924 = vmatpush3.bf16.msra.mxu1 %v11923_v41  ;;  %v9345_v41 = vld [vmem:[%s14914_s8 + $0x230] sm:$0xff] }
0x1c1a   : > { %11925 = vmatprep.subr.bf16.mxu1 %v12443_v3  ;;  %v11974_v43 = vpack.c.bf16 %v9346_v42, %v9345_v41  ;;  %v9390_v41 = vld [vmem:[%s14912_s6 + $0x2a8] sm:$0xff] }
0x1c1d   : > { %11927 = vmatpush3.bf16.msra.mxu1 %v11926_v44 }
0x1c1e   : > { %11928 = vmatprep.subr.bf16.mxu1 %v12443_v3 }
0x1c21   : > { %11930 = vmatpush3.bf16.msra.mxu1 %v11929_v47 }
0x1c22   : > { %11931 = vmatprep.subr.bf16.mxu1 %v12443_v3 }
0x1cc3   : > { %v4218_v48 = vpop.f32.mrb[42].mxu1 }
0x1cc4   : > { %v4222_v49 = vadd.f32 %v4218_v48, %v13584_v63  ;;  %v10811_v50 = vpop.f32.mrb[43].mxu1  ;;  %v4834_v48 = vld [vmem:[%s14921_s15 + $0x50] sm:$0xff] }
0x1cd3   : > { %v4298_v51 = vpop.f32.mrb[44].mxu1 }
0x1cd4   : > { %v10830_v53 = vpop.f32.mrb[45].mxu1  ;;  %10872 = vmatmul.mubr.msk.f32.vlgmr.msra.gmra.mrb[50].mxu0 %vm1144_vm4, %v4298_v51  ;;  %v4836_v51 = vld [vmem:[%s14921_s15 + $0x60] sm:$0xff] }
0x1cd5   : > { %10876 = vmatprep.mubr.msk.f32.mxu0 %vm12444_vm0, %v12445_v11  ;;  %v4837_v53 = vld [vmem:[%s14921_s15 + $0x68] sm:$0xff] }
0x1ce3   : > { %v4456_v54 = vpop.f32.mrb[46].mxu1 }
0x1ce4   : > { %v10868_v55 = vpop.f32.mrb[47].mxu1  ;;  %10875 = vmatpush3.msra.mxu0 %v4456_v54  ;;  %v11935_v54 = vpack.c.bf16 %v4837_v53, %v4836_v51  ;;  %v9331_v51 = vld [vmem:[%s14913_s7 + $0x208] sm:$0xff]  ;;  %v9320_v53 = vld [vmem:[%s14911_s5 + $0x1] ss:$0 sm:$0xff] }
0x1ce5   : > { %10879 = vmatprep.subr.mxu0 %v12445_v11 }
0x1da7   : > { %v4532_v52 = vpop.f32.mrb[50].mxu0 }
0x1da8   : > { %v4536_v56 = vmul.f32 0.35355338, %v4532_v52  ;;  %v10873_v57 = vpop.f32.mrb[51].mxu0 }
0x1daa   : > { %v4537_v58 = vsel %vm1144_vm4, %v4536_v56, -inf }
0x1dab   : > { %4538 = vmax.xlane.f32.xlu0 %v4537_v58  ;;  %v9312_v58 = vld [vmem:[%s14917_s11] ss:$0 sm:$0xff] }
0x1e38   : > { %v4539_v59 = vpop.xlane.xlu0 %4538 }
0x1e39   : > { %v4540_v60 = vsub.f32 %v4536_v56, %v4539_v59 }
0x1e3b   : > { %v4541_v61 = vmul.f32 1.442695, %v4540_v60  ;;  %v9313_v60 = vld [vmem:[%s14918_s12] ss:$0 sm:$0xff] }
0x1e3d   : > { %12336 = vpow2.f32 %v4541_v61 }
0x1e47   : > { %v12337_v62 = vpop.eup %12336 }
0x1e48   : > { %v4543_v63 = vsel %vm1144_vm4, %v12337_v62, 0.0 }
0x1e49   : > { %4544 = vadd.xlane.f32.xlu1 %v4543_v63  ;;  %v4838_v63 = vld [vmem:[%s14921_s15 + $0x70] sm:$0xff] }
0x1ed6   : > { %v4545_v5 = vpop.xlane.xlu1 %4544 }
0x1ed7   : > { %12338 = vrcp.f32 %v4545_v5  ;;  %v4839_v5 = vld [vmem:[%s14921_s15 + $0x78] sm:$0xff] }
0x1ee1   : > { %v12339_v6 = vpop.eup %12338 }
0x1ee2   : > { %v4547_v7 = vmul.f32 %v12339_v6, %v12337_v62  ;;  %v11938_v6 = vpack.c.bf16 %v4839_v5, %v4838_v63  ;;  %v9337_v63 = vld [vmem:[%s14913_s7 + $0x238] sm:$0xff] }
0x1ee4   : > { %10877 = vmatmul.mubr.msk.f32.vlgmr.msra.gmra.mrb[52].mxu0 %vm1144_vm4, %v4547_v7  ;;  %v9314_v7 = vld [vmem:[%s14920_s14] ss:$0 sm:$0xff] }
0x1ee5   : > { %10880 = vmatpush3.msra.mxu0 %v9309_v8  ;;  %10881 = vmatprep.mubr.msk.f32.mxu0 %vm12444_vm0, %v12445_v11 }
0x1ee6   : > { %11904 = vmatprep.subr.bf16.mxu0 %v12443_v3 }
0x1fb7   : > { %v4617_v10 = vpop.f32.mrb[52].mxu0 }
0x1fb8   : > { %v10878_v12 = vpop.f32.mrb[53].mxu0  ;;  %10882 = vmatmul.mubr.msk.f32.vlgmr.msra.gmra.mrb[54].mxu0 %vm1144_vm4, %v4617_v10 }
0x1fb9   : > { %10900 = vmatprep.mubr.msk.f32.mxu0 %vm12444_vm0, %v12445_v11  ;;  %11906 = vmatpush3.bf16.msra.mxu0 %v11905_v23  ;;  %v9339_v23 = vld [vmem:[%s14914_s8 + $0x200] sm:$0xff] }
0x1fba   : > { %11907 = vmatprep.subr.bf16.mxu0 %v12443_v3  ;;  %v11965_v25 = vpack.c.bf16 %v9340_v24, %v9339_v23  ;;  %v9371_v23 = vld [vmem:[%s14914_s8 + $0x248] sm:$0xff] }
0x1fbd   : > { %11909 = vmatpush3.bf16.msra.mxu0 %v11908_v26  ;;  %v9323_v26 = vld [vmem:[%s14912_s6 + $0x210] sm:$0xff] }
0x1fbe   : > { %11910 = vmatprep.subr.bf16.mxu0 %v12443_v3  ;;  %v11944_v28 = vpack.c.bf16 %v9324_v27, %v9323_v26  ;;  %v9373_v26 = vld [vmem:[%s14914_s8 + $0x258] sm:$0xff] }
0x1fc1   : > { %11912 = vmatpush3.bf16.msra.mxu0 %v11911_v29  ;;  %v9341_v29 = vld [vmem:[%s14914_s8 + $0x210] sm:$0xff] }
0x1fc2   : > { %11913 = vmatprep.subr.bf16.mxu0 %v12443_v3  ;;  %v11968_v31 = vpack.c.bf16 %v9342_v30, %v9341_v29  ;;  %v9375_v29 = vld [vmem:[%s14914_s8 + $0x268] sm:$0xff] }
0x1fc5   : > { %11915 = vmatpush3.bf16.msra.mxu0 %v11914_v32  ;;  %v9325_v32 = vld [vmem:[%s14912_s6 + $0x220] sm:$0xff] }
0x1fc6   : > { %11940 = vmatprep.subr.bf16.mxu0 %v12443_v3  ;;  %v11947_v34 = vpack.c.bf16 %v9326_v33, %v9325_v32  ;;  %v9377_v32 = vld [vmem:[%s14914_s8 + $0x278] sm:$0xff] }
0x208b   : > { %v4692_v13 = vpop.f32.mrb[54].mxu0 }
0x208c   : > { %v4696_v0 = vadd.f32 %v4692_v13, %v4222_v49  ;;  %v10883_v1 = vpop.f32.mrb[55].mxu0  ;;  %v4835_v49 = vld [vmem:[%s14921_s15 + $0x58] sm:$0xff] }
0x208d   : > { %v11932_v50 = vpack.c.bf16 %v4835_v49, %v4834_v48  ;;  %v9319_v48 = vld [vmem:[%s14910_s4 + $0x1] ss:$0 sm:$0xff] }
0x208e   : > { %v4697_v9 = vadd.f32 %v12378_v4, %v4696_v0  ;;  %v9316_v0 = vld [vmem:[%s14922_s16] ss:$0 sm:$0xff] }
0x208f   : > { %11933 = vmatpush3.bf16.msra.mxu1 %v11932_v50  ;;  %v9330_v50 = vld [vmem:[%s14913_s7 + $0x200] sm:$0xff] }
0x2090   : > { %v13688_v14 = vadd.f32 %v9311_v2, %v4697_v9  ;;  %11934 = vmatprep.subr.bf16.mxu1 %v12443_v3 }
0x2092   : > { %v4708_v15 = vsel %vm551_vm1, %v13688_v14, 0.0 }
0x2093   : > { %4709 = vadd.xlane.f32.xlu0 %v4708_v15  ;;  %11936 = vmatpush3.bf16.msra.mxu1 %v11935_v54 }
0x2094   : > { %11937 = vmatprep.subr.bf16.mxu1 %v12443_v3 }
0x2097   : > { %11939 = vmatpush3.bf16.msra.mxu1 %v11938_v6 }
0x2098   : > { %11964 = vmatprep.subr.bf16.mxu1 %v12443_v3 }
0x2120   : > { %v4710_v16 = vpop.xlane.xlu0 %4709 }
0x2121   : > { %v4711_v17 = vmul.f32 0.015625, %v4710_v16 }
0x2123   : > { %v13693_v18 = vsub.f32 %v13688_v14, %v4711_v17 }
0x2125   : > { %v4713_v19 = vmul.f32 %v13693_v18, %v13693_v18 }
0x2127   : > { %v4714_v20 = vsel %vm551_vm1, %v4713_v19, 0.0 }
0x2128   : > { %4715 = vadd.xlane.f32.xlu1 %v4714_v20 }
0x21b5   : > { %v4716_v55 = vpop.xlane.xlu1 %4715 }
0x21b6   : > { %v4717_v52 = vmul.f32 0.015625, %v4716_v55  ;;  %v11953_v55 = vpack.c.bf16 %v9331_v51, %v9330_v50  ;;  %v9406_v50 = vld [vmem:[%s14914_s8 + $0x298] sm:$0xff] }
0x21b8   : > { %v4718_v56 = vadd.f32 1e-05, %v4717_v52 }
0x21ba   : > { %12340 = vrsqrt.f32 %v4718_v56  ;;  %v9332_v56 = vld [vmem:[%s14913_s7 + $0x210] sm:$0xff] }
0x21c4   : > { %v12341_v57 = vpop.eup %12340 }
0x21c5   : > { %v4720_v59 = vmul.f32 %v12341_v57, %v13693_v18  ;;  %v9333_v57 = vld [vmem:[%s14913_s7 + $0x218] sm:$0xff] }
0x21c7   : > { %v4727_v61 = vmul.f32 %v9312_v58, %v4720_v59  ;;  %v11956_v58 = vpack.c.bf16 %v9333_v57, %v9332_v56  ;;  %v9334_v59 = vld [vmem:[%s14913_s7 + $0x220] sm:$0xff]  ;;  %v9409_v56 = vld [vmem:[%s14914_s8 + $0x2b0] sm:$0xff]  ;;  %v9410_v57 = vld [vmem:[%s14914_s8 + $0x2b8] sm:$0xff] }
0x21c9   : > { %v4734_v62 = vadd.f32 %v9313_v60, %v4727_v61  ;;  %v9335_v60 = vld [vmem:[%s14913_s7 + $0x228] sm:$0xff] }
0x21ca   : > { %v11959_v61 = vpack.c.bf16 %v9335_v60, %v9334_v59  ;;  %v9426_v59 = vld [vmem:[%s14913_s7 + $0x2c0] sm:$0xff]  ;;  %v9427_v60 = vld [vmem:[%s14913_s7 + $0x2c8] sm:$0xff] }
0x21cb   : > { %10901 = vmatmul.mubr.msk.f32.vlgmr.msra.gmra.mrb[56].mxu0 %vm551_vm1, %v4734_v62  ;;  %v9336_v62 = vld [vmem:[%s14913_s7 + $0x230] sm:$0xff] }
0x21cc   : > { %10954 = vmatprep.mubr.msk.f32.mxu0 %vm12444_vm0, %v12445_v11  ;;  %v11962_v5 = vpack.c.bf16 %v9337_v63, %v9336_v62  ;;  %v9428_v62 = vld [vmem:[%s14913_s7 + $0x2d0] sm:$0xff]  ;;  %v9429_v63 = vld [vmem:[%s14913_s7 + $0x2d8] sm:$0xff] }
0x229e   : > { %v4819_v8 = vpop.f32.mrb[56].mxu0 }
0x229f   : > { %v4820_v10 = vadd.f32 %v9314_v7, %v4819_v8  ;;  %v10902_v12 = vpop.f32.mrb[57].mxu0 }
0x22a0   : > { %v9352_v12 = vld [vmem:[%s14912_s6 + $0x240] sm:$0xff] }
0x22a1   : > { %v4823_v13 = vmax.f32 %v4820_v10, 0.0 }
0x22a3   : > { %10936 = vmatmul.mubr.f32.vlgmr.msra.gmra.mrb[48].mxu1 %v4823_v13  ;;  %v9353_v13 = vld [vmem:[%s14912_s6 + $0x248] sm:$0xff] }
0x22a4   : > { %10992 = vmatprep.mubr.msk.f32.mxu1 %vm12444_vm0, %v12445_v11  ;;  %11966 = vmatpush3.bf16.msra.mxu1 %v11965_v25  ;;  %v9372_v25 = vld [vmem:[%s14914_s8 + $0x250] sm:$0xff] }
0x22a5   : > { %11967 = vmatprep.subr.bf16.mxu1 %v12443_v3  ;;  %v12004_v27 = vpack.c.bf16 %v9373_v26, %v9372_v25 }
0x22a8   : > { %11969 = vmatpush3.bf16.msra.mxu1 %v11968_v31  ;;  %v9376_v31 = vld [vmem:[%s14914_s8 + $0x270] sm:$0xff] }
0x22a9   : > { %11970 = vmatprep.subr.bf16.mxu1 %v12443_v3  ;;  %v12010_v33 = vpack.c.bf16 %v9377_v32, %v9376_v31  ;;  %v9362_v31 = vld [vmem:[%s14913_s7 + $0x248] sm:$0xff] }
0x22ac   : > { %11972 = vmatpush3.bf16.msra.mxu1 %v11971_v37  ;;  %v9387_v37 = vld [vmem:[%s14912_s6 + $0x290] sm:$0xff] }
0x22ad   : > { %11973 = vmatprep.subr.bf16.mxu1 %v12443_v3  ;;  %v12016_v39 = vpack.c.bf16 %v9388_v38, %v9387_v37  ;;  %v9365_v38 = vld [vmem:[%s14913_s7 + $0x260] sm:$0xff] }
0x22b0   : > { %11975 = vmatpush3.bf16.msra.mxu1 %v11974_v43  ;;  %v9391_v43 = vld [vmem:[%s14912_s6 + $0x2b0] sm:$0xff] }
0x22b1   : > { %11000 = vmatprep.subr.mxu1 %v12445_v11 }
0x2376   : > { %v4913_v1 = vpop.f32.mrb[48].mxu1 }
0x2377   : > { %v4914_v2 = vadd.f32 %v9316_v0, %v4913_v1  ;;  %v10937_v4 = vpop.f32.mrb[49].mxu1 }
0x2378   : > { %v9354_v4 = vld [vmem:[%s14912_s6 + $0x250] sm:$0xff] }
0x2379   : > { %v13801_v9 = vadd.f32 %v4914_v2, %v13688_v14  ;;  %v9322_v14 = vld [vmem:[%s14912_s6 + $0x208] sm:$0xff]  ;;  %v11977_v2 = vpack.c.bf16 %v9353_v13, %v9352_v12  ;;  %v9433_v12 = vld [vmem:[%s14913_s7 + $0x2f8] sm:$0xff] }
0x237a   : > { %v11941_v22 = vpack.c.bf16 %v9322_v14, %v9321_v21  ;;  %v9359_v21 = vld [vmem:[%s14912_s6 + $0x278] sm:$0xff] }
0x237b   : > { %v4922_v15 = vsel %vm551_vm1, %v13801_v9, 0.0 }
0x237c   : > { %4923 = vadd.xlane.f32.xlu0 %v4922_v15  ;;  %11942 = vmatpush3.bf16.msra.mxu0 %v11941_v22  ;;  %v9355_v15 = vld [vmem:[%s14912_s6 + $0x258] sm:$0xff]  ;;  %v9370_v22 = vld [vmem:[%s14914_s8 + $0x240] sm:$0xff] }
0x237d   : > { %11943 = vmatprep.subr.bf16.mxu0 %v12443_v3  ;;  %v12001_v24 = vpack.c.bf16 %v9371_v23, %v9370_v22 }
0x2380   : > { %11945 = vmatpush3.bf16.msra.mxu0 %v11944_v28  ;;  %v9374_v28 = vld [vmem:[%s14914_s8 + $0x260] sm:$0xff] }
0x2381   : > { %11946 = vmatprep.subr.bf16.mxu0 %v12443_v3  ;;  %v12007_v30 = vpack.c.bf16 %v9375_v29, %v9374_v28 }
0x2384   : > { %11948 = vmatpush3.bf16.msra.mxu0 %v11947_v34  ;;  %v9385_v34 = vld [vmem:[%s14912_s6 + $0x280] sm:$0xff] }
0x2385   : > { %11949 = vmatprep.subr.bf16.mxu0 %v12443_v3  ;;  %v12013_v36 = vpack.c.bf16 %v9386_v35, %v9385_v34  ;;  %v9363_v35 = vld [vmem:[%s14913_s7 + $0x250] sm:$0xff] }
0x2388   : > { %11951 = vmatpush3.bf16.msra.mxu0 %v11950_v40  ;;  %v9389_v40 = vld [vmem:[%s14912_s6 + $0x2a0] sm:$0xff] }
0x2389   : > { %11952 = vmatprep.subr.bf16.mxu0 %v12443_v3  ;;  %v12019_v42 = vpack.c.bf16 %v9390_v41, %v9389_v40  ;;  %v9367_v41 = vld [vmem:[%s14913_s7 + $0x270] sm:$0xff] }
0x2409   : > { %v4924_v16 = vpop.xlane.xlu0 %4923 }
0x240a   : > { %v4925_v17 = vmul.f32 0.015625, %v4924_v16  ;;  %v11980_v16 = vpack.c.bf16 %v9355_v15, %v9354_v4 }
0x240c   : > { %v4926_v18 = vsub.f32 %v13801_v9, %v4925_v17  ;;  %v9356_v17 = vld [vmem:[%s14912_s6 + $0x260] sm:$0xff] }
0x240e   : > { %v4927_v19 = vmul.f32 %v4926_v18, %v4926_v18 }
0x2410   : > { %v4928_v20 = vsel %vm551_vm1, %v4927_v19, 0.0 }
0x2411   : > { %4929 = vadd.xlane.f32.xlu1 %v4928_v20  ;;  %v9358_v20 = vld [vmem:[%s14912_s6 + $0x270] sm:$0xff] }
0x2412   : > { %v11986_v14 = vpack.c.bf16 %v9359_v21, %v9358_v20 }
0x249e   : > { %v4930_v44 = vpop.xlane.xlu1 %4929 }
0x249f   : > { %v4931_v45 = vmul.f32 0.015625, %v4930_v44  ;;  %v9392_v44 = vld [vmem:[%s14912_s6 + $0x2b8] sm:$0xff] }
0x24a1   : > { %v4932_v46 = vadd.f32 1e-05, %v4931_v45  ;;  %v12022_v45 = vpack.c.bf16 %v9392_v44, %v9391_v43 }
0x24a3   : > { %12342 = vrsqrt.f32 %v4932_v46  ;;  %v9403_v46 = vld [vmem:[%s14914_s8 + $0x280] sm:$0xff] }
0x24ad   : > { %v12343_v47 = vpop.eup %12342 }
0x24ae   : > { %v4934_v49 = vmul.f32 %v12343_v47, %v4926_v18  ;;  %v9357_v18 = vld [vmem:[%s14912_s6 + $0x268] sm:$0xff] }
0x24af   : > { %v11983_v19 = vpack.c.bf16 %v9357_v18, %v9356_v17  ;;  %v9404_v47 = vld [vmem:[%s14914_s8 + $0x288] sm:$0xff] }
0x24b0   : > { %v4941_v54 = vmul.f32 %v9319_v48, %v4934_v49  ;;  %v12037_v48 = vpack.c.bf16 %v9404_v47, %v9403_v46  ;;  %v9405_v49 = vld [vmem:[%s14914_s8 + $0x290] sm:$0xff] }
0x24b1   : > { %v12040_v51 = vpack.c.bf16 %v9406_v50, %v9405_v49 }
0x24b2   : > { %v13875_v52 = vadd.f32 %v9320_v53, %v4941_v54  ;;  %v9407_v53 = vld [vmem:[%s14914_s8 + $0x2a0] sm:$0xff]  ;;  %v9408_v54 = vld [vmem:[%s14914_s8 + $0x2a8] sm:$0xff] }
0x24b4   : > { %10955 = vmatmul.mubr.msk.f32.vlgmr.msra.gmra.mrb[58].mxu0 %vm551_vm1, %v13875_v52  ;;  %10993 = vmatmul.mubr.msk.f32.vlgmr.msra.gmra.mrb[50].mxu1 %vm551_vm1, %v13875_v52 }
0x24b5   : > { %11954 = vmatpush3.bf16.msra.mxu0 %v11953_v55  ;;  %10973 = vmatprep.mubr.msk.f32.mxu0 %vm12444_vm0, %v12445_v11  ;;  %v12043_v55 = vpack.c.bf16 %v9408_v54, %v9407_v53 }
0x24b6   : > { %11955 = vmatprep.subr.bf16.mxu0 %v12443_v3  ;;  %11002 = vmatprep.mubr.msk.f32.mxu1 %vm12444_vm0, %v12445_v11 }
0x24b9   : > { %11957 = vmatpush3.bf16.msra.mxu0 %v11956_v58  ;;  %v12046_v58 = vpack.c.bf16 %v9410_v57, %v9409_v56 }
0x24ba   : > { %11958 = vmatprep.subr.bf16.mxu0 %v12443_v3 }
0x24bd   : > { %11960 = vmatpush3.bf16.msra.mxu0 %v11959_v61  ;;  %v12061_v61 = vpack.c.bf16 %v9427_v60, %v9426_v59 }
0x24be   : > { %11961 = vmatprep.subr.bf16.mxu0 %v12443_v3 }
0x24c1   : > { %11963 = vmatpush3.bf16.msra.mxu0 %v11962_v5  ;;  %v12064_v5 = vpack.c.bf16 %v9429_v63, %v9428_v62  ;;  %v9351_v62 = vld [vmem:[%s14915_s9 + $0x40] sm:$0xff] }
0x24c2   : > { %10995 = vmatprep.subr.mxu0 %v12445_v11  ;;  %v9394_v63 = vld [vmem:[%s14913_s7 + $0x280] sm:$0xff] }
0x24c4   : > { %10974 = vmatmul.mubr.msk.f32.vlgmr.msra.gmra.mrb[60].mxu0 %vm551_vm1, %v13875_v52 }
0x24c5   : > { %10997 = vmatprep.mubr.msk.f32.mxu0 %vm12444_vm0, %v12445_v11 }
0x2587   : > { %v5027_v6 = vpop.f32.mrb[58].mxu0  ;;  %v5185_v7 = vpop.f32.mrb[50].mxu1 }
0x2588   : > { %v10956_v8 = vpop.f32.mrb[59].mxu0  ;;  %v10994_v10 = vpop.f32.mrb[51].mxu1  ;;  %11001 = vmatpush3.msra.mxu1 %v5185_v7  ;;  %v9431_v7 = vld [vmem:[%s14913_s7 + $0x2e8] sm:$0xff] }
0x2589   : > { %11988 = vmatprep.subr.bf16.mxu1 %v12443_v3  ;;  %v9432_v10 = vld [vmem:[%s14913_s7 + $0x2f0] sm:$0xff] }
0x258a   : > { %v12070_v13 = vpack.c.bf16 %v9433_v12, %v9432_v10  ;;  %v9396_v10 = vld [vmem:[%s14913_s7 + $0x290] sm:$0xff]  ;;  %v9397_v12 = vld [vmem:[%s14913_s7 + $0x298] sm:$0xff] }
0x2597   : > { %v5106_v0 = vpop.f32.mrb[60].mxu0 }
0x2598   : > { %v10975_v1 = vpop.f32.mrb[61].mxu0  ;;  %10996 = vmatpush3.xpose.msk.msra.mxu0 %vm1144_vm4, %v5106_v0 }
0x2599   : > { %11976 = vmatprep.subr.bf16.mxu0 %v12443_v3 }
0x259b   : > { %10998 = vmatmul.mubr.msk.f32.vlgmr.msra.gmra.mrb[62].mxu0 %vm1144_vm4, %v5027_v6  ;;  %v9430_v6 = vld [vmem:[%s14913_s7 + $0x2e0] sm:$0xff] }
0x259c   : > { %11978 = vmatpush3.bf16.msra.mxu0 %v11977_v2  ;;  %11021 = vmatprep.mubr.msk.f32.mxu0 %vm12444_vm0, %v12445_v11  ;;  %v12067_v8 = vpack.c.bf16 %v9431_v7, %v9430_v6 }
0x259d   : > { %11979 = vmatprep.subr.bf16.mxu0 %v12443_v3 }
0x25a0   : > { %11981 = vmatpush3.bf16.msra.mxu0 %v11980_v16 }
0x25a1   : > { %11982 = vmatprep.subr.bf16.mxu0 %v12443_v3 }
0x25a4   : > { %11984 = vmatpush3.bf16.msra.mxu0 %v11983_v19 }
0x25a5   : > { %11985 = vmatprep.subr.bf16.mxu0 %v12443_v3 }
0x25a8   : > { %11987 = vmatpush3.bf16.msra.mxu0 %v11986_v14 }
0x25a9   : > { %12000 = vmatprep.subr.bf16.mxu0 %v12443_v3 }
0x25ab   : > { %11022 = vmatmul.mubr.msk.f32.vlgmr.msra.gmra.mrb[64].mxu0 %vm551_vm1, %v13875_v52 }
0x25ac   : > { %12002 = vmatpush3.bf16.msra.mxu0 %v12001_v24  ;;  %11059 = vmatprep.mubr.msk.f32.mxu0 %vm12444_vm0, %v12445_v11 }
0x25ad   : > { %12003 = vmatprep.subr.bf16.mxu0 %v12443_v3 }
0x25b0   : > { %12005 = vmatpush3.bf16.msra.mxu0 %v12004_v27 }
0x25b1   : > { %12006 = vmatprep.subr.bf16.mxu0 %v12443_v3 }
0x25b4   : > { %12008 = vmatpush3.bf16.msra.mxu0 %v12007_v30  ;;  %v9361_v30 = vld [vmem:[%s14913_s7 + $0x240] sm:$0xff] }
0x25b5   : > { %12009 = vmatprep.subr.bf16.mxu0 %v12443_v3 }
0x25b8   : > { %12011 = vmatpush3.bf16.msra.mxu0 %v12010_v33  ;;  %v11989_v33 = vpack.c.bf16 %v9362_v31, %v9361_v30 }
0x25b9   : > { %12012 = vmatprep.subr.bf16.mxu0 %v12443_v3 }
0x25bb   : > { %11060 = vmatmul.mubr.msk.f32.vlgmr.msra.gmra.mrb[66].mxu0 %vm551_vm1, %v13875_v52 }
0x25bc   : > { %12014 = vmatpush3.bf16.msra.mxu0 %v12013_v36  ;;  %11098 = vmatprep.mubr.msk.f32.mxu0 %vm12444_vm0, %v12445_v11  ;;  %v9364_v36 = vld [vmem:[%s14913_s7 + $0x258] sm:$0xff] }
0x25bd   : > { %12015 = vmatprep.subr.bf16.mxu0 %v12443_v3  ;;  %v11992_v37 = vpack.c.bf16 %v9364_v36, %v9363_v35  ;;  %v9415_v35 = vld [vmem:[%s14915_s9 + $0x50] sm:$0xff]  ;;  %v9417_v36 = vld [vmem:[%s14912_s6 + $0x2c0] sm:$0xff] }
0x25c0   : > { %12017 = vmatpush3.bf16.msra.mxu0 %v12016_v39  ;;  %v9366_v39 = vld [vmem:[%s14913_s7 + $0x268] sm:$0xff] }
0x25c1   : > { %12018 = vmatprep.subr.bf16.mxu0 %v12443_v3  ;;  %v11995_v40 = vpack.c.bf16 %v9366_v39, %v9365_v38  ;;  %v9419_v39 = vld [vmem:[%s14912_s6 + $0x2d0] sm:$0xff] }
0x25c4   : > { %12020 = vmatpush3.bf16.msra.mxu0 %v12019_v42  ;;  %v9368_v42 = vld [vmem:[%s14913_s7 + $0x278] sm:$0xff] }
0x25c5   : > { %12021 = vmatprep.subr.bf16.mxu0 %v12443_v3  ;;  %v11998_v43 = vpack.c.bf16 %v9368_v42, %v9367_v41 }
0x25c8   : > { %12023 = vmatpush3.bf16.msra.mxu0 %v12022_v45 }
0x25c9   : > { %12036 = vmatprep.subr.bf16.mxu0 %v12443_v3 }
0x25cb   : > { %11099 = vmatmul.mubr.msk.f32.vlgmr.msra.gmra.mrb[68].mxu0 %vm551_vm1, %v13875_v52 }
0x25cc   : > { %12038 = vmatpush3.bf16.msra.mxu0 %v12037_v48  ;;  %11136 = vmatprep.mubr.msk.f32.mxu0 %vm12444_vm0, %v12445_v11 }
0x25cd   : > { %12039 = vmatprep.subr.bf16.mxu0 %v12443_v3 }
0x25d0   : > { %12041 = vmatpush3.bf16.msra.mxu0 %v12040_v51 }
0x25d1   : > { %12042 = vmatprep.subr.bf16.mxu0 %v12443_v3 }
0x25d4   : > { %12044 = vmatpush3.bf16.msra.mxu0 %v12043_v55 }
0x25d5   : > { %12045 = vmatprep.subr.bf16.mxu0 %v12443_v3 }
0x25d8   : > { %12047 = vmatpush3.bf16.msra.mxu0 %v12046_v58 }
0x25d9   : > { %12060 = vmatprep.subr.bf16.mxu0 %v12443_v3 }
0x25db   : > { %11137 = vmatmul.mubr.msk.f32.vlgmr.msra.gmra.mrb[70].mxu0 %vm551_vm1, %v13875_v52 }
0x25dc   : > { %12062 = vmatpush3.bf16.msra.mxu0 %v12061_v61  ;;  %11189 = vmatprep.mubr.msk.f32.mxu0 %vm12444_vm0, %v12445_v11  ;;  %v9382_v61 = vld [vmem:[%s14915_s9 + $0x48] sm:$0xff] }
0x25dd   : > { %12063 = vmatprep.subr.bf16.mxu0 %v12443_v3 }
0x25e0   : > { %12065 = vmatpush3.bf16.msra.mxu0 %v12064_v5  ;;  %v9395_v5 = vld [vmem:[%s14913_s7 + $0x288] sm:$0xff] }
0x25e1   : > { %12066 = vmatprep.subr.bf16.mxu0 %v12443_v3 }
0x25e4   : > { %12068 = vmatpush3.bf16.msra.mxu0 %v12067_v8  ;;  %v12025_v8 = vpack.c.bf16 %v9395_v5, %v9394_v63  ;;  %v9458_v63 = vld [vmem:[%s14913_s7 + $0x300] sm:$0xff]  ;;  %v9459_v5 = vld [vmem:[%s14913_s7 + $0x308] sm:$0xff] }
0x25e5   : > { %12069 = vmatprep.subr.bf16.mxu0 %v12443_v3 }
0x25e8   : > { %12071 = vmatpush3.bf16.msra.mxu0 %v12070_v13  ;;  %v12028_v13 = vpack.c.bf16 %v9397_v12, %v9396_v10  ;;  %v9462_v12 = vld [vmem:[%s14913_s7 + $0x320] sm:$0xff] }
0x25e9   : > { %11211 = vmatprep.subr.mxu0 %v12445_v11 }
0x25eb   : > { %11190 = vmatmul.mubr.msk.f32.vlgmr.msra.gmra.mrb[72].mxu0 %vm551_vm1, %v13875_v52 }
0x25ec   : > { %11213 = vmatprep.mubr.msk.f32.mxu0 %vm12444_vm0, %v12445_v11 }
0x266e   : > { %v5261_v0 = vpop.f32.mrb[62].mxu0 }
0x266f   : > { %v5265_v1 = vmul.f32 0.35355338, %v5261_v0  ;;  %v10999_v2 = vpop.f32.mrb[63].mxu0  ;;  %v9398_v0 = vld [vmem:[%s14913_s7 + $0x2a0] sm:$0xff] }
0x2671   : > { %v5266_v4 = vsel %vm1144_vm4, %v5265_v1, -inf }
0x2672   : > { %5267 = vmax.xlane.f32.xlu0 %v5266_v4  ;;  %v9400_v4 = vld [vmem:[%s14913_s7 + $0x2b0] sm:$0xff] }
0x267e   : > { %v5427_v15 = vpop.f32.mrb[64].mxu0 }
0x267f   : > { %v11023_v16 = vpop.f32.mrb[65].mxu0 }
0x268e   : > { %v5585_v17 = vpop.f32.mrb[66].mxu0 }
0x268f   : > { %v11061_v18 = vpop.f32.mrb[67].mxu0 }
0x269e   : > { %v14078_v19 = vpop.f32.mrb[68].mxu0 }
0x269f   : > { %v11100_v20 = vpop.f32.mrb[69].mxu0 }
0x26ae   : > { %v14080_v21 = vpop.f32.mrb[70].mxu0 }
0x26af   : > { %v11138_v14 = vpop.f32.mrb[71].mxu0 }
0x26be   : > { %v6526_v22 = vpop.f32.mrb[72].mxu0 }
0x26bf   : > { %v11191_v23 = vpop.f32.mrb[73].mxu0  ;;  %11212 = vmatpush3.xpose.msk.msra.mxu0 %vm1144_vm4, %v6526_v22 }
0x26c0   : > { %11216 = vmatprep.subr.mxu0 %v12445_v11 }
0x26ff   : > { %v5268_v24 = vpop.xlane.xlu0 %5267 }
0x2700   : > { %v5269_v25 = vsub.f32 %v5265_v1, %v5268_v24  ;;  %v9399_v1 = vld [vmem:[%s14913_s7 + $0x2a8] sm:$0xff] }
0x2701   : > { %v12031_v2 = vpack.c.bf16 %v9399_v1, %v9398_v0  ;;  %v9464_v1 = vld [vmem:[%s14913_s7 + $0x330] sm:$0xff] }
0x2702   : > { %v5270_v26 = vmul.f32 1.442695, %v5269_v25 }
0x2704   : > { %12344 = vpow2.f32 %v5270_v26 }
0x270e   : > { %v12345_v27 = vpop.eup %12344 }
0x270f   : > { %v5272_v28 = vsel %vm1144_vm4, %v12345_v27, 0.0 }
0x2710   : > { %5273 = vadd.xlane.f32.xlu1 %v5272_v28 }
0x279d   : > { %v5274_v29 = vpop.xlane.xlu1 %5273 }
0x279e   : > { %12346 = vrcp.f32 %v5274_v29 }
0x27a8   : > { %v12347_v32 = vpop.eup %12346 }
0x27a9   : > { %v5276_v34 = vmul.f32 %v12347_v32, %v12345_v27 }
0x27ab   : > { %11003 = vmatmul.mubr.msk.f32.vlgmr.msra.gmra.mrb[52].mxu1 %vm1144_vm4, %v5276_v34 }
0x27ac   : > { %11990 = vmatpush3.bf16.msra.mxu1 %v11989_v33  ;;  %11040 = vmatprep.mubr.msk.f32.mxu1 %vm12444_vm0, %v12445_v11 }
0x27ad   : > { %11991 = vmatprep.subr.bf16.mxu1 %v12443_v3 }
0x27b0   : > { %11993 = vmatpush3.bf16.msra.mxu1 %v11992_v37  ;;  %v9418_v37 = vld [vmem:[%s14912_s6 + $0x2c8] sm:$0xff] }
0x27b1   : > { %11994 = vmatprep.subr.bf16.mxu1 %v12443_v3  ;;  %v12049_v38 = vpack.c.bf16 %v9418_v37, %v9417_v36  ;;  %v9449_v36 = vld [vmem:[%s14912_s6 + $0x300] sm:$0xff]  ;;  %v9450_v37 = vld [vmem:[%s14912_s6 + $0x308] sm:$0xff] }
0x27b4   : > { %11996 = vmatpush3.bf16.msra.mxu1 %v11995_v40  ;;  %v9420_v40 = vld [vmem:[%s14912_s6 + $0x2d8] sm:$0xff] }
0x27b5   : > { %11997 = vmatprep.subr.bf16.mxu1 %v12443_v3 }
0x27b8   : > { %11999 = vmatpush3.bf16.msra.mxu1 %v11998_v43  ;;  %v12052_v43 = vpack.c.bf16 %v9420_v40, %v9419_v39  ;;  %v9451_v39 = vld [vmem:[%s14912_s6 + $0x310] sm:$0xff]  ;;  %v9452_v40 = vld [vmem:[%s14912_s6 + $0x318] sm:$0xff] }
0x27b9   : > { %11062 = vmatprep.subr.mxu1 %v12445_v11 }
0x27bb   : > { %11041 = vmatmul.mubr.msk.f32.vlgmr.msra.gmra.mrb[54].mxu1 %vm551_vm1, %v13875_v52 }
0x27bc   : > { %11064 = vmatprep.mubr.msk.f32.mxu1 %vm12444_vm0, %v12445_v11 }
0x287e   : > { %v5346_v44 = vpop.f32.mrb[52].mxu1 }
0x287f   : > { %v11004_v45 = vpop.f32.mrb[53].mxu1 }
0x2880   : > { %v9422_v45 = vld [vmem:[%s14912_s6 + $0x2e8] sm:$0xff] }
0x288e   : > { %v5506_v46 = vpop.f32.mrb[54].mxu1 }
0x288f   : > { %v11042_v47 = vpop.f32.mrb[55].mxu1  ;;  %11063 = vmatpush3.xpose.msk.msra.mxu1 %vm1144_vm4, %v5506_v46 }
0x2890   : > { %11067 = vmatprep.subr.mxu1 %v12445_v11  ;;  %v9423_v47 = vld [vmem:[%s14912_s6 + $0x2f0] sm:$0xff] }
0x2892   : > { %11065 = vmatmul.mubr.msk.f32.vlgmr.msra.gmra.mrb[56].mxu1 %vm1144_vm4, %v5427_v15  ;;  %v9401_v15 = vld [vmem:[%s14913_s7 + $0x2b8] sm:$0xff] }
0x2893   : > { %11068 = vmatpush3.msra.mxu1 %v5585_v17  ;;  %11069 = vmatprep.mubr.msk.f32.mxu1 %vm12444_vm0, %v12445_v11  ;;  %v12034_v16 = vpack.c.bf16 %v9401_v15, %v9400_v4 }
0x2894   : > { %11072 = vmatprep.subr.mxu1 %v12445_v11 }
0x2965   : > { %v5661_v48 = vpop.f32.mrb[56].mxu1 }
0x2966   : > { %v5665_v49 = vmul.f32 0.35355338, %v5661_v48  ;;  %v11066_v50 = vpop.f32.mrb[57].mxu1  ;;  %v9424_v48 = vld [vmem:[%s14912_s6 + $0x2f8] sm:$0xff] }
0x2967   : > { %v9435_v50 = vld [vmem:[%s14914_s8 + $0x2c0] sm:$0xff] }
0x2968   : > { %v5666_v51 = vsel %vm1144_vm4, %v5665_v49, -inf }
0x2969   : > { %5667 = vmax.xlane.f32.xlu0 %v5666_v51  ;;  %v9436_v51 = vld [vmem:[%s14914_s8 + $0x2c8] sm:$0xff] }
0x29f6   : > { %v5668_v53 = vpop.xlane.xlu0 %5667 }
0x29f7   : > { %v5669_v54 = vsub.f32 %v5665_v49, %v5668_v53  ;;  %v12058_v49 = vpack.c.bf16 %v9424_v48, %v9423_v47  ;;  %v12073_v53 = vpack.c.bf16 %v9436_v51, %v9435_v50  ;;  %v9455_v47 = vld [vmem:[%s14912_s6 + $0x330] sm:$0xff]  ;;  %v9456_v48 = vld [vmem:[%s14912_s6 + $0x338] sm:$0xff]  ;;  %v9467_v50 = vld [vmem:[%s14914_s8 + $0x300] sm:$0xff] }
0x29f8   : > { %v9468_v51 = vld [vmem:[%s14914_s8 + $0x308] sm:$0xff] }
0x29f9   : > { %v5670_v55 = vmul.f32 1.442695, %v5669_v54  ;;  %v9437_v54 = vld [vmem:[%s14914_s8 + $0x2d0] sm:$0xff] }
0x29fb   : > { %12348 = vpow2.f32 %v5670_v55  ;;  %v9438_v55 = vld [vmem:[%s14914_s8 + $0x2d8] sm:$0xff] }
0x2a05   : > { %v12349_v56 = vpop.eup %12348 }
0x2a06   : > { %v5672_v57 = vsel %vm1144_vm4, %v12349_v56, 0.0 }
0x2a07   : > { %5673 = vadd.xlane.f32.xlu1 %v5672_v57  ;;  %v9439_v57 = vld [vmem:[%s14914_s8 + $0x2e0] sm:$0xff] }
0x2a94   : > { %v5674_v58 = vpop.xlane.xlu1 %5673 }
0x2a95   : > { %12350 = vrcp.f32 %v5674_v58  ;;  %v9440_v58 = vld [vmem:[%s14914_s8 + $0x2e8] sm:$0xff] }
0x2a9f   : > { %v12351_v59 = vpop.eup %12350 }
0x2aa0   : > { %v5676_v60 = vmul.f32 %v12351_v59, %v12349_v56  ;;  %v12076_v56 = vpack.c.bf16 %v9438_v55, %v9437_v54  ;;  %v12079_v59 = vpack.c.bf16 %v9440_v58, %v9439_v57  ;;  %v9469_v54 = vld [vmem:[%s14914_s8 + $0x310] sm:$0xff]  ;;  %v9470_v55 = vld [vmem:[%s14914_s8 + $0x318] sm:$0xff]  ;;  %v9471_v57 = vld [vmem:[%s14914_s8 + $0x320] sm:$0xff] }
0x2aa1   : > { %v9472_v58 = vld [vmem:[%s14914_s8 + $0x328] sm:$0xff] }
0x2aa2   : > { %11070 = vmatmul.mubr.msk.f32.vlgmr.msra.gmra.mrb[58].mxu1 %vm1144_vm4, %v5676_v60  ;;  %v9441_v60 = vld [vmem:[%s14914_s8 + $0x2f0] sm:$0xff] }
0x2aa3   : > { %11073 = vmatpush3.msra.mxu1 %v9382_v61  ;;  %11074 = vmatprep.mubr.msk.f32.mxu1 %vm12444_vm0, %v12445_v11  ;;  %v9442_v61 = vld [vmem:[%s14914_s8 + $0x2f8] sm:$0xff] }
0x2aa4   : > { %11077 = vmatprep.subr.mxu1 %v12445_v11 }
0x2b75   : > { %v5746_v6 = vpop.f32.mrb[58].mxu1 }
0x2b76   : > { %v11071_v7 = vpop.f32.mrb[59].mxu1  ;;  %11075 = vmatmul.mubr.msk.f32.vlgmr.msra.gmra.mrb[60].mxu1 %vm1144_vm4, %v5746_v6  ;;  %v12097_v6 = vpack.c.bf16 %v9459_v5, %v9458_v63  ;;  %v9490_v63 = vld [vmem:[%s14913_s7 + $0x340] sm:$0xff]  ;;  %v9491_v5 = vld [vmem:[%s14913_s7 + $0x348] sm:$0xff] }
0x2b77   : > { %11078 = vmatpush3.msra.mxu1 %v9351_v62  ;;  %11079 = vmatprep.mubr.msk.f32.mxu1 %vm12444_vm0, %v12445_v11  ;;  %v12082_v62 = vpack.c.bf16 %v9442_v61, %v9441_v60  ;;  %v9460_v7 = vld [vmem:[%s14913_s7 + $0x310] sm:$0xff]  ;;  %v9474_v61 = vld [vmem:[%s14914_s8 + $0x338] sm:$0xff] }
0x2b78   : > { %12024 = vmatprep.subr.bf16.mxu1 %v12443_v3  ;;  %v9473_v60 = vld [vmem:[%s14914_s8 + $0x330] sm:$0xff] }
0x2b7a   : > { %11080 = vmatmul.mubr.msk.f32.vlgmr.msra.gmra.mrb[62].mxu1 %vm1144_vm4, %v5346_v44  ;;  %v9421_v44 = vld [vmem:[%s14912_s6 + $0x2e0] sm:$0xff] }
0x2b7b   : > { %12026 = vmatpush3.bf16.msra.mxu1 %v12025_v8  ;;  %11117 = vmatprep.mubr.msk.f32.mxu1 %vm12444_vm0, %v12445_v11  ;;  %v12055_v46 = vpack.c.bf16 %v9422_v45, %v9421_v44  ;;  %v9461_v8 = vld [vmem:[%s14913_s7 + $0x318] sm:$0xff]  ;;  %v9453_v44 = vld [vmem:[%s14912_s6 + $0x320] sm:$0xff]  ;;  %v9454_v45 = vld [vmem:[%s14912_s6 + $0x328] sm:$0xff] }
0x2b7c   : > { %12027 = vmatprep.subr.bf16.mxu1 %v12443_v3  ;;  %v12100_v10 = vpack.c.bf16 %v9461_v8, %v9460_v7  ;;  %v9492_v7 = vld [vmem:[%s14913_s7 + $0x350] sm:$0xff]  ;;  %v9493_v8 = vld [vmem:[%s14913_s7 + $0x358] sm:$0xff] }
0x2b7f   : > { %12029 = vmatpush3.bf16.msra.mxu1 %v12028_v13  ;;  %v9463_v13 = vld [vmem:[%s14913_s7 + $0x328] sm:$0xff] }
0x2b80   : > { %12030 = vmatprep.subr.bf16.mxu1 %v12443_v3  ;;  %v12103_v0 = vpack.c.bf16 %v9463_v13, %v9462_v12  ;;  %v9494_v12 = vld [vmem:[%s14913_s7 + $0x360] sm:$0xff]  ;;  %v9495_v13 = vld [vmem:[%s14913_s7 + $0x368] sm:$0xff] }
0x2b83   : > { %12032 = vmatpush3.bf16.msra.mxu1 %v12031_v2  ;;  %v9465_v2 = vld [vmem:[%s14913_s7 + $0x338] sm:$0xff] }
0x2b84   : > { %12033 = vmatprep.subr.bf16.mxu1 %v12443_v3  ;;  %v12106_v4 = vpack.c.bf16 %v9465_v2, %v9464_v1  ;;  %v9496_v1 = vld [vmem:[%s14913_s7 + $0x370] sm:$0xff]  ;;  %v9497_v2 = vld [vmem:[%s14913_s7 + $0x378] sm:$0xff] }
0x2b87   : > { %12035 = vmatpush3.bf16.msra.mxu1 %v12034_v16 }
0x2b88   : > { %11139 = vmatprep.subr.mxu1 %v12445_v11 }
0x2b8a   : > { %11118 = vmatmul.mubr.msk.f32.vlgmr.msra.gmra.mrb[64].mxu1 %vm551_vm1, %v13875_v52 }
0x2b8b   : > { %11141 = vmatprep.mubr.msk.f32.mxu1 %vm12444_vm0, %v12445_v11 }
0x2c49   : > { %v5821_v17 = vpop.f32.mrb[60].mxu1 }
0x2c4a   : > { %v11076_v18 = vpop.f32.mrb[61].mxu1 }
0x2c4d   : > { %v5894_v20 = vpop.f32.mrb[62].mxu1 }
0x2c4e   : > { %v14177_v14 = vadd.f32 %v5894_v20, %v5821_v17  ;;  %v11081_v22 = vpop.f32.mrb[63].mxu1 }
0x2c5d   : > { %v6052_v23 = vpop.f32.mrb[64].mxu1 }
0x2c5e   : > { %v11119_v24 = vpop.f32.mrb[65].mxu1  ;;  %11140 = vmatpush3.xpose.msk.msra.mxu1 %vm1144_vm4, %v6052_v23 }
0x2c5f   : > { %11144 = vmatprep.subr.mxu1 %v12445_v11 }
0x2c61   : > { %11142 = vmatmul.mubr.msk.f32.vlgmr.msra.gmra.mrb[66].mxu1 %vm1144_vm4, %v14078_v19 }
0x2c62   : > { %11145 = vmatpush3.msra.mxu1 %v14080_v21  ;;  %11146 = vmatprep.mubr.msk.f32.mxu1 %vm12444_vm0, %v12445_v11 }
0x2c63   : > { %11149 = vmatprep.subr.mxu1 %v12445_v11 }
0x2d34   : > { %v6207_v25 = vpop.f32.mrb[66].mxu1 }
0x2d35   : > { %v6211_v26 = vmul.f32 0.35355338, %v6207_v25  ;;  %v11143_v27 = vpop.f32.mrb[67].mxu1 }
0x2d37   : > { %v6212_v28 = vsel %vm1144_vm4, %v6211_v26, -inf }
0x2d38   : > { %6213 = vmax.xlane.f32.xlu0 %v6212_v28 }
0x2dc5   : > { %v6214_v29 = vpop.xlane.xlu0 %6213 }
0x2dc6   : > { %v6215_v30 = vsub.f32 %v6211_v26, %v6214_v29 }
0x2dc8   : > { %v6216_v31 = vmul.f32 1.442695, %v6215_v30 }
0x2dca   : > { %12352 = vpow2.f32 %v6216_v31 }
0x2dd4   : > { %v12353_v32 = vpop.eup %12352 }
0x2dd5   : > { %v6218_v19 = vsel %vm1144_vm4, %v12353_v32, 0.0 }
0x2dd6   : > { %6219 = vadd.xlane.f32.xlu1 %v6218_v19 }
0x2e63   : > { %v6220_v21 = vpop.xlane.xlu1 %6219 }
0x2e64   : > { %12354 = vrcp.f32 %v6220_v21 }
0x2e6e   : > { %v12355_v33 = vpop.eup %12354 }
0x2e6f   : > { %v6222_v34 = vmul.f32 %v12355_v33, %v12353_v32 }
0x2e71   : > { %11147 = vmatmul.mubr.msk.f32.vlgmr.msra.gmra.mrb[68].mxu1 %vm1144_vm4, %v6222_v34 }
0x2e72   : > { %11150 = vmatpush3.msra.mxu1 %v9415_v35  ;;  %11151 = vmatprep.mubr.msk.f32.mxu1 %vm12444_vm0, %v12445_v11  ;;  %v9447_v35 = vld [vmem:[%s14915_s9 + $0x58] sm:$0xff] }
0x2e73   : > { %12048 = vmatprep.subr.bf16.mxu1 %v12443_v3 }
0x2f44   : > { %v6292_v41 = vpop.f32.mrb[68].mxu1 }
0x2f45   : > { %v11148_v42 = vpop.f32.mrb[69].mxu1  ;;  %11152 = vmatmul.mubr.msk.f32.vlgmr.msra.gmra.mrb[70].mxu1 %vm1144_vm4, %v6292_v41 }
0x2f46   : > { %12050 = vmatpush3.bf16.msra.mxu1 %v12049_v38  ;;  %11170 = vmatprep.mubr.msk.f32.mxu1 %vm12444_vm0, %v12445_v11  ;;  %v12085_v38 = vpack.c.bf16 %v9450_v37, %v9449_v36  ;;  %v9481_v36 = vld [vmem:[%s14912_s6 + $0x340] sm:$0xff]  ;;  %v9482_v37 = vld [vmem:[%s14912_s6 + $0x348] sm:$0xff] }
0x2f47   : > { %12051 = vmatprep.subr.bf16.mxu1 %v12443_v3 }
0x2f4a   : > { %12053 = vmatpush3.bf16.msra.mxu1 %v12052_v43  ;;  %v12088_v43 = vpack.c.bf16 %v9452_v40, %v9451_v39  ;;  %v9483_v39 = vld [vmem:[%s14912_s6 + $0x350] sm:$0xff]  ;;  %v9484_v40 = vld [vmem:[%s14912_s6 + $0x358] sm:$0xff] }
0x2f4b   : > { %12054 = vmatprep.subr.bf16.mxu1 %v12443_v3 }
0x2f4e   : > { %12056 = vmatpush3.bf16.msra.mxu1 %v12055_v46  ;;  %v12091_v46 = vpack.c.bf16 %v9454_v45, %v9453_v44  ;;  %v9485_v44 = vld [vmem:[%s14912_s6 + $0x360] sm:$0xff]  ;;  %v9486_v45 = vld [vmem:[%s14912_s6 + $0x368] sm:$0xff] }
0x2f4f   : > { %12057 = vmatprep.subr.bf16.mxu1 %v12443_v3 }
0x2f52   : > { %12059 = vmatpush3.bf16.msra.mxu1 %v12058_v49  ;;  %v12094_v49 = vpack.c.bf16 %v9456_v48, %v9455_v47  ;;  %v9487_v47 = vld [vmem:[%s14912_s6 + $0x370] sm:$0xff]  ;;  %v9488_v48 = vld [vmem:[%s14912_s6 + $0x378] sm:$0xff] }
0x2f53   : > { %12072 = vmatprep.subr.bf16.mxu1 %v12443_v3 }
0x2f55   : > { %11171 = vmatmul.mubr.msk.f32.vlgmr.msra.gmra.mrb[72].mxu1 %vm551_vm1, %v13875_v52 }
0x2f56   : > { %12074 = vmatpush3.bf16.msra.mxu1 %v12073_v53  ;;  %11208 = vmatprep.mubr.msk.f32.mxu1 %vm12444_vm0, %v12445_v11  ;;  %v12109_v53 = vpack.c.bf16 %v9468_v51, %v9467_v50  ;;  %v9499_v50 = vld [vmem:[%s14914_s8 + $0x340] sm:$0xff]  ;;  %v9500_v51 = vld [vmem:[%s14914_s8 + $0x348] sm:$0xff] }
0x2f57   : > { %12075 = vmatprep.subr.bf16.mxu1 %v12443_v3 }
0x2f5a   : > { %12077 = vmatpush3.bf16.msra.mxu1 %v12076_v56  ;;  %v12112_v56 = vpack.c.bf16 %v9470_v55, %v9469_v54  ;;  %v9501_v54 = vld [vmem:[%s14914_s8 + $0x350] sm:$0xff]  ;;  %v9502_v55 = vld [vmem:[%s14914_s8 + $0x358] sm:$0xff] }
0x2f5b   : > { %12078 = vmatprep.subr.bf16.mxu1 %v12443_v3 }
0x2f5e   : > { %12080 = vmatpush3.bf16.msra.mxu1 %v12079_v59  ;;  %v12115_v59 = vpack.c.bf16 %v9472_v58, %v9471_v57  ;;  %v9503_v57 = vld [vmem:[%s14914_s8 + $0x360] sm:$0xff]  ;;  %v9504_v58 = vld [vmem:[%s14914_s8 + $0x368] sm:$0xff] }
0x2f5f   : > { %12081 = vmatprep.subr.bf16.mxu1 %v12443_v3 }
0x2f62   : > { %12083 = vmatpush3.bf16.msra.mxu1 %v12082_v62  ;;  %v12118_v62 = vpack.c.bf16 %v9474_v61, %v9473_v60  ;;  %v9505_v60 = vld [vmem:[%s14914_s8 + $0x370] sm:$0xff]  ;;  %v9506_v61 = vld [vmem:[%s14914_s8 + $0x378] sm:$0xff] }
0x2f63   : > { %12096 = vmatprep.subr.bf16.mxu1 %v12443_v3 }
0x2f65   : > { %11209 = vmatmul.mubr.msk.f32.vlgmr.msra.gmra.mrb[74].mxu1 %vm551_vm1, %v13875_v52 }
0x2f66   : > { %12098 = vmatpush3.bf16.msra.mxu1 %v12097_v6  ;;  %11261 = vmatprep.mubr.msk.f32.mxu1 %vm12444_vm0, %v12445_v11  ;;  %v12133_v6 = vpack.c.bf16 %v9491_v5, %v9490_v63  ;;  %v9522_v63 = vld [vmem:[%s14913_s7 + $0x380] sm:$0xff]  ;;  %v9523_v5 = vld [vmem:[%s14913_s7 + $0x388] sm:$0xff] }
0x2f67   : > { %12099 = vmatprep.subr.bf16.mxu1 %v12443_v3 }
0x2f6a   : > { %12101 = vmatpush3.bf16.msra.mxu1 %v12100_v10  ;;  %v12136_v10 = vpack.c.bf16 %v9493_v8, %v9492_v7  ;;  %v9524_v7 = vld [vmem:[%s14913_s7 + $0x390] sm:$0xff]  ;;  %v9525_v8 = vld [vmem:[%s14913_s7 + $0x398] sm:$0xff] }
0x2f6b   : > { %12102 = vmatprep.subr.bf16.mxu1 %v12443_v3 }
0x2f6e   : > { %12104 = vmatpush3.bf16.msra.mxu1 %v12103_v0  ;;  %v12139_v0 = vpack.c.bf16 %v9495_v13, %v9494_v12  ;;  %v9526_v12 = vld [vmem:[%s14913_s7 + $0x3a0] sm:$0xff]  ;;  %v9527_v13 = vld [vmem:[%s14913_s7 + $0x3a8] sm:$0xff] }
0x2f6f   : > { %12105 = vmatprep.subr.bf16.mxu1 %v12443_v3 }
0x2f72   : > { %12107 = vmatpush3.bf16.msra.mxu1 %v12106_v4  ;;  %v12142_v4 = vpack.c.bf16 %v9497_v2, %v9496_v1  ;;  %v9528_v1 = vld [vmem:[%s14913_s7 + $0x3b0] sm:$0xff]  ;;  %v9529_v2 = vld [vmem:[%s14913_s7 + $0x3b8] sm:$0xff] }
0x2f73   : > { %11283 = vmatprep.subr.mxu1 %v12445_v11 }
0x2f75   : > { %11262 = vmatmul.mubr.msk.f32.vlgmr.msra.gmra.mrb[76].mxu1 %vm551_vm1, %v13875_v52 }
0x2f76   : > { %11285 = vmatprep.mubr.msk.f32.mxu1 %vm12444_vm0, %v12445_v11 }
0x3018   : > { %v6367_v15 = vpop.f32.mrb[70].mxu1 }
0x3019   : > { %v14296_v16 = vadd.f32 %v6367_v15, %v14177_v14  ;;  %v11153_v17 = vpop.f32.mrb[71].mxu1 }
0x3028   : > { %v6447_v18 = vpop.f32.mrb[72].mxu1 }
0x3029   : > { %v11172_v20 = vpop.f32.mrb[73].mxu1  ;;  %11214 = vmatmul.mubr.msk.f32.vlgmr.msra.gmra.mrb[74].mxu0 %vm1144_vm4, %v6447_v18 }
0x302a   : > { %11218 = vmatprep.mubr.msk.f32.mxu0 %vm12444_vm0, %v12445_v11 }
0x3038   : > { %v6605_v22 = vpop.f32.mrb[74].mxu1 }
0x3039   : > { %v11210_v23 = vpop.f32.mrb[75].mxu1  ;;  %11217 = vmatpush3.msra.mxu0 %v6605_v22 }
0x303a   : > { %11221 = vmatprep.subr.mxu0 %v12445_v11 }
0x3048   : > { %v7000_v24 = vpop.f32.mrb[76].mxu1 }
0x3049   : > { %v11263_v25 = vpop.f32.mrb[77].mxu1  ;;  %11284 = vmatpush3.xpose.msk.msra.mxu1 %vm1144_vm4, %v7000_v24 }
0x304a   : > { %11288 = vmatprep.subr.mxu1 %v12445_v11 }
0x30fc   : > { %v6681_v14 = vpop.f32.mrb[74].mxu0 }
0x30fd   : > { %v6685_v26 = vmul.f32 0.35355338, %v6681_v14  ;;  %v11215_v27 = vpop.f32.mrb[75].mxu0 }
0x30ff   : > { %v6686_v28 = vsel %vm1144_vm4, %v6685_v26, -inf }
0x3100   : > { %6687 = vmax.xlane.f32.xlu0 %v6686_v28 }
0x318d   : > { %v6688_v29 = vpop.xlane.xlu0 %6687 }
0x318e   : > { %v6689_v30 = vsub.f32 %v6685_v26, %v6688_v29 }
0x3190   : > { %v6690_v31 = vmul.f32 1.442695, %v6689_v30 }
0x3192   : > { %12356 = vpow2.f32 %v6690_v31 }
0x319c   : > { %v12357_v32 = vpop.eup %12356 }
0x319d   : > { %v6692_v19 = vsel %vm1144_vm4, %v12357_v32, 0.0 }
0x319e   : > { %6693 = vadd.xlane.f32.xlu1 %v6692_v19 }
0x322b   : > { %v6694_v21 = vpop.xlane.xlu1 %6693 }
0x322c   : > { %12358 = vrcp.f32 %v6694_v21 }
0x3236   : > { %v12359_v33 = vpop.eup %12358 }
0x3237   : > { %v6696_v34 = vmul.f32 %v12359_v33, %v12357_v32 }
0x3239   : > { %11219 = vmatmul.mubr.msk.f32.vlgmr.msra.gmra.mrb[76].mxu0 %vm1144_vm4, %v6696_v34 }
0x323a   : > { %11222 = vmatpush3.msra.mxu0 %v9447_v35  ;;  %11223 = vmatprep.mubr.msk.f32.mxu0 %vm12444_vm0, %v12445_v11  ;;  %v9479_v35 = vld [vmem:[%s14915_s9 + $0x60] sm:$0xff] }
0x323b   : > { %12084 = vmatprep.subr.bf16.mxu0 %v12443_v3 }
0x330c   : > { %v6766_v41 = vpop.f32.mrb[76].mxu0 }
0x330d   : > { %v11220_v42 = vpop.f32.mrb[77].mxu0  ;;  %11224 = vmatmul.mubr.msk.f32.vlgmr.msra.gmra.mrb[78].mxu0 %vm1144_vm4, %v6766_v41 }
0x330e   : > { %12086 = vmatpush3.bf16.msra.mxu0 %v12085_v38  ;;  %11242 = vmatprep.mubr.msk.f32.mxu0 %vm12444_vm0, %v12445_v11  ;;  %v12121_v38 = vpack.c.bf16 %v9482_v37, %v9481_v36  ;;  %v9513_v36 = vld [vmem:[%s14912_s6 + $0x380] sm:$0xff]  ;;  %v9514_v37 = vld [vmem:[%s14912_s6 + $0x388] sm:$0xff] }
0x330f   : > { %12087 = vmatprep.subr.bf16.mxu0 %v12443_v3 }
0x3312   : > { %12089 = vmatpush3.bf16.msra.mxu0 %v12088_v43  ;;  %v12124_v43 = vpack.c.bf16 %v9484_v40, %v9483_v39  ;;  %v9515_v39 = vld [vmem:[%s14912_s6 + $0x390] sm:$0xff]  ;;  %v9516_v40 = vld [vmem:[%s14912_s6 + $0x398] sm:$0xff] }
0x3313   : > { %12090 = vmatprep.subr.bf16.mxu0 %v12443_v3 }
0x3316   : > { %12092 = vmatpush3.bf16.msra.mxu0 %v12091_v46  ;;  %v12127_v46 = vpack.c.bf16 %v9486_v45, %v9485_v44  ;;  %v9517_v44 = vld [vmem:[%s14912_s6 + $0x3a0] sm:$0xff]  ;;  %v9518_v45 = vld [vmem:[%s14912_s6 + $0x3a8] sm:$0xff] }
0x3317   : > { %12093 = vmatprep.subr.bf16.mxu0 %v12443_v3 }
0x331a   : > { %12095 = vmatpush3.bf16.msra.mxu0 %v12094_v49  ;;  %v12130_v49 = vpack.c.bf16 %v9488_v48, %v9487_v47  ;;  %v9519_v47 = vld [vmem:[%s14912_s6 + $0x3b0] sm:$0xff]  ;;  %v9520_v48 = vld [vmem:[%s14912_s6 + $0x3b8] sm:$0xff] }
0x331b   : > { %12108 = vmatprep.subr.bf16.mxu0 %v12443_v3 }
0x331d   : > { %11243 = vmatmul.mubr.msk.f32.vlgmr.msra.gmra.mrb[80].mxu0 %vm551_vm1, %v13875_v52 }
0x331e   : > { %12110 = vmatpush3.bf16.msra.mxu0 %v12109_v53  ;;  %11280 = vmatprep.mubr.msk.f32.mxu0 %vm12444_vm0, %v12445_v11  ;;  %v12145_v53 = vpack.c.bf16 %v9500_v51, %v9499_v50  ;;  %v9531_v50 = vld [vmem:[%s14914_s8 + $0x380] sm:$0xff]  ;;  %v9532_v51 = vld [vmem:[%s14914_s8 + $0x388] sm:$0xff] }
0x331f   : > { %12111 = vmatprep.subr.bf16.mxu0 %v12443_v3 }
0x3322   : > { %12113 = vmatpush3.bf16.msra.mxu0 %v12112_v56  ;;  %v12148_v56 = vpack.c.bf16 %v9502_v55, %v9501_v54  ;;  %v9533_v54 = vld [vmem:[%s14914_s8 + $0x390] sm:$0xff]  ;;  %v9534_v55 = vld [vmem:[%s14914_s8 + $0x398] sm:$0xff] }
0x3323   : > { %12114 = vmatprep.subr.bf16.mxu0 %v12443_v3 }
0x3326   : > { %12116 = vmatpush3.bf16.msra.mxu0 %v12115_v59  ;;  %v12151_v59 = vpack.c.bf16 %v9504_v58, %v9503_v57  ;;  %v9535_v57 = vld [vmem:[%s14914_s8 + $0x3a0] sm:$0xff]  ;;  %v9536_v58 = vld [vmem:[%s14914_s8 + $0x3a8] sm:$0xff] }
0x3327   : > { %12117 = vmatprep.subr.bf16.mxu0 %v12443_v3 }
0x332a   : > { %12119 = vmatpush3.bf16.msra.mxu0 %v12118_v62  ;;  %v12154_v62 = vpack.c.bf16 %v9506_v61, %v9505_v60  ;;  %v9537_v60 = vld [vmem:[%s14914_s8 + $0x3b0] sm:$0xff]  ;;  %v9538_v61 = vld [vmem:[%s14914_s8 + $0x3b8] sm:$0xff] }
0x332b   : > { %12132 = vmatprep.subr.bf16.mxu0 %v12443_v3 }
0x332d   : > { %11281 = vmatmul.mubr.msk.f32.vlgmr.msra.gmra.mrb[82].mxu0 %vm551_vm1, %v13875_v52 }
0x332e   : > { %12134 = vmatpush3.bf16.msra.mxu0 %v12133_v6  ;;  %11333 = vmatprep.mubr.msk.f32.mxu0 %vm12444_vm0, %v12445_v11  ;;  %v12169_v6 = vpack.c.bf16 %v9523_v5, %v9522_v63  ;;  %v9554_v63 = vld [vmem:[%s14913_s7 + $0x3c0] sm:$0xff]  ;;  %v9555_v5 = vld [vmem:[%s14913_s7 + $0x3c8] sm:$0xff] }
0x332f   : > { %12135 = vmatprep.subr.bf16.mxu0 %v12443_v3 }
0x3332   : > { %12137 = vmatpush3.bf16.msra.mxu0 %v12136_v10  ;;  %v12172_v10 = vpack.c.bf16 %v9525_v8, %v9524_v7  ;;  %v9556_v7 = vld [vmem:[%s14913_s7 + $0x3d0] sm:$0xff]  ;;  %v9557_v8 = vld [vmem:[%s14913_s7 + $0x3d8] sm:$0xff] }
0x3333   : > { %12138 = vmatprep.subr.bf16.mxu0 %v12443_v3 }
0x3336   : > { %12140 = vmatpush3.bf16.msra.mxu0 %v12139_v0  ;;  %v12175_v0 = vpack.c.bf16 %v9527_v13, %v9526_v12  ;;  %v9558_v12 = vld [vmem:[%s14913_s7 + $0x3e0] sm:$0xff]  ;;  %v9559_v13 = vld [vmem:[%s14913_s7 + $0x3e8] sm:$0xff] }
0x3337   : > { %12141 = vmatprep.subr.bf16.mxu0 %v12443_v3 }
0x333a   : > { %12143 = vmatpush3.bf16.msra.mxu0 %v12142_v4  ;;  %v12178_v4 = vpack.c.bf16 %v9529_v2, %v9528_v1  ;;  %v9560_v1 = vld [vmem:[%s14913_s7 + $0x3f0] sm:$0xff]  ;;  %v9561_v2 = vld [vmem:[%s14913_s7 + $0x3f8] sm:$0xff] }
0x333b   : > { %11355 = vmatprep.subr.mxu0 %v12445_v11 }
0x333d   : > { %11334 = vmatmul.mubr.msk.f32.vlgmr.msra.gmra.mrb[84].mxu0 %vm551_vm1, %v13875_v52 }
0x333e   : > { %11357 = vmatprep.mubr.msk.f32.mxu0 %vm12444_vm0, %v12445_v11 }
0x33e0   : > { %v6841_v15 = vpop.f32.mrb[78].mxu0 }
0x33e1   : > { %v14413_v17 = vadd.f32 %v6841_v15, %v14296_v16  ;;  %v11225_v18 = vpop.f32.mrb[79].mxu0 }
0x33f0   : > { %v6921_v20 = vpop.f32.mrb[80].mxu0 }
0x33f1   : > { %v11244_v22 = vpop.f32.mrb[81].mxu0  ;;  %11286 = vmatmul.mubr.msk.f32.vlgmr.msra.gmra.mrb[78].mxu1 %vm1144_vm4, %v6921_v20 }
0x33f2   : > { %11290 = vmatprep.mubr.msk.f32.mxu1 %vm12444_vm0, %v12445_v11 }
0x3400   : > { %v7079_v23 = vpop.f32.mrb[82].mxu0 }
0x3401   : > { %v11282_v24 = vpop.f32.mrb[83].mxu0  ;;  %11289 = vmatpush3.msra.mxu1 %v7079_v23 }
0x3402   : > { %11293 = vmatprep.subr.mxu1 %v12445_v11 }
0x3410   : > { %v7474_v25 = vpop.f32.mrb[84].mxu0 }
0x3411   : > { %v11335_v14 = vpop.f32.mrb[85].mxu0  ;;  %11356 = vmatpush3.xpose.msk.msra.mxu0 %vm1144_vm4, %v7474_v25 }
0x3412   : > { %11360 = vmatprep.subr.mxu0 %v12445_v11 }
0x34c4   : > { %v7155_v16 = vpop.f32.mrb[78].mxu1 }
0x34c5   : > { %v7159_v26 = vmul.f32 0.35355338, %v7155_v16  ;;  %v11287_v27 = vpop.f32.mrb[79].mxu1 }
0x34c7   : > { %v7160_v28 = vsel %vm1144_vm4, %v7159_v26, -inf }
0x34c8   : > { %7161 = vmax.xlane.f32.xlu0 %v7160_v28 }
0x3555   : > { %v7162_v29 = vpop.xlane.xlu0 %7161 }
0x3556   : > { %v7163_v30 = vsub.f32 %v7159_v26, %v7162_v29 }
0x3558   : > { %v7164_v31 = vmul.f32 1.442695, %v7163_v30 }
0x355a   : > { %12360 = vpow2.f32 %v7164_v31 }
0x3564   : > { %v12361_v32 = vpop.eup %12360 }
0x3565   : > { %v7166_v19 = vsel %vm1144_vm4, %v12361_v32, 0.0 }
0x3566   : > { %7167 = vadd.xlane.f32.xlu1 %v7166_v19 }
0x35f3   : > { %v7168_v21 = vpop.xlane.xlu1 %7167 }
0x35f4   : > { %12362 = vrcp.f32 %v7168_v21 }
0x35fe   : > { %v12363_v33 = vpop.eup %12362 }
0x35ff   : > { %v7170_v34 = vmul.f32 %v12363_v33, %v12361_v32 }
0x3601   : > { %11291 = vmatmul.mubr.msk.f32.vlgmr.msra.gmra.mrb[80].mxu1 %vm1144_vm4, %v7170_v34 }
0x3602   : > { %11294 = vmatpush3.msra.mxu1 %v9479_v35  ;;  %11295 = vmatprep.mubr.msk.f32.mxu1 %vm12444_vm0, %v12445_v11  ;;  %v9511_v35 = vld [vmem:[%s14915_s9 + $0x68] sm:$0xff] }
0x3603   : > { %12120 = vmatprep.subr.bf16.mxu1 %v12443_v3 }
0x36d4   : > { %v7240_v41 = vpop.f32.mrb[80].mxu1 }
0x36d5   : > { %v11292_v42 = vpop.f32.mrb[81].mxu1  ;;  %11296 = vmatmul.mubr.msk.f32.vlgmr.msra.gmra.mrb[82].mxu1 %vm1144_vm4, %v7240_v41 }
0x36d6   : > { %12122 = vmatpush3.bf16.msra.mxu1 %v12121_v38  ;;  %11314 = vmatprep.mubr.msk.f32.mxu1 %vm12444_vm0, %v12445_v11  ;;  %v12157_v38 = vpack.c.bf16 %v9514_v37, %v9513_v36  ;;  %v9545_v36 = vld [vmem:[%s14912_s6 + $0x3c0] sm:$0xff]  ;;  %v9546_v37 = vld [vmem:[%s14912_s6 + $0x3c8] sm:$0xff] }
0x36d7   : > { %12123 = vmatprep.subr.bf16.mxu1 %v12443_v3 }
0x36da   : > { %12125 = vmatpush3.bf16.msra.mxu1 %v12124_v43  ;;  %v12160_v43 = vpack.c.bf16 %v9516_v40, %v9515_v39  ;;  %v9547_v39 = vld [vmem:[%s14912_s6 + $0x3d0] sm:$0xff]  ;;  %v9548_v40 = vld [vmem:[%s14912_s6 + $0x3d8] sm:$0xff] }
0x36db   : > { %12126 = vmatprep.subr.bf16.mxu1 %v12443_v3 }
0x36de   : > { %12128 = vmatpush3.bf16.msra.mxu1 %v12127_v46  ;;  %v12163_v46 = vpack.c.bf16 %v9518_v45, %v9517_v44  ;;  %v9549_v44 = vld [vmem:[%s14912_s6 + $0x3e0] sm:$0xff]  ;;  %v9550_v45 = vld [vmem:[%s14912_s6 + $0x3e8] sm:$0xff] }
0x36df   : > { %12129 = vmatprep.subr.bf16.mxu1 %v12443_v3 }
0x36e2   : > { %12131 = vmatpush3.bf16.msra.mxu1 %v12130_v49  ;;  %v12166_v49 = vpack.c.bf16 %v9520_v48, %v9519_v47  ;;  %v9551_v47 = vld [vmem:[%s14912_s6 + $0x3f0] sm:$0xff]  ;;  %v9552_v48 = vld [vmem:[%s14912_s6 + $0x3f8] sm:$0xff] }
0x36e3   : > { %12144 = vmatprep.subr.bf16.mxu1 %v12443_v3 }
0x36e5   : > { %11315 = vmatmul.mubr.msk.f32.vlgmr.msra.gmra.mrb[84].mxu1 %vm551_vm1, %v13875_v52 }
0x36e6   : > { %12146 = vmatpush3.bf16.msra.mxu1 %v12145_v53  ;;  %11352 = vmatprep.mubr.msk.f32.mxu1 %vm12444_vm0, %v12445_v11  ;;  %v12181_v53 = vpack.c.bf16 %v9532_v51, %v9531_v50  ;;  %v9563_v50 = vld [vmem:[%s14914_s8 + $0x3c0] sm:$0xff]  ;;  %v9564_v51 = vld [vmem:[%s14914_s8 + $0x3c8] sm:$0xff] }
0x36e7   : > { %12147 = vmatprep.subr.bf16.mxu1 %v12443_v3 }
0x36ea   : > { %12149 = vmatpush3.bf16.msra.mxu1 %v12148_v56  ;;  %v12184_v56 = vpack.c.bf16 %v9534_v55, %v9533_v54  ;;  %v9565_v54 = vld [vmem:[%s14914_s8 + $0x3d0] sm:$0xff]  ;;  %v9566_v55 = vld [vmem:[%s14914_s8 + $0x3d8] sm:$0xff] }
0x36eb   : > { %12150 = vmatprep.subr.bf16.mxu1 %v12443_v3 }
0x36ee   : > { %12152 = vmatpush3.bf16.msra.mxu1 %v12151_v59  ;;  %v12187_v59 = vpack.c.bf16 %v9536_v58, %v9535_v57  ;;  %v9567_v57 = vld [vmem:[%s14914_s8 + $0x3e0] sm:$0xff]  ;;  %v9568_v58 = vld [vmem:[%s14914_s8 + $0x3e8] sm:$0xff] }
0x36ef   : > { %12153 = vmatprep.subr.bf16.mxu1 %v12443_v3 }
0x36f2   : > { %12155 = vmatpush3.bf16.msra.mxu1 %v12154_v62  ;;  %v12190_v62 = vpack.c.bf16 %v9538_v61, %v9537_v60  ;;  %v9569_v60 = vld [vmem:[%s14914_s8 + $0x3f0] sm:$0xff]  ;;  %v9570_v61 = vld [vmem:[%s14914_s8 + $0x3f8] sm:$0xff] }
0x36f3   : > { %12168 = vmatprep.subr.bf16.mxu1 %v12443_v3 }
0x36f5   : > { %11353 = vmatmul.mubr.msk.f32.vlgmr.msra.gmra.mrb[86].mxu1 %vm551_vm1, %v13875_v52 }
0x36f6   : > { %12170 = vmatpush3.bf16.msra.mxu1 %v12169_v6  ;;  %11405 = vmatprep.mubr.msk.f32.mxu1 %vm12444_vm0, %v12445_v11  ;;  %v12205_v6 = vpack.c.bf16 %v9555_v5, %v9554_v63 }
0x36f7   : > { %12171 = vmatprep.subr.bf16.mxu1 %v12443_v3 }
0x36fa   : > { %12173 = vmatpush3.bf16.msra.mxu1 %v12172_v10  ;;  %v12208_v10 = vpack.c.bf16 %v9557_v8, %v9556_v7 }
0x36fb   : > { %12174 = vmatprep.subr.bf16.mxu1 %v12443_v3 }
0x36fe   : > { %12176 = vmatpush3.bf16.msra.mxu1 %v12175_v0  ;;  %v12211_v0 = vpack.c.bf16 %v9559_v13, %v9558_v12 }
0x36ff   : > { %12177 = vmatprep.subr.bf16.mxu1 %v12443_v3 }
0x3702   : > { %12179 = vmatpush3.bf16.msra.mxu1 %v12178_v4  ;;  %v12214_v4 = vpack.c.bf16 %v9561_v2, %v9560_v1 }
0x3703   : > { %11427 = vmatprep.subr.mxu1 %v12445_v11 }
0x3705   : > { %11406 = vmatmul.mubr.msk.f32.vlgmr.msra.gmra.mrb[88].mxu1 %vm551_vm1, %v13875_v52 }
0x3706   : > { %11429 = vmatprep.mubr.msk.f32.mxu1 %vm12444_vm0, %v12445_v11 }
0x37a8   : > { %v7315_v15 = vpop.f32.mrb[82].mxu1 }
0x37a9   : > { %v14530_v18 = vadd.f32 %v7315_v15, %v14413_v17  ;;  %v11297_v20 = vpop.f32.mrb[83].mxu1 }
0x37b8   : > { %v7395_v22 = vpop.f32.mrb[84].mxu1 }
0x37b9   : > { %v11316_v23 = vpop.f32.mrb[85].mxu1  ;;  %11358 = vmatmul.mubr.msk.f32.vlgmr.msra.gmra.mrb[86].mxu0 %vm1144_vm4, %v7395_v22 }
0x37ba   : > { %11362 = vmatprep.mubr.msk.f32.mxu0 %vm12444_vm0, %v12445_v11 }
0x37c8   : > { %v7553_v24 = vpop.f32.mrb[86].mxu1 }
0x37c9   : > { %v11354_v25 = vpop.f32.mrb[87].mxu1  ;;  %11361 = vmatpush3.msra.mxu0 %v7553_v24 }
0x37ca   : > { %11365 = vmatprep.subr.mxu0 %v12445_v11 }
0x37d8   : > { %v7948_v14 = vpop.f32.mrb[88].mxu1 }
0x37d9   : > { %v11407_v16 = vpop.f32.mrb[89].mxu1  ;;  %11428 = vmatpush3.xpose.msk.msra.mxu1 %vm1144_vm4, %v7948_v14 }
0x37da   : > { %11432 = vmatprep.subr.mxu1 %v12445_v11 }
0x388c   : > { %v7629_v17 = vpop.f32.mrb[86].mxu0 }
0x388d   : > { %v7633_v26 = vmul.f32 0.35355338, %v7629_v17  ;;  %v11359_v27 = vpop.f32.mrb[87].mxu0 }
0x388f   : > { %v7634_v28 = vsel %vm1144_vm4, %v7633_v26, -inf }
0x3890   : > { %7635 = vmax.xlane.f32.xlu0 %v7634_v28 }
0x391d   : > { %v7636_v29 = vpop.xlane.xlu0 %7635 }
0x391e   : > { %v7637_v30 = vsub.f32 %v7633_v26, %v7636_v29 }
0x3920   : > { %v7638_v31 = vmul.f32 1.442695, %v7637_v30 }
0x3922   : > { %12364 = vpow2.f32 %v7638_v31 }
0x392c   : > { %v12365_v32 = vpop.eup %12364 }
0x392d   : > { %v7640_v19 = vsel %vm1144_vm4, %v12365_v32, 0.0 }
0x392e   : > { %7641 = vadd.xlane.f32.xlu1 %v7640_v19 }
0x39bb   : > { %v7642_v21 = vpop.xlane.xlu1 %7641 }
0x39bc   : > { %12366 = vrcp.f32 %v7642_v21 }
0x39c6   : > { %v12367_v33 = vpop.eup %12366 }
0x39c7   : > { %v7644_v34 = vmul.f32 %v12367_v33, %v12365_v32 }
0x39c9   : > { %11363 = vmatmul.mubr.msk.f32.vlgmr.msra.gmra.mrb[88].mxu0 %vm1144_vm4, %v7644_v34 }
0x39ca   : > { %11366 = vmatpush3.msra.mxu0 %v9511_v35  ;;  %11367 = vmatprep.mubr.msk.f32.mxu0 %vm12444_vm0, %v12445_v11  ;;  %v9543_v35 = vld [vmem:[%s14915_s9 + $0x70] sm:$0xff] }
0x39cb   : > { %12156 = vmatprep.subr.bf16.mxu0 %v12443_v3 }
0x3a9c   : > { %v7714_v41 = vpop.f32.mrb[88].mxu0 }
0x3a9d   : > { %v11364_v42 = vpop.f32.mrb[89].mxu0  ;;  %11368 = vmatmul.mubr.msk.f32.vlgmr.msra.gmra.mrb[90].mxu0 %vm1144_vm4, %v7714_v41 }
0x3a9e   : > { %12158 = vmatpush3.bf16.msra.mxu0 %v12157_v38  ;;  %11386 = vmatprep.mubr.msk.f32.mxu0 %vm12444_vm0, %v12445_v11  ;;  %v12193_v38 = vpack.c.bf16 %v9546_v37, %v9545_v36  ;;  %v9585_v36 = vld [vmem:[%s14919_s13 + $0x50] sm:$0xff]  ;;  %v9586_v37 = vld [vmem:[%s14919_s13 + $0x58] sm:$0xff] }
0x3a9f   : > { %12159 = vmatprep.subr.bf16.mxu0 %v12443_v3 }
0x3aa2   : > { %12161 = vmatpush3.bf16.msra.mxu0 %v12160_v43  ;;  %v12196_v43 = vpack.c.bf16 %v9548_v40, %v9547_v39  ;;  %v9587_v39 = vld [vmem:[%s14919_s13 + $0x60] sm:$0xff]  ;;  %v9588_v40 = vld [vmem:[%s14919_s13 + $0x68] sm:$0xff] }
0x3aa3   : > { %12162 = vmatprep.subr.bf16.mxu0 %v12443_v3 }
0x3aa6   : > { %12164 = vmatpush3.bf16.msra.mxu0 %v12163_v46  ;;  %v12199_v46 = vpack.c.bf16 %v9550_v45, %v9549_v44  ;;  %v9594_v45 = vld [vmem:[%s14921_s15 + $0x80] sm:$0xff] }
0x3aa7   : > { %12165 = vmatprep.subr.bf16.mxu0 %v12443_v3 }
0x3aaa   : > { %12167 = vmatpush3.bf16.msra.mxu0 %v12166_v49  ;;  %v12202_v49 = vpack.c.bf16 %v9552_v48, %v9551_v47  ;;  %v9596_v47 = vld [vmem:[%s14921_s15 + $0x90] sm:$0xff] }
0x3aab   : > { %12180 = vmatprep.subr.bf16.mxu0 %v12443_v3 }
0x3aad   : > { %11387 = vmatmul.mubr.msk.f32.vlgmr.msra.gmra.mrb[92].mxu0 %vm551_vm1, %v13875_v52 }
0x3aae   : > { %12182 = vmatpush3.bf16.msra.mxu0 %v12181_v53  ;;  %11424 = vmatprep.mubr.msk.f32.mxu0 %vm12444_vm0, %v12445_v11  ;;  %v12217_v53 = vpack.c.bf16 %v9564_v51, %v9563_v50  ;;  %v9598_v51 = vld [vmem:[%s14921_s15 + $0xa0] sm:$0xff] }
0x3aaf   : > { %12183 = vmatprep.subr.bf16.mxu0 %v12443_v3 }
0x3ab2   : > { %12185 = vmatpush3.bf16.msra.mxu0 %v12184_v56  ;;  %v12220_v56 = vpack.c.bf16 %v9566_v55, %v9565_v54  ;;  %v9600_v55 = vld [vmem:[%s14921_s15 + $0xb0] sm:$0xff] }
0x3ab3   : > { %12186 = vmatprep.subr.bf16.mxu0 %v12443_v3 }
0x3ab6   : > { %12188 = vmatpush3.bf16.msra.mxu0 %v12187_v59  ;;  %v12223_v59 = vpack.c.bf16 %v9568_v58, %v9567_v57  ;;  %v9602_v58 = vld [vmem:[%s14921_s15 + $0xc0] sm:$0xff] }
0x3ab7   : > { %12189 = vmatprep.subr.bf16.mxu0 %v12443_v3 }
0x3aba   : > { %12191 = vmatpush3.bf16.msra.mxu0 %v12190_v62  ;;  %v12226_v62 = vpack.c.bf16 %v9570_v61, %v9569_v60  ;;  %v9604_v61 = vld [vmem:[%s14921_s15 + $0xd0] sm:$0xff] }
0x3abb   : > { %12204 = vmatprep.subr.bf16.mxu0 %v12443_v3 }
0x3abd   : > { %11425 = vmatmul.mubr.msk.f32.vlgmr.msra.gmra.mrb[94].mxu0 %vm551_vm1, %v13875_v52 }
0x3abe   : > { %12206 = vmatpush3.bf16.msra.mxu0 %v12205_v6  ;;  %11477 = vmatprep.mubr.msk.f32.mxu0 %vm12444_vm0, %v12445_v11 }
0x3abf   : > { %12207 = vmatprep.subr.bf16.mxu0 %v12443_v3 }
0x3ac2   : > { %12209 = vmatpush3.bf16.msra.mxu0 %v12208_v10 }
0x3ac3   : > { %12210 = vmatprep.subr.bf16.mxu0 %v12443_v3 }
0x3ac6   : > { %12212 = vmatpush3.bf16.msra.mxu0 %v12211_v0 }
0x3ac7   : > { %12213 = vmatprep.subr.bf16.mxu0 %v12443_v3 }
0x3aca   : > { %12215 = vmatpush3.bf16.msra.mxu0 %v12214_v4 }
0x3acb   : > { %11499 = vmatprep.subr.mxu0 %v12445_v11 }
0x3acd   : > { %11478 = vmatmul.mubr.msk.f32.vlgmr.msra.gmra.mrb[96].mxu0 %vm551_vm1, %v13875_v52 }
0x3ace   : > { %11501 = vmatprep.mubr.msk.f32.mxu0 %vm12444_vm0, %v12445_v11 }
0x3b70   : > { %v7789_v15 = vpop.f32.mrb[90].mxu0 }
0x3b71   : > { %v14647_v20 = vadd.f32 %v7789_v15, %v14530_v18  ;;  %v11369_v22 = vpop.f32.mrb[91].mxu0 }
0x3b80   : > { %v7869_v23 = vpop.f32.mrb[92].mxu0 }
0x3b81   : > { %v11388_v24 = vpop.f32.mrb[93].mxu0  ;;  %11430 = vmatmul.mubr.msk.f32.vlgmr.msra.gmra.mrb[90].mxu1 %vm1144_vm4, %v7869_v23 }
0x3b82   : > { %11434 = vmatprep.mubr.msk.f32.mxu1 %vm12444_vm0, %v12445_v11 }
0x3b90   : > { %v8027_v25 = vpop.f32.mrb[94].mxu0 }
0x3b91   : > { %v11426_v14 = vpop.f32.mrb[95].mxu0  ;;  %11433 = vmatpush3.msra.mxu1 %v8027_v25 }
0x3b92   : > { %11437 = vmatprep.subr.mxu1 %v12445_v11  ;;  %v9575_v14 = vld [vmem:[%s14915_s9 + $0x78] sm:$0xff] }
0x3ba0   : > { %v8422_v16 = vpop.f32.mrb[96].mxu0 }
0x3ba1   : > { %v11479_v17 = vpop.f32.mrb[97].mxu0  ;;  %11500 = vmatpush3.xpose.msk.msra.mxu0 %vm1144_vm4, %v8422_v16 }
0x3ba2   : > { %11504 = vmatprep.subr.mxu0 %v12445_v11 }
0x3c54   : > { %v8103_v18 = vpop.f32.mrb[90].mxu1 }
0x3c55   : > { %v8107_v26 = vmul.f32 0.35355338, %v8103_v18  ;;  %v11431_v27 = vpop.f32.mrb[91].mxu1 }
0x3c57   : > { %v8108_v28 = vsel %vm1144_vm4, %v8107_v26, -inf }
0x3c58   : > { %8109 = vmax.xlane.f32.xlu0 %v8108_v28  ;;  %v9578_v28 = vld [vmem:[%s14916_s10 + $0x1] ss:$0 sm:$0xff] }
0x3ce5   : > { %v8110_v29 = vpop.xlane.xlu0 %8109 }
0x3ce6   : > { %v8111_v30 = vsub.f32 %v8107_v26, %v8110_v29 }
0x3ce8   : > { %v8112_v31 = vmul.f32 1.442695, %v8111_v30 }
0x3cea   : > { %12368 = vpow2.f32 %v8112_v31 }
0x3cf4   : > { %v12369_v32 = vpop.eup %12368 }
0x3cf5   : > { %v8114_v19 = vsel %vm1144_vm4, %v12369_v32, 0.0 }
0x3cf6   : > { %8115 = vadd.xlane.f32.xlu1 %v8114_v19 }
0x3d83   : > { %v8116_v21 = vpop.xlane.xlu1 %8115 }
0x3d84   : > { %12370 = vrcp.f32 %v8116_v21 }
0x3d8e   : > { %v12371_v33 = vpop.eup %12370 }
0x3d8f   : > { %v8118_v34 = vmul.f32 %v12371_v33, %v12369_v32 }
0x3d91   : > { %11435 = vmatmul.mubr.msk.f32.vlgmr.msra.gmra.mrb[92].mxu1 %vm1144_vm4, %v8118_v34  ;;  %v9584_v34 = vld [vmem:[%s14919_s13 + $0x48] sm:$0xff] }
0x3d92   : > { %11438 = vmatpush3.msra.mxu1 %v9543_v35  ;;  %11439 = vmatprep.mubr.msk.f32.mxu1 %vm12444_vm0, %v12445_v11 }
0x3d93   : > { %12192 = vmatprep.subr.bf16.mxu1 %v12443_v3 }
0x3e64   : > { %v8188_v41 = vpop.f32.mrb[92].mxu1 }
0x3e65   : > { %v11436_v42 = vpop.f32.mrb[93].mxu1  ;;  %11440 = vmatmul.mubr.msk.f32.vlgmr.msra.gmra.mrb[94].mxu1 %vm1144_vm4, %v8188_v41  ;;  %v12235_v41 = vpack.c.bf16 %v9588_v40, %v9587_v39 }
0x3e66   : > { %12194 = vmatpush3.bf16.msra.mxu1 %v12193_v38  ;;  %11458 = vmatprep.mubr.msk.f32.mxu1 %vm12444_vm0, %v12445_v11  ;;  %v12232_v38 = vpack.c.bf16 %v9586_v37, %v9585_v36  ;;  %v9589_v42 = vld [vmem:[%s14919_s13 + $0x70] sm:$0xff] }
0x3e67   : > { %12195 = vmatprep.subr.bf16.mxu1 %v12443_v3 }
0x3e6a   : > { %12197 = vmatpush3.bf16.msra.mxu1 %v12196_v43  ;;  %v9590_v43 = vld [vmem:[%s14919_s13 + $0x78] sm:$0xff] }
0x3e6b   : > { %12198 = vmatprep.subr.bf16.mxu1 %v12443_v3  ;;  %v12238_v44 = vpack.c.bf16 %v9590_v43, %v9589_v42 }
0x3e6e   : > { %12200 = vmatpush3.bf16.msra.mxu1 %v12199_v46  ;;  %v9595_v46 = vld [vmem:[%s14921_s15 + $0x88] sm:$0xff] }
0x3e6f   : > { %12201 = vmatprep.subr.bf16.mxu1 %v12443_v3  ;;  %v12241_v48 = vpack.c.bf16 %v9595_v46, %v9594_v45 }
0x3e72   : > { %12203 = vmatpush3.bf16.msra.mxu1 %v12202_v49  ;;  %v9597_v49 = vld [vmem:[%s14921_s15 + $0x98] sm:$0xff] }
0x3e73   : > { %12216 = vmatprep.subr.bf16.mxu1 %v12443_v3  ;;  %v12244_v50 = vpack.c.bf16 %v9597_v49, %v9596_v47 }
0x3e75   : > { %11459 = vmatmul.mubr.msk.f32.vlgmr.msra.gmra.mrb[96].mxu1 %vm551_vm1, %v13875_v52 }
0x3e76   : > { %12218 = vmatpush3.bf16.msra.mxu1 %v12217_v53  ;;  %11496 = vmatprep.mubr.msk.f32.mxu1 %vm12444_vm0, %v12445_v11  ;;  %v9599_v53 = vld [vmem:[%s14921_s15 + $0xa8] sm:$0xff] }
0x3e77   : > { %12219 = vmatprep.subr.bf16.mxu1 %v12443_v3  ;;  %v12247_v54 = vpack.c.bf16 %v9599_v53, %v9598_v51 }
0x3e7a   : > { %12221 = vmatpush3.bf16.msra.mxu1 %v12220_v56  ;;  %v9601_v56 = vld [vmem:[%s14921_s15 + $0xb8] sm:$0xff] }
0x3e7b   : > { %12222 = vmatprep.subr.bf16.mxu1 %v12443_v3  ;;  %v12250_v57 = vpack.c.bf16 %v9601_v56, %v9600_v55 }
0x3e7e   : > { %12224 = vmatpush3.bf16.msra.mxu1 %v12223_v59  ;;  %v9603_v59 = vld [vmem:[%s14921_s15 + $0xc8] sm:$0xff] }
0x3e7f   : > { %12225 = vmatprep.subr.bf16.mxu1 %v12443_v3  ;;  %v12253_v60 = vpack.c.bf16 %v9603_v59, %v9602_v58 }
0x3e82   : > { %12227 = vmatpush3.bf16.msra.mxu1 %v12226_v62  ;;  %v9605_v62 = vld [vmem:[%s14921_s15 + $0xd8] sm:$0xff] }
0x3e83   : > { %12240 = vmatprep.subr.bf16.mxu1 %v12443_v3 }
0x3e85   : > { %11497 = vmatmul.mubr.msk.f32.vlgmr.msra.gmra.mrb[98].mxu1 %vm551_vm1, %v13875_v52 }
0x3e86   : > { %11565 = vmatprep.mubr.msk.f32.mxu1 %vm12444_vm0, %v12445_v11  ;;  %12242 = vmatpush3.bf16.msra.mxu1 %v12241_v48 }
0x3e87   : > { %12243 = vmatprep.subr.bf16.mxu1 %v12443_v3 }
0x3e8a   : > { %12245 = vmatpush3.bf16.msra.mxu1 %v12244_v50 }
0x3e8b   : > { %12246 = vmatprep.subr.bf16.mxu1 %v12443_v3 }
0x3e8e   : > { %12248 = vmatpush3.bf16.msra.mxu1 %v12247_v54 }
0x3e8f   : > { %12249 = vmatprep.subr.bf16.mxu1 %v12443_v3 }
0x3e92   : > { %12251 = vmatpush3.bf16.msra.mxu1 %v12250_v57 }
0x3e93   : > { %12252 = vmatprep.subr.bf16.mxu1 %v12443_v3 }
0x3e96   : > { %12254 = vmatpush3.bf16.msra.mxu1 %v12253_v60 }
0x3e97   : > { %12255 = vmatprep.subr.bf16.mxu1 %v12443_v3 }
0x3f38   : > { %v8263_v63 = vpop.f32.mrb[94].mxu1 }
0x3f39   : > { %v8267_v5 = vadd.f32 %v8263_v63, %v14647_v20  ;;  %v11441_v6 = vpop.f32.mrb[95].mxu1  ;;  %v12256_v63 = vpack.c.bf16 %v9605_v62, %v9604_v61 }
0x3f3a   : > { %v9607_v6 = vld [vmem:[%s14921_s15 + $0xe8] sm:$0xff] }
0x3f3b   : > { %12257 = vmatpush3.bf16.msra.mxu1 %v12256_v63 }
0x3f3c   : > { %12258 = vmatprep.subr.bf16.mxu1 %v12443_v3 }
0x3f48   : > { %v8343_v7 = vpop.f32.mrb[96].mxu1 }
0x3f49   : > { %v11460_v8 = vpop.f32.mrb[97].mxu1  ;;  %11502 = vmatmul.mubr.msk.f32.vlgmr.msra.gmra.mrb[98].mxu0 %vm1144_vm4, %v8343_v7 }
0x3f4a   : > { %11506 = vmatprep.mubr.msk.f32.mxu0 %vm12444_vm0, %v12445_v11 }
0x3f58   : > { %v8501_v10 = vpop.f32.mrb[98].mxu1 }
0x3f59   : > { %v11498_v12 = vpop.f32.mrb[99].mxu1  ;;  %11505 = vmatpush3.msra.mxu0 %v8501_v10 }
0x3f5a   : > { %11509 = vmatprep.subr.mxu0 %v12445_v11 }
0x401c   : > { %v8577_v52 = vpop.f32.mrb[98].mxu0 }
0x401d   : > { %v8581_v13 = vmul.f32 0.35355338, %v8577_v52  ;;  %v11503_v0 = vpop.f32.mrb[99].mxu0 }
0x401f   : > { %v8582_v1 = vsel %vm1144_vm4, %v8581_v13, -inf }
0x4020   : > { %8583 = vmax.xlane.f32.xlu0 %v8582_v1  ;;  %v9582_v1 = vld [vmem:[%s14918_s12 + $0x1] ss:$0 sm:$0xff] }
0x40ad   : > { %v8584_v2 = vpop.xlane.xlu0 %8583 }
0x40ae   : > { %v8585_v4 = vsub.f32 %v8581_v13, %v8584_v2  ;;  %v9581_v13 = vld [vmem:[%s14917_s11 + $0x1] ss:$0 sm:$0xff] }
0x40b0   : > { %v8586_v15 = vmul.f32 1.442695, %v8585_v4 }
0x40b2   : > { %12372 = vpow2.f32 %v8586_v15  ;;  %v9609_v15 = vld [vmem:[%s14921_s15 + $0xf8] sm:$0xff] }
0x40bc   : > { %v12373_v20 = vpop.eup %12372 }
0x40bd   : > { %v8588_v22 = vsel %vm1144_vm4, %v12373_v20, 0.0 }
0x40be   : > { %8589 = vadd.xlane.f32.xlu1 %v8588_v22  ;;  %v9592_v22 = vld [vmem:[%s14920_s14 + $0x1] ss:$0 sm:$0xff] }
0x414b   : > { %v8590_v23 = vpop.xlane.xlu1 %8589 }
0x414c   : > { %12374 = vrcp.f32 %v8590_v23 }
0x4156   : > { %v12375_v24 = vpop.eup %12374 }
0x4157   : > { %v8592_v25 = vmul.f32 %v12375_v24, %v12373_v20 }
0x4159   : > { %11507 = vmatmul.mubr.msk.f32.vlgmr.msra.gmra.mrb[100].mxu0 %vm1144_vm4, %v8592_v25 }
0x415a   : > { %11510 = vmatpush3.msra.mxu0 %v9575_v14  ;;  %11511 = vmatprep.mubr.msk.f32.mxu0 %vm12444_vm0, %v12445_v11 }
0x415b   : > { %12228 = vmatprep.subr.bf16.mxu0 %v12443_v3 }
0x422c   : > { %v8662_v16 = vpop.f32.mrb[100].mxu0 }
0x422d   : > { %v11508_v17 = vpop.f32.mrb[101].mxu0  ;;  %11512 = vmatmul.mubr.msk.f32.vlgmr.msra.gmra.mrb[102].mxu0 %vm1144_vm4, %v8662_v16  ;;  %v9611_v16 = vld [vmem:[%s14922_s16 + $0x1] ss:$0 sm:$0xff] }
0x422e   : > { %11530 = vmatprep.mubr.msk.f32.mxu0 %vm12444_vm0, %v12445_v11 }
0x4300   : > { %v8737_v18 = vpop.f32.mrb[102].mxu0 }
0x4301   : > { %v8741_v26 = vadd.f32 %v8737_v18, %v8267_v5  ;;  %v11513_v27 = vpop.f32.mrb[103].mxu0  ;;  %v9606_v5 = vld [vmem:[%s14921_s15 + $0xe0] sm:$0xff] }
0x4302   : > { %v12259_v7 = vpack.c.bf16 %v9607_v6, %v9606_v5 }
0x4303   : > { %v8742_v29 = vadd.f32 %v8741_v26, %v13801_v9  ;;  %v9583_v9 = vld [vmem:[%s14919_s13 + $0x40] sm:$0xff] }
0x4304   : > { %v12229_v35 = vpack.c.bf16 %v9584_v34, %v9583_v9  ;;  %12260 = vmatpush3.bf16.msra.mxu1 %v12259_v7 }
0x4305   : > { %v14752_v30 = vadd.f32 %v9578_v28, %v8742_v29  ;;  %12261 = vmatprep.subr.bf16.mxu1 %v12443_v3 }
0x4306   : > { %12230 = vmatpush3.bf16.msra.mxu0 %v12229_v35 }
0x4307   : > { %v8756_v31 = vsel %vm551_vm1, %v14752_v30, 0.0  ;;  %12231 = vmatprep.subr.bf16.mxu0 %v12443_v3 }
0x4308   : > { %8757 = vadd.xlane.f32.xlu0 %v8756_v31 }
0x430a   : > { %12233 = vmatpush3.bf16.msra.mxu0 %v12232_v38 }
0x430b   : > { %12234 = vmatprep.subr.bf16.mxu0 %v12443_v3 }
0x430e   : > { %12236 = vmatpush3.bf16.msra.mxu0 %v12235_v41 }
0x430f   : > { %12237 = vmatprep.subr.bf16.mxu0 %v12443_v3  ;;  %v9608_v3 = vld [vmem:[%s14921_s15 + $0xf0] sm:$0xff] }
0x4310   : > { %v12262_v20 = vpack.c.bf16 %v9609_v15, %v9608_v3 }
0x4312   : > { %12239 = vmatpush3.bf16.msra.mxu0 %v12238_v44  ;;  %12263 = vmatpush3.bf16.msra.mxu1 %v12262_v20 }
0x4395   : > { %v8758_v32 = vpop.xlane.xlu0 %8757 }
0x4396   : > { %v8759_v19 = vmul.f32 0.015625, %v8758_v32 }
0x4398   : > { %v14757_v21 = vsub.f32 %v14752_v30, %v8759_v19 }
0x439a   : > { %v8761_v11 = vmul.f32 %v14757_v21, %v14757_v21 }
0x439c   : > { %v8762_v33 = vsel %vm551_vm1, %v8761_v11, 0.0 }
0x439d   : > { %8763 = vadd.xlane.f32.xlu1 %v8762_v33 }
0x442a   : > { %v8764_v8 = vpop.xlane.xlu1 %8763 }
0x442b   : > { %v8765_v10 = vmul.f32 0.015625, %v8764_v8 }
0x442d   : > { %v8766_v12 = vadd.f32 1e-05, %v8765_v10 }
0x442f   : > { %12376 = vrsqrt.f32 %v8766_v12 }
0x4439   : > { %v12377_v52 = vpop.eup %12376 }
0x443a   : > { %v8768_v0 = vmul.f32 %v12377_v52, %v14757_v21 }
0x443c   : > { %v8775_v2 = vmul.f32 %v9581_v13, %v8768_v0 }
0x443e   : > { %v8782_v4 = vadd.f32 %v9582_v1, %v8775_v2 }
0x4440   : > { %11531 = vmatmul.mubr.msk.f32.vlgmr.msra.gmra.mrb[104].mxu0 %vm551_vm1, %v8782_v4 }
0x4513   : > { %v8869_v23 = vpop.f32.mrb[104].mxu0 }
0x4514   : > { %v8870_v24 = vadd.f32 %v9592_v22, %v8869_v23  ;;  %v11532_v25 = vpop.f32.mrb[105].mxu0 }
0x4516   : > { %v8873_v14 = vmax.f32 %v8870_v24, 0.0 }
0x4518   : > { %11566 = vmatmul.mubr.f32.vlgmr.msra.gmra.mrb[100].mxu1 %v8873_v14 }
0x45eb   : > { %v8965_v17 = vpop.f32.mrb[100].mxu1 }
0x45ec   : > { %v8966_v18 = vadd.f32 %v9611_v16, %v8965_v17  ;;  %v11567_v26 = vpop.f32.mrb[101].mxu1 }
0x45ee   : > { %v8969_v27 = vadd.f32 %v8966_v18, %v14752_v30 }
0x45f0   : > { %8971 = vst.msk [vmem:[%s537_s27 - $0x4] sm:$0xf0] %vm8970_vm5, %v8969_v27 }
0x45f1   : > { %12392 = shalt.err (!%p12389_p3)
}
0x45f2   : > { %s12393_s26 = scalar_lea.hbm %s14864_s1, 64  ;;  %s12397_s29 = scalar_lea.hbm %s14949_s17, 128 }
0x45f3   : > { %p12394_p4 = scmp.ne.s32.totalorder %s14864_s1, %s12393_s26  ;;  %p12398_p9 = scmp.lt.u32.totalorder %s14864_s1, %s14949_s17 }
0x45f4   : > { %p12399_p10 = scmp.lt.u32.totalorder %s12397_s29, %s12393_s26  ;;  %p12401_p12 = scmp.lt.u32.totalorder %s12393_s26, %s14864_s1 }
0x45f5   : > { %p12395_p7 = pnand %p12394_p4, %p12575_p5 }
0x45f6   : > { %p12400_p11 = por %p12399_p10, %p12398_p9 }
0x45f7   : > { %p12396_p8 = pneg %p12395_p7 }
0x45f8   : > { %p12402_p13 = por %p12401_p12, %p12400_p11 }
0x45fa   : > { %p12403_p0 = pnand %p12402_p13, %p12396_p8 }
0x45fc   : > { %12406 = shalt.err (!%p12403_p0)
}
0x45fd   : > { %12264 = dma.vmem_to_hbm [thread:$0]  (%p12575_p5), %s14866_s24, 64, %s14864_s1, %s8973_s30  }
0x45fe PF: > { %s14950_s28 = sld [smem:[#allocation8_spill]]  ;;  %s14951_s20 = sld [smem:[#allocation6_spill]] }
0x4604   : > { %p12270_p1 = scmp.ge.s32.totalorder %s14950_s28, 2  ;;  %s8998_s18 = sand.u32 1, %s14951_s20  }
0x4605   : > { %s8999_s27 = scalar_lea.sflag [#allocation4], %s8998_s18 }
0x4606   : > { %p12267_p2 = pnand %p12270_p1, %p12579_p6 }
0x4608   : > { %12424 = dma.done.wait (!%p12267_p2), %s8999_s27, 64  }
0x4609   : > { %12426 = vsyncadd (!%p12267_p2), %s8999_s27, 4294967232  ;;  %s14953_s27 = sld [smem:[#allocation9_spill]]  ;;  %s14954_s26 = sld [smem:[#allocation7_spill]] }
0x460a   : > { %s14955_s29 = sld [smem:[#allocation10_spill]]  ;;  %s14956_s24 = smov %s12433_s25 }
0x460f   : > { %p27_p3 = scmp.ge.s32.totalorder %s14953_s27, 4   ;;  %s14957_s25 = smov %s14954_s26 }
0x4610   : > { %s14958_s26 = smov %s14955_s29 }
0x4611   :  { %29 = sbr.rel (!%p27_p3) target bundleno = 7 (0x7), region = 198 }
0x4618   :  { %9004 = vsyncpa [#allocation4], 1 }
0x4619   :  { %9006 = vsyncpa [#allocation4 + $0x1], 1 }

</bundles_post_ra>
